<compile_context>
chip_gen: v7x
topology: tpu7x:2x2x1
jax: 0.10.0
libtpu: 0.0.40
codegen_flags: <defaults>
</compile_context>

<pallas_src>
import functools
import math

import jax
import jax.numpy as jnp
from jax import lax
from jax.experimental import pallas as pl
from jax.experimental.pallas import tpu as pltpu

_MASK_VALUE = -1e30     # finite "minus infinity": robust with online softmax


# ------------------------------ small helpers ------------------------------

def _pick_tile(n, max_tile):
    """Largest multiple-of-8 divisor of n that is <= max_tile, else n (full)."""
    if n <= max_tile:
        return n
    start = max_tile - (max_tile % 8)
    for c in range(start, 7, -8):
        if n % c == 0:
            return c
    return n


def _pick_div(n, cap):
    """Largest divisor of n that is <= cap."""
    cap = max(1, min(n, cap))
    for c in range(cap, 0, -1):
        if n % c == 0:
            return c
    return 1


def _mod_const(x, m):
    """int32 modulo by a static positive constant, vector-safe lowering."""
    if m & (m - 1) == 0:                      # power of two -> bitwise and
        return jnp.bitwise_and(x, m - 1)
    q = jnp.floor(x.astype(jnp.float32) / float(m))   # exact for |x| < 2**24
    return x - (q * float(m)).astype(jnp.int32)


def _mm(a, b, dd):
    return jnp.dot(a.astype(dd), b.astype(dd), preferred_element_type=jnp.float32)


# ----------------------------- Pallas kernels ------------------------------

def _linear_kernel(x_ref, w_ref, b_ref, o_ref, *, dot_dtype):
    y = _mm(x_ref[...], w_ref[...], dot_dtype) + b_ref[...]
    o_ref[...] = y.astype(o_ref.dtype)


def linear(x, w, b, *, dot_dtype, out_dtype=jnp.float32, max_rows=512):
    """y = x @ w + b with w already (In, Out) (stored in dot_dtype), b (1, Out)."""
    lead = x.shape[:-1]
    n_in, n_out = w.shape
    x2 = x.reshape(-1, n_in)
    rows = x2.shape[0]
    tile = _pick_tile(rows, max_rows)
    out = pl.pallas_call(
        functools.partial(_linear_kernel, dot_dtype=dot_dtype),
        grid=(rows // tile,),
        in_specs=[pl.BlockSpec((tile, n_in), lambda i: (i, 0)),
                  pl.BlockSpec((n_in, n_out), lambda i: (0, 0)),
                  pl.BlockSpec((1, n_out), lambda i: (0, 0))],
        out_specs=pl.BlockSpec((tile, n_out), lambda i: (i, 0)),
        out_shape=jax.ShapeDtypeStruct((rows, n_out), out_dtype),
        compiler_params=pltpu.CompilerParams(dimension_semantics=("parallel",)),
    )(x2, w, b)
    return out.reshape(*lead, n_out)


def _qkv_kernel(x_ref, w_ref, b_ref, q_ref, k_ref, v_ref, *, dot_dtype):
    y = _mm(x_ref[...], w_ref[...], dot_dtype) + b_ref[...]      # (tile, 3E)
    E = q_ref.shape[-1]
    q_ref[...] = y[:, :E].astype(q_ref.dtype)
    k_ref[...] = y[:, E:2 * E].astype(k_ref.dtype)
    v_ref[...] = y[:, 2 * E:].astype(v_ref.dtype)


def qkv_linear(x, w, b, *, dot_dtype, max_rows=512):
    """Fused QKV projection.  w: (E, 3E) with q columns pre-scaled by 1/sqrt(dh).
    Returns (q, k, v), each with x's leading shape and last dim E, in dot_dtype."""
    lead = x.shape[:-1]
    e_in, e3 = w.shape
    E = e3 // 3
    x2 = x.reshape(-1, e_in)
    rows = x2.shape[0]
    tile = _pick_tile(rows, max_rows)
    q, k, v = pl.pallas_call(
        functools.partial(_qkv_kernel, dot_dtype=dot_dtype),
        grid=(rows // tile,),
        in_specs=[pl.BlockSpec((tile, e_in), lambda i: (i, 0)),
                  pl.BlockSpec((e_in, e3), lambda i: (0, 0)),
                  pl.BlockSpec((1, e3), lambda i: (0, 0))],
        out_specs=(pl.BlockSpec((tile, E), lambda i: (i, 0)),
                   pl.BlockSpec((tile, E), lambda i: (i, 0)),
                   pl.BlockSpec((tile, E), lambda i: (i, 0))),
        out_shape=(jax.ShapeDtypeStruct((rows, E), dot_dtype),
                   jax.ShapeDtypeStruct((rows, E), dot_dtype),
                   jax.ShapeDtypeStruct((rows, E), dot_dtype)),
        compiler_params=pltpu.CompilerParams(dimension_semantics=("parallel",)),
    )(x2, w, b)
    return (q.reshape(*lead, E), k.reshape(*lead, E), v.reshape(*lead, E))


def _ln(y, g, beta):
    mu = jnp.mean(y, axis=-1, keepdims=True)
    yc = y - mu
    var = jnp.mean(yc * yc, axis=-1, keepdims=True)
    return (yc * lax.rsqrt(var + 1e-5)) * g + beta


def _attn_ln_single_kernel(q_ref, k_ref, v_ref, xres_ref, wo_ref, bo_ref,
                           g_ref, beta_ref, o_ref, *,
                           num_heads, masked, num_joints, dot_dtype):
    """Single-KV-tile fast path: whole sequence in one block, no online softmax."""
    q = q_ref[0]
    k = k_ref[0]
    v = v_ref[0]
    S, E = q.shape
    dh = E // num_heads

    keep = None
    if masked:
        qg = lax.broadcasted_iota(jnp.int32, (S, 1), 0)
        kg = lax.broadcasted_iota(jnp.int32, (1, S), 1)
        keep = (qg >= kg) & (_mod_const(qg, num_joints) == _mod_const(kg, num_joints))

    parts = []
    for h in range(num_heads):
        sl = slice(h * dh, (h + 1) * dh)
        s = lax.dot_general(q[:, sl].astype(dot_dtype), k[:, sl].astype(dot_dtype),
                            (((1,), (1,)), ((), ())),
                            preferred_element_type=jnp.float32)        # (S, S)
        if masked:
            s = jnp.where(keep, s, _MASK_VALUE)
        m = jnp.max(s, axis=-1, keepdims=True)
        p = jnp.exp(s - m)
        l = jnp.sum(p, axis=-1, keepdims=True)
        ctx_h = _mm(p, v[:, sl], dot_dtype)                            # (S, dh)
        parts.append(ctx_h * pl.reciprocal(l, approx=True))
    ctx = parts[0] if num_heads == 1 else jnp.concatenate(parts, axis=-1)

    y = xres_ref[0] + _mm(ctx, wo_ref[...], dot_dtype) + bo_ref[...]
    o_ref[0] = _ln(y, g_ref[...], beta_ref[...]).astype(o_ref.dtype)


def _attn_ln_multi_kernel(q_ref, k_ref, v_ref, xres_ref, wo_ref, bo_ref,
                          g_ref, beta_ref, o_ref, m_sc, l_sc, acc_sc, *,
                          num_heads, masked, num_joints, dot_dtype):
    """Online-softmax path.  Grid = (batch, q_tile, kv_tile)."""
    qi = pl.program_id(1)
    ki = pl.program_id(2)
    nk = pl.num_programs(2)
    tq = q_ref.shape[1]
    tk = k_ref.shape[1]
    E = q_ref.shape[2]
    dh = E // num_heads

    @pl.when(ki == 0)
    def _():
        m_sc[...] = jnp.full(m_sc.shape, _MASK_VALUE, m_sc.dtype)
        l_sc[...] = jnp.zeros(l_sc.shape, l_sc.dtype)
        acc_sc[...] = jnp.zeros(acc_sc.shape, acc_sc.dtype)

    def compute():
        q = q_ref[0]
        k = k_ref[0]
        v = v_ref[0]
        keep = None
        if masked:
            qg = qi * tq + lax.broadcasted_iota(jnp.int32, (tq, 1), 0)
            kg = ki * tk + lax.broadcasted_iota(jnp.int32, (1, tk), 1)
            keep = (qg >= kg) & (_mod_const(qg, num_joints) == _mod_const(kg, num_joints))
        for h in range(num_heads):
            sl = slice(h * dh, (h + 1) * dh)
            s = lax.dot_general(q[:, sl].astype(dot_dtype), k[:, sl].astype(dot_dtype),
                                (((1,), (1,)), ((), ())),
                                preferred_element_type=jnp.float32)    # (tq, tk)
            if masked:
                s = jnp.where(keep, s, _MASK_VALUE)
            m_prev = m_sc[h]                                           # (tq, 1)
            m_new = jnp.maximum(m_prev, jnp.max(s, axis=-1, keepdims=True))
            alpha = jnp.exp(m_prev - m_new)
            p = jnp.exp(s - m_new)
            l_sc[h] = alpha * l_sc[h] + jnp.sum(p, axis=-1, keepdims=True)
            acc_sc[h] = alpha * acc_sc[h] + _mm(p, v[:, sl], dot_dtype)
            m_sc[h] = m_new

    if masked:
        # causal block skip: KV tiles strictly above the diagonal are fully
        # masked -> skip all compute (the DMA still happens, which is fine).
        pl.when(ki * tk <= qi * tq + (tq - 1))(compute)
    else:
        compute()

    @pl.when(ki == nk - 1)
    def _():
        parts = []
        for h in range(num_heads):
            inv = pl.reciprocal(l_sc[h], approx=True)
            parts.append(acc_sc[h] * inv)
        ctx = parts[0] if num_heads == 1 else jnp.concatenate(parts, axis=-1)
        y = xres_ref[0] + _mm(ctx, wo_ref[...], dot_dtype) + bo_ref[...]
        o_ref[0] = _ln(y, g_ref[...], beta_ref[...]).astype(o_ref.dtype)


def attn_layernorm(qkv, xres, ap, *, masked, num_heads, num_joints=1,
                   dot_dtype, max_tile=256):
    """LayerNorm(xres + MultiheadSelfAttention) with q/k/v precomputed.

    qkv:  tuple of (B, S, E) arrays (q already scaled by 1/sqrt(dh)).
    xres: (B, S, E) residual / LayerNorm input.  Returns (B, S, E) float32.
    """
    q, k, v = qkv
    B, S, E = xres.shape
    dh = E // num_heads
    tile = _pick_tile(S, max_tile)
    nt = S // tile

    if nt == 1:
        kernel = functools.partial(_attn_ln_single_kernel, num_heads=num_heads,
                                   masked=masked, num_joints=num_joints,
                                   dot_dtype=dot_dtype)
        return pl.pallas_call(
            kernel,
            grid=(B,),
            in_specs=[
                pl.BlockSpec((1, S, E), lambda b: (b, 0, 0)),   # q
                pl.BlockSpec((1, S, E), lambda b: (b, 0, 0)),   # k
                pl.BlockSpec((1, S, E), lambda b: (b, 0, 0)),   # v
                pl.BlockSpec((1, S, E), lambda b: (b, 0, 0)),   # residual
                pl.BlockSpec((E, E), lambda b: (0, 0)),         # wo
                pl.BlockSpec((1, E), lambda b: (0, 0)),         # bo
                pl.BlockSpec((1, E), lambda b: (0, 0)),         # ln gamma
                pl.BlockSpec((1, E), lambda b: (0, 0)),         # ln beta
            ],
            out_specs=pl.BlockSpec((1, S, E), lambda b: (b, 0, 0)),
            out_shape=jax.ShapeDtypeStruct((B, S, E), xres.dtype),
            compiler_params=pltpu.CompilerParams(dimension_semantics=("parallel",)),
        )(q, k, v, xres, ap["wo"], ap["bo"], ap["ln_g"], ap["ln_b"])

    kernel = functools.partial(_attn_ln_multi_kernel, num_heads=num_heads,
                               masked=masked, num_joints=num_joints,
                               dot_dtype=dot_dtype)
    return pl.pallas_call(
        kernel,
        grid=(B, nt, nt),
        in_specs=[
            pl.BlockSpec((1, tile, E), lambda b, qi, ki: (b, qi, 0)),   # q
            pl.BlockSpec((1, tile, E), lambda b, qi, ki: (b, ki, 0)),   # k
            pl.BlockSpec((1, tile, E), lambda b, qi, ki: (b, ki, 0)),   # v
            pl.BlockSpec((1, tile, E), lambda b, qi, ki: (b, qi, 0)),   # residual
            pl.BlockSpec((E, E), lambda b, qi, ki: (0, 0)),
            pl.BlockSpec((1, E), lambda b, qi, ki: (0, 0)),
            pl.BlockSpec((1, E), lambda b, qi, ki: (0, 0)),
            pl.BlockSpec((1, E), lambda b, qi, ki: (0, 0)),
        ],
        out_specs=pl.BlockSpec((1, tile, E), lambda b, qi, ki: (b, qi, 0)),
        out_shape=jax.ShapeDtypeStruct((B, S, E), xres.dtype),
        scratch_shapes=[
            pltpu.VMEM((num_heads, tile, 1), jnp.float32),    # running max
            pltpu.VMEM((num_heads, tile, 1), jnp.float32),    # running denom
            pltpu.VMEM((num_heads, tile, dh), jnp.float32),   # per-head context acc
        ],
        compiler_params=pltpu.CompilerParams(
            dimension_semantics=("parallel", "parallel", "arbitrary")),
    )(q, k, v, xres, ap["wo"], ap["bo"], ap["ln_g"], ap["ln_b"])


def _ffn_kernel(x_ref, sp_ref, w1_ref, b1_ref, w2_ref, b2_ref, o_ref, *,
                t, dot_dtype):
    Wn = x_ref.shape[1]
    fmask = lax.broadcasted_iota(jnp.int32, (Wn, 1), 0) == t
    for r in range(x_ref.shape[0]):                     # short static unroll
        x = x_ref[r]                                    # (W, E)
        # temporal_output[t] += spatial_output, folded in (frame-t rows only)
        x = jnp.where(fmask, x + sp_ref[r], x)
        h = _mm(x, w1_ref[...], dot_dtype) + b1_ref[...]
        # relu, then `ffn + ffn_dropout(ffn)` with dropout = identity  ->  * 2
        h = jnp.maximum(h, 0.0) * 2.0
        y = _mm(h, w2_ref[...], dot_dtype) + b2_ref[...]
        o_ref[r] = y.astype(o_ref.dtype)


def fused_ffn(x, sp, w1, b1, w2, b2, *, t, dot_dtype, max_block_rows=256):
    """Fused FFN over x (B*J, W, E); sp (B*J, 1, E) is added at frame t first."""
    BJ, W, E = x.shape
    F = w1.shape[1]
    bjt = _pick_div(BJ, min(8, max(1, max_block_rows // max(W, 1))))
    return pl.pallas_call(
        functools.partial(_ffn_kernel, t=t, dot_dtype=dot_dtype),
        grid=(BJ // bjt,),
        in_specs=[
            pl.BlockSpec((bjt, W, E), lambda i: (i, 0, 0)),
            pl.BlockSpec((bjt, 1, E), lambda i: (i, 0, 0)),
            pl.BlockSpec((E, F), lambda i: (0, 0)),
            pl.BlockSpec((1, F), lambda i: (0, 0)),
            pl.BlockSpec((F, E), lambda i: (0, 0)),
            pl.BlockSpec((1, E), lambda i: (0, 0)),
        ],
        out_specs=pl.BlockSpec((bjt, W, E), lambda i: (i, 0, 0)),
        out_shape=jax.ShapeDtypeStruct((BJ, W, E), x.dtype),
        compiler_params=pltpu.CompilerParams(dimension_semantics=("parallel",)),
    )(x, sp, w1, b1, w2, b2)


# ------------------------------- model glue --------------------------------

def positional_encoding(length, d_model, dtype=jnp.float32):
    pos = jnp.arange(length, dtype=jnp.float32)[:, None]
    div = jnp.exp(jnp.arange(0, d_model, 2, dtype=jnp.float32)
                  * (-math.log(10000.0) / d_model))
    pe = jnp.zeros((length, d_model), jnp.float32)
    pe = pe.at[:, 0::2].set(jnp.sin(pos * div))
    pe = pe.at[:, 1::2].set(jnp.cos(pos * div))
    return pe.astype(dtype)


def st_transformer_layer(x, p, t, num_heads, dot_dtype, attn_max_tile):
    """x: (B, J, W, E) canonical layout; t: frame index (static python int)."""
    B, J, W, E = x.shape
    S = J * W
    x_flat = x.reshape(B, S, E)                        # joint-major flatten (free)

    # temporal attention over the flattened (joint, time) sequence with the
    # torch flattened mask, fused with residual + temporal_norm.
    qkv_t = qkv_linear(x_flat, p["tp"]["w_in"], p["tp"]["b_in"], dot_dtype=dot_dtype)
    tn = attn_layernorm(qkv_t, x_flat, p["tp"], masked=True, num_joints=J,
                        num_heads=num_heads, dot_dtype=dot_dtype,
                        max_tile=attn_max_tile)                          # (B, S, E)

    # spatial attention over joints at frame t (single-KV-tile fast path),
    # fused with residual + spatial_norm.
    xs = x[:, :, t, :]                                                   # (B, J, E)
    qkv_s = qkv_linear(xs, p["sp"]["w_in"], p["sp"]["b_in"], dot_dtype=dot_dtype)
    sp = attn_layernorm(qkv_s, xs, p["sp"], masked=False,
                        num_heads=num_heads, dot_dtype=dot_dtype,
                        max_tile=attn_max_tile)                          # (B, J, E)

    # fused FFN; spatial residual at frame t is folded in (no extra HBM pass)
    y = fused_ffn(tn.reshape(B * J, W, E), sp.reshape(B * J, 1, E),
                  p["ffn_w"], p["ffn_b"], p["ffn_inv_w"], p["ffn_inv_b"],
                  t=t, dot_dtype=dot_dtype)
    return y.reshape(B, J, W, E)


def st_transformer_forward(src, t, params, cfg, *, dot_dtype=jnp.bfloat16,
                           attn_max_tile=256):
    """Training-branch forward.  src: (batch, total_time, input_dim)."""
    B, T, D = src.shape
    W, J, H = cfg["window"], cfg["num_joints"], cfg["hidden_dim"]
    heads = cfg["attention_heads"]

    # sliding-window inputs, batch-major; torch's .double() mapped to float32
    n = min(W, T)
    inputs = jnp.zeros((B, W, D), jnp.float32)
    inputs = inputs.at[:, :n, :].set(src[:, max(0, T - W):T, :].astype(jnp.float32))

    # joint embedding + positional encoding (dropout layers are identity)
    emb = linear(inputs.reshape(B * W, D), params["emb_w"], params["emb_b"],
                 dot_dtype=dot_dtype).reshape(B, W, J * H)
    emb = emb + params["pos_enc"][None, :, :]

    # canonical (B, J, W, H) layout: the temporal joint-major flatten and the
    # FFN (B*J, W, H) view are free reshapes; no per-layer transposes.
    x = emb.reshape(B, W, J, H).transpose(0, 2, 1, 3)

    wt = min(W - 1, t)
    for lp in params["layers"]:
        x = st_transformer_layer(x, lp, wt, heads, dot_dtype, attn_max_tile)

    # project_to_output is a per-frame linear; only frame wt is needed.
    xt = x[:, :, wt, :].reshape(B * J, H)
    proj = linear(xt, params["proj_w"], params["proj_b"],
                  dot_dtype=dot_dtype).reshape(B, D)
    out = proj + src[:, t, :].astype(jnp.float32)      # residual from input
    return out.T                                       # torch .transpose(0, 1)
    # TODO(synk): the autoregressive eval branch (self.training == False) is a
    # host-side loop over this same stack and is not implemented here.


# ------------------------------- parameters --------------------------------

def _normal(key, shape, scale=0.05):
    return scale * jax.random.normal(key, shape, jnp.float32)


def init_params(key, cfg):
    """Raw parameters in torch layout (nn.Linear / MHA in_proj: (Out, In))."""
    D, H, J = cfg["input_dim"], cfg["hidden_dim"], cfg["num_joints"]
    F = cfg["feedforward_size"]
    keys = iter(jax.random.split(key, 64))
    params = {
        "emb_w": _normal(next(keys), (H * J, D)),
        "emb_b": jnp.zeros((H * J,), jnp.float32),
        "proj_w": _normal(next(keys), (D // J, H)),
        "proj_b": jnp.zeros((D // J,), jnp.float32),
        "layers": [],
    }
    for _ in range(cfg["num_layers"]):
        params["layers"].append({
            "sp_in_w": _normal(next(keys), (3 * H, H)),
            "sp_in_b": jnp.zeros((3 * H,), jnp.float32),
            "sp_out_w": _normal(next(keys), (H, H)),
            "sp_out_b": jnp.zeros((H,), jnp.float32),
            "sp_ln_g": jnp.ones((H,), jnp.float32),
            "sp_ln_b": jnp.zeros((H,), jnp.float32),
            "tp_in_w": _normal(next(keys), (3 * H, H)),
            "tp_in_b": jnp.zeros((3 * H,), jnp.float32),
            "tp_out_w": _normal(next(keys), (H, H)),
            "tp_out_b": jnp.zeros((H,), jnp.float32),
            "tp_ln_g": jnp.ones((H,), jnp.float32),
            "tp_ln_b": jnp.zeros((H,), jnp.float32),
            "ffn_w": _normal(next(keys), (F, H)),
            "ffn_b": jnp.zeros((F,), jnp.float32),
            "ffn_inv_w": _normal(next(keys), (H, F)),
            "ffn_inv_b": jnp.zeros((H,), jnp.float32),
            # TODO(synk): ffn_norm is declared in the torch module but never
            # used in forward, so it is intentionally omitted here.
        })
    return params


def _prep_attention(in_w, in_b, out_w, out_b, ln_g, ln_b, num_heads, dd):
    """Pre-transpose MHA weights; fold 1/sqrt(dh) into the q columns; cast to dd."""
    E = out_w.shape[0]
    dh = E // num_heads
    scale = 1.0 / math.sqrt(dh)
    w_in = in_w.T                                # (E, 3E), columns = [q | k | v]
    w_in = w_in.at[:, :E].multiply(scale)
    b_in = in_b.at[:E].multiply(scale)
    return {
        "w_in": w_in.astype(dd),
        "b_in": b_in.reshape(1, 3 * E).astype(jnp.float32),
        "wo": out_w.T.astype(dd),
        "bo": out_b.reshape(1, E).astype(jnp.float32),
        "ln_g": ln_g.reshape(1, E).astype(jnp.float32),
        "ln_b": ln_b.reshape(1, E).astype(jnp.float32),
    }


def prepare_params(raw, cfg, dot_dtype=jnp.bfloat16):
    """Convert torch-layout params to kernel layout once (weights stored in
    dot_dtype so no per-grid-step casts; biases / LN params stay float32)."""
    D, H, J = cfg["input_dim"], cfg["hidden_dim"], cfg["num_joints"]
    F, W = cfg["feedforward_size"], cfg["window"]
    heads = cfg["attention_heads"]
    dd = dot_dtype
    out = {
        "emb_w": raw["emb_w"].T.astype(dd),                 # (D, J*H)
        "emb_b": raw["emb_b"].reshape(1, H * J).astype(jnp.float32),
        "pos_enc": positional_encoding(W, H * J),
        "proj_w": raw["proj_w"].T.astype(dd),               # (H, D//J)
        "proj_b": raw["proj_b"].reshape(1, D // J).astype(jnp.float32),
        "layers": [],
    }
    for lp in raw["layers"]:
        out["layers"].append({
            "sp": _prep_attention(lp["sp_in_w"], lp["sp_in_b"], lp["sp_out_w"],
                                  lp["sp_out_b"], lp["sp_ln_g"], lp["sp_ln_b"],
                                  heads, dd),
            "tp": _prep_attention(lp["tp_in_w"], lp["tp_in_b"], lp["tp_out_w"],
                                  lp["tp_out_b"], lp["tp_ln_g"], lp["tp_ln_b"],
                                  heads, dd),
            "ffn_w": lp["ffn_w"].T.astype(dd),              # (H, F)
            "ffn_b": lp["ffn_b"].reshape(1, F).astype(jnp.float32),
            "ffn_inv_w": lp["ffn_inv_w"].T.astype(dd),      # (F, H)
            "ffn_inv_b": lp["ffn_inv_b"].reshape(1, H).astype(jnp.float32),
        })
    return out


if __name__ == "__main__":
    cfg = dict(input_dim=12, hidden_dim=32, num_layers=2, attention_heads=4,
               feedforward_size=64, num_joints=4, window=8)
    key = jax.random.PRNGKey(0)
    pkey, xkey = jax.random.split(key)
    raw_params = init_params(pkey, cfg)
    params = prepare_params(raw_params, cfg, dot_dtype=jnp.bfloat16)

    batch, total_time, t = 2, 10, 5
    src = jax.random.normal(xkey, (batch, total_time, cfg["input_dim"]), jnp.float32)

    @functools.partial(jax.jit, static_argnums=(1, 3))
    def fwd(src_, t_, params_, attn_max_tile):
        return st_transformer_forward(src_, t_, params_, cfg,
                                      dot_dtype=jnp.bfloat16,
                                      attn_max_tile=attn_max_tile)

    # 1) single-KV-tile fast path (temporal S = J*W = 32 fits in one tile)
    out1 = jax.block_until_ready(fwd(src, t, params, 256))
    # 2) force the multi-tile online-softmax + causal-block-skip path (tile = 8)
    out2 = jax.block_until_ready(fwd(src, t, params, 8))

    assert out1.shape == (cfg["input_dim"], batch), out1.shape
    assert bool(jnp.all(jnp.isfinite(out1)))
    assert bool(jnp.all(jnp.isfinite(out2)))
    # both tilings must agree (same math, different softmax tiling / fp order)
    assert bool(jnp.allclose(out1, out2, rtol=5e-2, atol=5e-2)), (
        float(jnp.max(jnp.abs(out1 - out2))))
    print("KERNEL_OK")
</pallas_src>

<mosaic_0001>
module attributes {stable_mosaic.version = 11 : i64} {
  func.func @_linear_kernel(%arg0: i32, %arg1: memref<16x12xf32, #tpu.memory_space<vmem>>, %arg2: memref<12x128xbf16, #tpu.memory_space<vmem>>, %arg3: memref<1x128xf32, #tpu.memory_space<vmem>>, %arg4: memref<16x128xf32, #tpu.memory_space<vmem>>) attributes {dimension_semantics = [#tpu.dimension_semantics<parallel>], iteration_bounds = array<i64: 1>, scalar_prefetch = 0 : i64, scratch_operands = 0 : i64, tpu.core_type = #tpu.core_type<tc>, window_params = [{transform_indices = @transform_0, window_bounds = array<i64: 16, 12>}, {pipeline_mode = #tpu.pipeline_mode<synchronous>, transform_indices = @transform_1, window_bounds = array<i64: 12, 128>}, {pipeline_mode = #tpu.pipeline_mode<synchronous>, transform_indices = @transform_2, window_bounds = array<i64: 1, 128>}, {transform_indices = @transform_3, window_bounds = array<i64: 16, 128>}]} {
    %c0 = arith.constant 0 : index
    %c0_0 = arith.constant 0 : index
    %0 = vector.load %arg1[%c0, %c0_0] : memref<16x12xf32, #tpu.memory_space<vmem>>, vector<16x12xf32>
    %c0_1 = arith.constant 0 : index
    %c0_2 = arith.constant 0 : index
    %1 = vector.load %arg2[%c0_1, %c0_2] : memref<12x128xbf16, #tpu.memory_space<vmem>>, vector<12x128xbf16>
    %2 = arith.truncf %0 : vector<16x12xf32> to vector<16x12xbf16>
    %cst = arith.constant dense<0.000000e+00> : vector<16x128xf32>
    %3 = tpu.matmul %2, %1, %cst {dimension_numbers = #tpu.dot_dimension_numbers<[1], [0], [0], [1], [0, 0, 1, 1], [], []>} : vector<16x12xbf16>, vector<12x128xbf16>, vector<16x128xf32> -> vector<16x128xf32>
    %c0_3 = arith.constant 0 : index
    %c0_4 = arith.constant 0 : index
    %4 = vector.load %arg3[%c0_3, %c0_4] : memref<1x128xf32, #tpu.memory_space<vmem>>, vector<1x128xf32>
    %5 = vector.broadcast %4 : vector<1x128xf32> to vector<16x128xf32>
    %6 = arith.addf %3, %5 : vector<16x128xf32>
    %c0_5 = arith.constant 0 : index
    %c0_6 = arith.constant 0 : index
    %7 = vector.load %arg4[%c0_5, %c0_6] : memref<16x128xf32, #tpu.memory_space<vmem>>, vector<16x128xf32>
    tpu.vector_store %arg4[%c0_5, %c0_6], %6 {strides = array<i32>} : memref<16x128xf32, #tpu.memory_space<vmem>>, vector<16x128xf32>,
    return
  }
  func.func @transform_0(%arg0: i32) -> (i32, i32) {
    %c0_i32 = arith.constant 0 : i32
    %c0_i32_0 = arith.constant 0 : i32
    return %arg0, %c0_i32 : i32, i32
  }
  func.func @transform_1(%arg0: i32) -> (i32, i32) {
    %c0_i32 = arith.constant 0 : i32
    %c0_i32_0 = arith.constant 0 : i32
    %c0_i32_1 = arith.constant 0 : i32
    return %c0_i32, %c0_i32_0 : i32, i32
  }
  func.func @transform_2(%arg0: i32) -> (i32, i32) {
    %c0_i32 = arith.constant 0 : i32
    %c0_i32_0 = arith.constant 0 : i32
    %c0_i32_1 = arith.constant 0 : i32
    return %c0_i32, %c0_i32_0 : i32, i32
  }
  func.func @transform_3(%arg0: i32) -> (i32, i32) {
    %c0_i32 = arith.constant 0 : i32
    %c0_i32_0 = arith.constant 0 : i32
    return %arg0, %c0_i32 : i32, i32
  }
}

module attributes {stable_mosaic.version = 11 : i64} {
  func.func @_qkv_kernel(%arg0: i32, %arg1: memref<8x32xf32, #tpu.memory_space<vmem>>, %arg2: memref<32x96xbf16, #tpu.memory_space<vmem>>, %arg3: memref<1x96xf32, #tpu.memory_space<vmem>>, %arg4: memref<8x32xbf16, #tpu.memory_space<vmem>>, %arg5: memref<8x32xbf16, #tpu.memory_space<vmem>>, %arg6: memref<8x32xbf16, #tpu.memory_space<vmem>>) attributes {dimension_semantics = [#tpu.dimension_semantics<parallel>], iteration_bounds = array<i64: 1>, scalar_prefetch = 0 : i64, scratch_operands = 0 : i64, tpu.core_type = #tpu.core_type<tc>, window_params = [{transform_indices = @transform_0, window_bounds = array<i64: 8, 32>}, {pipeline_mode = #tpu.pipeline_mode<synchronous>, transform_indices = @transform_1, window_bounds = array<i64: 32, 96>}, {pipeline_mode = #tpu.pipeline_mode<synchronous>, transform_indices = @transform_2, window_bounds = array<i64: 1, 96>}, {transform_indices = @transform_3, window_bounds = array<i64: 8, 32>}, {transform_indices = @transform_4, window_bounds = array<i64: 8, 32>}, {transform_indices = @transform_5, window_bounds = array<i64: 8, 32>}]} {
    %c0 = arith.constant 0 : index
    %c0_0 = arith.constant 0 : index
    %0 = vector.load %arg1[%c0, %c0_0] : memref<8x32xf32, #tpu.memory_space<vmem>>, vector<8x32xf32>
    %c0_1 = arith.constant 0 : index
    %c0_2 = arith.constant 0 : index
    %1 = vector.load %arg2[%c0_1, %c0_2] : memref<32x96xbf16, #tpu.memory_space<vmem>>, vector<32x96xbf16>
    %2 = arith.truncf %0 : vector<8x32xf32> to vector<8x32xbf16>
    %cst = arith.constant dense<0.000000e+00> : vector<8x96xf32>
    %3 = tpu.matmul %2, %1, %cst {dimension_numbers = #tpu.dot_dimension_numbers<[1], [0], [0], [1], [0, 0, 1, 1], [], []>} : vector<8x32xbf16>, vector<32x96xbf16>, vector<8x96xf32> -> vector<8x96xf32>
    %c0_3 = arith.constant 0 : index
    %c0_4 = arith.constant 0 : index
    %4 = vector.load %arg3[%c0_3, %c0_4] : memref<1x96xf32, #tpu.memory_space<vmem>>, vector<1x96xf32>
    %5 = vector.broadcast %4 : vector<1x96xf32> to vector<8x96xf32>
    %6 = arith.addf %3, %5 : vector<8x96xf32>
    %7 = vector.extract_strided_slice %6 {offsets = [0, 0], sizes = [8, 32], strides = [1, 1]} : vector<8x96xf32> to vector<8x32xf32>
    %8 = arith.truncf %7 : vector<8x32xf32> to vector<8x32xbf16>
    %c0_5 = arith.constant 0 : index
    %c0_6 = arith.constant 0 : index
    %9 = vector.load %arg4[%c0_5, %c0_6] : memref<8x32xbf16, #tpu.memory_space<vmem>>, vector<8x32xbf16>
    tpu.vector_store %arg4[%c0_5, %c0_6], %8 {strides = array<i32>} : memref<8x32xbf16, #tpu.memory_space<vmem>>, vector<8x32xbf16>,
    %10 = vector.extract_strided_slice %6 {offsets = [0, 32], sizes = [8, 32], strides = [1, 1]} : vector<8x96xf32> to vector<8x32xf32>
    %11 = arith.truncf %10 : vector<8x32xf32> to vector<8x32xbf16>
    %c0_7 = arith.constant 0 : index
    %c0_8 = arith.constant 0 : index
    %12 = vector.load %arg5[%c0_7, %c0_8] : memref<8x32xbf16, #tpu.memory_space<vmem>>, vector<8x32xbf16>
    tpu.vector_store %arg5[%c0_7, %c0_8], %11 {strides = array<i32>} : memref<8x32xbf16, #tpu.memory_space<vmem>>, vector<8x32xbf16>,
    %13 = vector.extract_strided_slice %6 {offsets = [0, 64], sizes = [8, 32], strides = [1, 1]} : vector<8x96xf32> to vector<8x32xf32>
    %14 = arith.truncf %13 : vector<8x32xf32> to vector<8x32xbf16>
    %c0_9 = arith.constant 0 : index
    %c0_10 = arith.constant 0 : index
    %15 = vector.load %arg6[%c0_9, %c0_10] : memref<8x32xbf16, #tpu.memory_space<vmem>>, vector<8x32xbf16>
    tpu.vector_store %arg6[%c0_9, %c0_10], %14 {strides = array<i32>} : memref<8x32xbf16, #tpu.memory_space<vmem>>, vector<8x32xbf16>,
    return
  }
  func.func @transform_0(%arg0: i32) -> (i32, i32) {
    %c0_i32 = arith.constant 0 : i32
    %c0_i32_0 = arith.constant 0 : i32
    return %arg0, %c0_i32 : i32, i32
  }
  func.func @transform_1(%arg0: i32) -> (i32, i32) {
    %c0_i32 = arith.constant 0 : i32
    %c0_i32_0 = arith.constant 0 : i32
    %c0_i32_1 = arith.constant 0 : i32
    return %c0_i32, %c0_i32_0 : i32, i32
  }
  func.func @transform_2(%arg0: i32) -> (i32, i32) {
    %c0_i32 = arith.constant 0 : i32
    %c0_i32_0 = arith.constant 0 : i32
    %c0_i32_1 = arith.constant 0 : i32
    return %c0_i32, %c0_i32_0 : i32, i32
  }
  func.func @transform_3(%arg0: i32) -> (i32, i32) {
    %c0_i32 = arith.constant 0 : i32
    %c0_i32_0 = arith.constant 0 : i32
    return %arg0, %c0_i32 : i32, i32
  }
  func.func @transform_4(%arg0: i32) -> (i32, i32) {
    %c0_i32 = arith.constant 0 : i32
    %c0_i32_0 = arith.constant 0 : i32
    return %arg0, %c0_i32 : i32, i32
  }
  func.func @transform_5(%arg0: i32) -> (i32, i32) {
    %c0_i32 = arith.constant 0 : i32
    %c0_i32_0 = arith.constant 0 : i32
    return %arg0, %c0_i32 : i32, i32
  }
}

module attributes {stable_mosaic.version = 11 : i64} {
  func.func @_attn_ln_single_kernel(%arg0: i32, %arg1: memref<1x4x32xbf16, #tpu.memory_space<vmem>>, %arg2: memref<1x4x32xbf16, #tpu.memory_space<vmem>>, %arg3: memref<1x4x32xbf16, #tpu.memory_space<vmem>>, %arg4: memref<1x4x32xf32, #tpu.memory_space<vmem>>, %arg5: memref<32x32xbf16, #tpu.memory_space<vmem>>, %arg6: memref<1x32xf32, #tpu.memory_space<vmem>>, %arg7: memref<1x32xf32, #tpu.memory_space<vmem>>, %arg8: memref<1x32xf32, #tpu.memory_space<vmem>>, %arg9: memref<1x4x32xf32, #tpu.memory_space<vmem>>) attributes {dimension_semantics = [#tpu.dimension_semantics<parallel>], iteration_bounds = array<i64: 2>, scalar_prefetch = 0 : i64, scratch_operands = 0 : i64, tpu.core_type = #tpu.core_type<tc>, window_params = [{transform_indices = @transform_0, window_bounds = array<i64: 1, 4, 32>}, {transform_indices = @transform_1, window_bounds = array<i64: 1, 4, 32>}, {transform_indices = @transform_2, window_bounds = array<i64: 1, 4, 32>}, {transform_indices = @transform_3, window_bounds = array<i64: 1, 4, 32>}, {pipeline_mode = #tpu.pipeline_mode<synchronous>, transform_indices = @transform_4, window_bounds = array<i64: 32, 32>}, {pipeline_mode = #tpu.pipeline_mode<synchronous>, transform_indices = @transform_5, window_bounds = array<i64: 1, 32>}, {pipeline_mode = #tpu.pipeline_mode<synchronous>, transform_indices = @transform_6, window_bounds = array<i64: 1, 32>}, {pipeline_mode = #tpu.pipeline_mode<synchronous>, transform_indices = @transform_7, window_bounds = array<i64: 1, 32>}, {transform_indices = @transform_8, window_bounds = array<i64: 1, 4, 32>}]} {
    %c0 = arith.constant 0 : index
    %c0_0 = arith.constant 0 : index
    %c0_1 = arith.constant 0 : index
    %0 = vector.load %arg1[%c0, %c0_0, %c0_1] : memref<1x4x32xbf16, #tpu.memory_space<vmem>>, vector<1x4x32xbf16>
    %1 = vector.shape_cast %0 : vector<1x4x32xbf16> to vector<4x32xbf16>
    %c0_2 = arith.constant 0 : index
    %c0_3 = arith.constant 0 : index
    %c0_4 = arith.constant 0 : index
    %2 = vector.load %arg2[%c0_2, %c0_3, %c0_4] : memref<1x4x32xbf16, #tpu.memory_space<vmem>>, vector<1x4x32xbf16>
    %3 = vector.shape_cast %2 : vector<1x4x32xbf16> to vector<4x32xbf16>
    %c0_5 = arith.constant 0 : index
    %c0_6 = arith.constant 0 : index
    %c0_7 = arith.constant 0 : index
    %4 = vector.load %arg3[%c0_5, %c0_6, %c0_7] : memref<1x4x32xbf16, #tpu.memory_space<vmem>>, vector<1x4x32xbf16>
    %5 = vector.shape_cast %4 : vector<1x4x32xbf16> to vector<4x32xbf16>
    %6 = vector.extract_strided_slice %1 {offsets = [0, 0], sizes = [4, 8], strides = [1, 1]} : vector<4x32xbf16> to vector<4x8xbf16>
    %7 = vector.extract_strided_slice %3 {offsets = [0, 0], sizes = [4, 8], strides = [1, 1]} : vector<4x32xbf16> to vector<4x8xbf16>
    %cst = arith.constant dense<0.000000e+00> : vector<4x4xf32>
    %8 = tpu.matmul %6, %7, %cst {dimension_numbers = #tpu.dot_dimension_numbers<[1], [1], [0], [0], [0, 0, 1, 0], [], []>} : vector<4x8xbf16>, vector<4x8xbf16>, vector<4x4xf32> -> vector<4x4xf32>
    %cst_8 = arith.constant dense<0xFF800000> : vector<4xf32>
    %9 = vector.multi_reduction <maximumf>, %8, %cst_8 [1] : vector<4x4xf32> to vector<4xf32>
    %10 = vector.shape_cast %9 : vector<4xf32> to vector<4x1xf32>
    %11 = vector.broadcast %10 : vector<4x1xf32> to vector<4x4xf32>
    %12 = arith.subf %8, %11 : vector<4x4xf32>
    %13 = math.exp %12 : vector<4x4xf32>
    %cst_9 = arith.constant dense<0.000000e+00> : vector<4xf32>
    %14 = vector.multi_reduction <add>, %13, %cst_9 [1] : vector<4x4xf32> to vector<4xf32>
    %15 = vector.shape_cast %14 : vector<4xf32> to vector<4x1xf32>
    %16 = vector.extract_strided_slice %5 {offsets = [0, 0], sizes = [4, 8], strides = [1, 1]} : vector<4x32xbf16> to vector<4x8xbf16>
    %17 = arith.truncf %13 : vector<4x4xf32> to vector<4x4xbf16>
    %cst_10 = arith.constant dense<0.000000e+00> : vector<4x8xf32>
    %18 = tpu.matmul %17, %16, %cst_10 {dimension_numbers = #tpu.dot_dimension_numbers<[1], [0], [0], [1], [0, 0, 1, 1], [], []>} : vector<4x4xbf16>, vector<4x8xbf16>, vector<4x8xf32> -> vector<4x8xf32>
    %19 = tpu.reciprocal %15 {approx = true} : vector<4x1xf32> -> vector<4x1xf32>
    %20 = vector.broadcast %19 : vector<4x1xf32> to vector<4x8xf32>
    %21 = arith.mulf %18, %20 : vector<4x8xf32>
    %22 = vector.extract_strided_slice %1 {offsets = [0, 8], sizes = [4, 8], strides = [1, 1]} : vector<4x32xbf16> to vector<4x8xbf16>
    %23 = vector.extract_strided_slice %3 {offsets = [0, 8], sizes = [4, 8], strides = [1, 1]} : vector<4x32xbf16> to vector<4x8xbf16>
    %cst_11 = arith.constant dense<0.000000e+00> : vector<4x4xf32>
    %24 = tpu.matmul %22, %23, %cst_11 {dimension_numbers = #tpu.dot_dimension_numbers<[1], [1], [0], [0], [0, 0, 1, 0], [], []>} : vector<4x8xbf16>, vector<4x8xbf16>, vector<4x4xf32> -> vector<4x4xf32>
    %cst_12 = arith.constant dense<0xFF800000> : vector<4xf32>
    %25 = vector.multi_reduction <maximumf>, %24, %cst_12 [1] : vector<4x4xf32> to vector<4xf32>
    %26 = vector.shape_cast %25 : vector<4xf32> to vector<4x1xf32>
    %27 = vector.broadcast %26 : vector<4x1xf32> to vector<4x4xf32>
    %28 = arith.subf %24, %27 : vector<4x4xf32>
    %29 = math.exp %28 : vector<4x4xf32>
    %cst_13 = arith.constant dense<0.000000e+00> : vector<4xf32>
    %30 = vector.multi_reduction <add>, %29, %cst_13 [1] : vector<4x4xf32> to vector<4xf32>
    %31 = vector.shape_cast %30 : vector<4xf32> to vector<4x1xf32>
    %32 = vector.extract_strided_slice %5 {offsets = [0, 8], sizes = [4, 8], strides = [1, 1]} : vector<4x32xbf16> to vector<4x8xbf16>
    %33 = arith.truncf %29 : vector<4x4xf32> to vector<4x4xbf16>
    %cst_14 = arith.constant dense<0.000000e+00> : vector<4x8xf32>
    %34 = tpu.matmul %33, %32, %cst_14 {dimension_numbers = #tpu.dot_dimension_numbers<[1], [0], [0], [1], [0, 0, 1, 1], [], []>} : vector<4x4xbf16>, vector<4x8xbf16>, vector<4x8xf32> -> vector<4x8xf32>
    %35 = tpu.reciprocal %31 {approx = true} : vector<4x1xf32> -> vector<4x1xf32>
    %36 = vector.broadcast %35 : vector<4x1xf32> to vector<4x8xf32>
    %37 = arith.mulf %34, %36 : vector<4x8xf32>
    %38 = vector.extract_strided_slice %1 {offsets = [0, 16], sizes = [4, 8], strides = [1, 1]} : vector<4x32xbf16> to vector<4x8xbf16>
    %39 = vector.extract_strided_slice %3 {offsets = [0, 16], sizes = [4, 8], strides = [1, 1]} : vector<4x32xbf16> to vector<4x8xbf16>
    %cst_15 = arith.constant dense<0.000000e+00> : vector<4x4xf32>
    %40 = tpu.matmul %38, %39, %cst_15 {dimension_numbers = #tpu.dot_dimension_numbers<[1], [1], [0], [0], [0, 0, 1, 0], [], []>} : vector<4x8xbf16>, vector<4x8xbf16>, vector<4x4xf32> -> vector<4x4xf32>
    %cst_16 = arith.constant dense<0xFF800000> : vector<4xf32>
    %41 = vector.multi_reduction <maximumf>, %40, %cst_16 [1] : vector<4x4xf32> to vector<4xf32>
    %42 = vector.shape_cast %41 : vector<4xf32> to vector<4x1xf32>
    %43 = vector.broadcast %42 : vector<4x1xf32> to vector<4x4xf32>
    %44 = arith.subf %40, %43 : vector<4x4xf32>
    %45 = math.exp %44 : vector<4x4xf32>
    %cst_17 = arith.constant dense<0.000000e+00> : vector<4xf32>
    %46 = vector.multi_reduction <add>, %45, %cst_17 [1] : vector<4x4xf32> to vector<4xf32>
    %47 = vector.shape_cast %46 : vector<4xf32> to vector<4x1xf32>
    %48 = vector.extract_strided_slice %5 {offsets = [0, 16], sizes = [4, 8], strides = [1, 1]} : vector<4x32xbf16> to vector<4x8xbf16>
    %49 = arith.truncf %45 : vector<4x4xf32> to vector<4x4xbf16>
    %cst_18 = arith.constant dense<0.000000e+00> : vector<4x8xf32>
    %50 = tpu.matmul %49, %48, %cst_18 {dimension_numbers = #tpu.dot_dimension_numbers<[1], [0], [0], [1], [0, 0, 1, 1], [], []>} : vector<4x4xbf16>, vector<4x8xbf16>, vector<4x8xf32> -> vector<4x8xf32>
    %51 = tpu.reciprocal %47 {approx = true} : vector<4x1xf32> -> vector<4x1xf32>
    %52 = vector.broadcast %51 : vector<4x1xf32> to vector<4x8xf32>
    %53 = arith.mulf %50, %52 : vector<4x8xf32>
    %54 = vector.extract_strided_slice %1 {offsets = [0, 24], sizes = [4, 8], strides = [1, 1]} : vector<4x32xbf16> to vector<4x8xbf16>
    %55 = vector.extract_strided_slice %3 {offsets = [0, 24], sizes = [4, 8], strides = [1, 1]} : vector<4x32xbf16> to vector<4x8xbf16>
    %cst_19 = arith.constant dense<0.000000e+00> : vector<4x4xf32>
    %56 = tpu.matmul %54, %55, %cst_19 {dimension_numbers = #tpu.dot_dimension_numbers<[1], [1], [0], [0], [0, 0, 1, 0], [], []>} : vector<4x8xbf16>, vector<4x8xbf16>, vector<4x4xf32> -> vector<4x4xf32>
    %cst_20 = arith.constant dense<0xFF800000> : vector<4xf32>
    %57 = vector.multi_reduction <maximumf>, %56, %cst_20 [1] : vector<4x4xf32> to vector<4xf32>
    %58 = vector.shape_cast %57 : vector<4xf32> to vector<4x1xf32>
    %59 = vector.broadcast %58 : vector<4x1xf32> to vector<4x4xf32>
    %60 = arith.subf %56, %59 : vector<4x4xf32>
    %61 = math.exp %60 : vector<4x4xf32>
    %cst_21 = arith.constant dense<0.000000e+00> : vector<4xf32>
    %62 = vector.multi_reduction <add>, %61, %cst_21 [1] : vector<4x4xf32> to vector<4xf32>
    %63 = vector.shape_cast %62 : vector<4xf32> to vector<4x1xf32>
    %64 = vector.extract_strided_slice %5 {offsets = [0, 24], sizes = [4, 8], strides = [1, 1]} : vector<4x32xbf16> to vector<4x8xbf16>
    %65 = arith.truncf %61 : vector<4x4xf32> to vector<4x4xbf16>
    %cst_22 = arith.constant dense<0.000000e+00> : vector<4x8xf32>
    %66 = tpu.matmul %65, %64, %cst_22 {dimension_numbers = #tpu.dot_dimension_numbers<[1], [0], [0], [1], [0, 0, 1, 1], [], []>} : vector<4x4xbf16>, vector<4x8xbf16>, vector<4x8xf32> -> vector<4x8xf32>
    %67 = tpu.reciprocal %63 {approx = true} : vector<4x1xf32> -> vector<4x1xf32>
    %68 = vector.broadcast %67 : vector<4x1xf32> to vector<4x8xf32>
    %69 = arith.mulf %66, %68 : vector<4x8xf32>
    %70 = tpu.concatenate %21, %37, %53, %69 in 1 : vector<4x8xf32>, vector<4x8xf32>, vector<4x8xf32>, vector<4x8xf32> -> vector<4x32xf32>
    %c0_23 = arith.constant 0 : index
    %c0_24 = arith.constant 0 : index
    %c0_25 = arith.constant 0 : index
    %71 = vector.load %arg4[%c0_23, %c0_24, %c0_25] : memref<1x4x32xf32, #tpu.memory_space<vmem>>, vector<1x4x32xf32>
    %72 = vector.shape_cast %71 : vector<1x4x32xf32> to vector<4x32xf32>
    %c0_26 = arith.constant 0 : index
    %c0_27 = arith.constant 0 : index
    %73 = vector.load %arg5[%c0_26, %c0_27] : memref<32x32xbf16, #tpu.memory_space<vmem>>, vector<32x32xbf16>
    %74 = arith.truncf %70 : vector<4x32xf32> to vector<4x32xbf16>
    %cst_28 = arith.constant dense<0.000000e+00> : vector<4x32xf32>
    %75 = tpu.matmul %74, %73, %cst_28 {dimension_numbers = #tpu.dot_dimension_numbers<[1], [0], [0], [1], [0, 0, 1, 1], [], []>} : vector<4x32xbf16>, vector<32x32xbf16>, vector<4x32xf32> -> vector<4x32xf32>
    %76 = arith.addf %72, %75 : vector<4x32xf32>
    %c0_29 = arith.constant 0 : index
    %c0_30 = arith.constant 0 : index
    %77 = vector.load %arg6[%c0_29, %c0_30] : memref<1x32xf32, #tpu.memory_space<vmem>>, vector<1x32xf32>
    %78 = vector.broadcast %77 : vector<1x32xf32> to vector<4x32xf32>
    %79 = arith.addf %76, %78 : vector<4x32xf32>
    %c0_31 = arith.constant 0 : index
    %c0_32 = arith.constant 0 : index
    %80 = vector.load %arg7[%c0_31, %c0_32] : memref<1x32xf32, #tpu.memory_space<vmem>>, vector<1x32xf32>
    %c0_33 = arith.constant 0 : index
    %c0_34 = arith.constant 0 : index
    %81 = vector.load %arg8[%c0_33, %c0_34] : memref<1x32xf32, #tpu.memory_space<vmem>>, vector<1x32xf32>
    %cst_35 = arith.constant dense<0.000000e+00> : vector<4xf32>
    %82 = vector.multi_reduction <add>, %79, %cst_35 [1] : vector<4x32xf32> to vector<4xf32>
    %83 = vector.shape_cast %82 : vector<4xf32> to vector<4x1xf32>
    %cst_36 = arith.constant 3.200000e+01 : f32
    %84 = vector.broadcast %cst_36 : f32 to vector<4x1xf32>
    %85 = arith.divf %83, %84 : vector<4x1xf32>
    %86 = vector.broadcast %85 : vector<4x1xf32> to vector<4x32xf32>
    %87 = arith.subf %79, %86 : vector<4x32xf32>
    %88 = arith.mulf %87, %87 : vector<4x32xf32>
    %cst_37 = arith.constant dense<0.000000e+00> : vector<4xf32>
    %89 = vector.multi_reduction <add>, %88, %cst_37 [1] : vector<4x32xf32> to vector<4xf32>
    %90 = vector.shape_cast %89 : vector<4xf32> to vector<4x1xf32>
    %cst_38 = arith.constant 3.200000e+01 : f32
    %91 = vector.broadcast %cst_38 : f32 to vector<4x1xf32>
    %92 = arith.divf %90, %91 : vector<4x1xf32>
    %cst_39 = arith.constant 9.99999974E-6 : f32
    %93 = vector.broadcast %cst_39 : f32 to vector<4x1xf32>
    %94 = arith.addf %92, %93 : vector<4x1xf32>
    %95 = math.rsqrt %94 : vector<4x1xf32>
    %96 = vector.broadcast %95 : vector<4x1xf32> to vector<4x32xf32>
    %97 = arith.mulf %87, %96 : vector<4x32xf32>
    %98 = vector.broadcast %80 : vector<1x32xf32> to vector<4x32xf32>
    %99 = arith.mulf %97, %98 : vector<4x32xf32>
    %100 = vector.broadcast %81 : vector<1x32xf32> to vector<4x32xf32>
    %101 = arith.addf %99, %100 : vector<4x32xf32>
    %c0_40 = arith.constant 0 : index
    %c0_41 = arith.constant 0 : index
    %c0_42 = arith.constant 0 : index
    %102 = vector.load %arg9[%c0_40, %c0_41, %c0_42] : memref<1x4x32xf32, #tpu.memory_space<vmem>>, vector<1x4x32xf32>
    %103 = vector.shape_cast %102 : vector<1x4x32xf32> to vector<4x32xf32>
    %104 = vector.shape_cast %101 : vector<4x32xf32> to vector<1x4x32xf32>
    tpu.vector_store %arg9[%c0_40, %c0_41, %c0_42], %104 {strides = array<i32>} : memref<1x4x32xf32, #tpu.memory_space<vmem>>, vector<1x4x32xf32>,
    return
  }
  func.func @transform_0(%arg0: i32) -> (i32, i32, i32) {
    %c0_i32 = arith.constant 0 : i32
    %c0_i32_0 = arith.constant 0 : i32
    %c0_i32_1 = arith.constant 0 : i32
    return %arg0, %c0_i32, %c0_i32_0 : i32, i32, i32
  }
  func.func @transform_1(%arg0: i32) -> (i32, i32, i32) {
    %c0_i32 = arith.constant 0 : i32
    %c0_i32_0 = arith.constant 0 : i32
    %c0_i32_1 = arith.constant 0 : i32
    return %arg0, %c0_i32, %c0_i32_0 : i32, i32, i32
  }
  func.func @transform_2(%arg0: i32) -> (i32, i32, i32) {
    %c0_i32 = arith.constant 0 : i32
    %c0_i32_0 = arith.constant 0 : i32
    %c0_i32_1 = arith.constant 0 : i32
    return %arg0, %c0_i32, %c0_i32_0 : i32, i32, i32
  }
  func.func @transform_3(%arg0: i32) -> (i32, i32, i32) {
    %c0_i32 = arith.constant 0 : i32
    %c0_i32_0 = arith.constant 0 : i32
    %c0_i32_1 = arith.constant 0 : i32
    return %arg0, %c0_i32, %c0_i32_0 : i32, i32, i32
  }
  func.func @transform_4(%arg0: i32) -> (i32, i32) {
    %c0_i32 = arith.constant 0 : i32
    %c0_i32_0 = arith.constant 0 : i32
    %c0_i32_1 = arith.constant 0 : i32
    return %c0_i32, %c0_i32_0 : i32, i32
  }
  func.func @transform_5(%arg0: i32) -> (i32, i32) {
    %c0_i32 = arith.constant 0 : i32
    %c0_i32_0 = arith.constant 0 : i32
    %c0_i32_1 = arith.constant 0 : i32
    return %c0_i32, %c0_i32_0 : i32, i32
  }
  func.func @transform_6(%arg0: i32) -> (i32, i32) {
    %c0_i32 = arith.constant 0 : i32
    %c0_i32_0 = arith.constant 0 : i32
    %c0_i32_1 = arith.constant 0 : i32
    return %c0_i32, %c0_i32_0 : i32, i32
  }
  func.func @transform_7(%arg0: i32) -> (i32, i32) {
    %c0_i32 = arith.constant 0 : i32
    %c0_i32_0 = arith.constant 0 : i32
    %c0_i32_1 = arith.constant 0 : i32
    return %c0_i32, %c0_i32_0 : i32, i32
  }
  func.func @transform_8(%arg0: i32) -> (i32, i32, i32) {
    %c0_i32 = arith.constant 0 : i32
    %c0_i32_0 = arith.constant 0 : i32
    %c0_i32_1 = arith.constant 0 : i32
    return %arg0, %c0_i32, %c0_i32_0 : i32, i32, i32
  }
}

module attributes {stable_mosaic.version = 11 : i64} {
  func.func @_qkv_kernel(%arg0: i32, %arg1: memref<64x32xf32, #tpu.memory_space<vmem>>, %arg2: memref<32x96xbf16, #tpu.memory_space<vmem>>, %arg3: memref<1x96xf32, #tpu.memory_space<vmem>>, %arg4: memref<64x32xbf16, #tpu.memory_space<vmem>>, %arg5: memref<64x32xbf16, #tpu.memory_space<vmem>>, %arg6: memref<64x32xbf16, #tpu.memory_space<vmem>>) attributes {dimension_semantics = [#tpu.dimension_semantics<parallel>], iteration_bounds = array<i64: 1>, scalar_prefetch = 0 : i64, scratch_operands = 0 : i64, tpu.core_type = #tpu.core_type<tc>, window_params = [{transform_indices = @transform_0, window_bounds = array<i64: 64, 32>}, {pipeline_mode = #tpu.pipeline_mode<synchronous>, transform_indices = @transform_1, window_bounds = array<i64: 32, 96>}, {pipeline_mode = #tpu.pipeline_mode<synchronous>, transform_indices = @transform_2, window_bounds = array<i64: 1, 96>}, {transform_indices = @transform_3, window_bounds = array<i64: 64, 32>}, {transform_indices = @transform_4, window_bounds = array<i64: 64, 32>}, {transform_indices = @transform_5, window_bounds = array<i64: 64, 32>}]} {
    %c0 = arith.constant 0 : index
    %c0_0 = arith.constant 0 : index
    %0 = vector.load %arg1[%c0, %c0_0] : memref<64x32xf32, #tpu.memory_space<vmem>>, vector<64x32xf32>
    %c0_1 = arith.constant 0 : index
    %c0_2 = arith.constant 0 : index
    %1 = vector.load %arg2[%c0_1, %c0_2] : memref<32x96xbf16, #tpu.memory_space<vmem>>, vector<32x96xbf16>
    %2 = arith.truncf %0 : vector<64x32xf32> to vector<64x32xbf16>
    %cst = arith.constant dense<0.000000e+00> : vector<64x96xf32>
    %3 = tpu.matmul %2, %1, %cst {dimension_numbers = #tpu.dot_dimension_numbers<[1], [0], [0], [1], [0, 0, 1, 1], [], []>} : vector<64x32xbf16>, vector<32x96xbf16>, vector<64x96xf32> -> vector<64x96xf32>
    %c0_3 = arith.constant 0 : index
    %c0_4 = arith.constant 0 : index
    %4 = vector.load %arg3[%c0_3, %c0_4] : memref<1x96xf32, #tpu.memory_space<vmem>>, vector<1x96xf32>
    %5 = vector.broadcast %4 : vector<1x96xf32> to vector<64x96xf32>
    %6 = arith.addf %3, %5 : vector<64x96xf32>
    %7 = vector.extract_strided_slice %6 {offsets = [0, 0], sizes = [64, 32], strides = [1, 1]} : vector<64x96xf32> to vector<64x32xf32>
    %8 = arith.truncf %7 : vector<64x32xf32> to vector<64x32xbf16>
    %c0_5 = arith.constant 0 : index
    %c0_6 = arith.constant 0 : index
    %9 = vector.load %arg4[%c0_5, %c0_6] : memref<64x32xbf16, #tpu.memory_space<vmem>>, vector<64x32xbf16>
    tpu.vector_store %arg4[%c0_5, %c0_6], %8 {strides = array<i32>} : memref<64x32xbf16, #tpu.memory_space<vmem>>, vector<64x32xbf16>,
    %10 = vector.extract_strided_slice %6 {offsets = [0, 32], sizes = [64, 32], strides = [1, 1]} : vector<64x96xf32> to vector<64x32xf32>
    %11 = arith.truncf %10 : vector<64x32xf32> to vector<64x32xbf16>
    %c0_7 = arith.constant 0 : index
    %c0_8 = arith.constant 0 : index
    %12 = vector.load %arg5[%c0_7, %c0_8] : memref<64x32xbf16, #tpu.memory_space<vmem>>, vector<64x32xbf16>
    tpu.vector_store %arg5[%c0_7, %c0_8], %11 {strides = array<i32>} : memref<64x32xbf16, #tpu.memory_space<vmem>>, vector<64x32xbf16>,
    %13 = vector.extract_strided_slice %6 {offsets = [0, 64], sizes = [64, 32], strides = [1, 1]} : vector<64x96xf32> to vector<64x32xf32>
    %14 = arith.truncf %13 : vector<64x32xf32> to vector<64x32xbf16>
    %c0_9 = arith.constant 0 : index
    %c0_10 = arith.constant 0 : index
    %15 = vector.load %arg6[%c0_9, %c0_10] : memref<64x32xbf16, #tpu.memory_space<vmem>>, vector<64x32xbf16>
    tpu.vector_store %arg6[%c0_9, %c0_10], %14 {strides = array<i32>} : memref<64x32xbf16, #tpu.memory_space<vmem>>, vector<64x32xbf16>,
    return
  }
  func.func @transform_0(%arg0: i32) -> (i32, i32) {
    %c0_i32 = arith.constant 0 : i32
    %c0_i32_0 = arith.constant 0 : i32
    return %arg0, %c0_i32 : i32, i32
  }
  func.func @transform_1(%arg0: i32) -> (i32, i32) {
    %c0_i32 = arith.constant 0 : i32
    %c0_i32_0 = arith.constant 0 : i32
    %c0_i32_1 = arith.constant 0 : i32
    return %c0_i32, %c0_i32_0 : i32, i32
  }
  func.func @transform_2(%arg0: i32) -> (i32, i32) {
    %c0_i32 = arith.constant 0 : i32
    %c0_i32_0 = arith.constant 0 : i32
    %c0_i32_1 = arith.constant 0 : i32
    return %c0_i32, %c0_i32_0 : i32, i32
  }
  func.func @transform_3(%arg0: i32) -> (i32, i32) {
    %c0_i32 = arith.constant 0 : i32
    %c0_i32_0 = arith.constant 0 : i32
    return %arg0, %c0_i32 : i32, i32
  }
  func.func @transform_4(%arg0: i32) -> (i32, i32) {
    %c0_i32 = arith.constant 0 : i32
    %c0_i32_0 = arith.constant 0 : i32
    return %arg0, %c0_i32 : i32, i32
  }
  func.func @transform_5(%arg0: i32) -> (i32, i32) {
    %c0_i32 = arith.constant 0 : i32
    %c0_i32_0 = arith.constant 0 : i32
    return %arg0, %c0_i32 : i32, i32
  }
}

module attributes {stable_mosaic.version = 11 : i64} {
  func.func @_attn_ln_single_kernel(%arg0: i32, %arg1: memref<1x32x32xbf16, #tpu.memory_space<vmem>>, %arg2: memref<1x32x32xbf16, #tpu.memory_space<vmem>>, %arg3: memref<1x32x32xbf16, #tpu.memory_space<vmem>>, %arg4: memref<1x32x32xf32, #tpu.memory_space<vmem>>, %arg5: memref<32x32xbf16, #tpu.memory_space<vmem>>, %arg6: memref<1x32xf32, #tpu.memory_space<vmem>>, %arg7: memref<1x32xf32, #tpu.memory_space<vmem>>, %arg8: memref<1x32xf32, #tpu.memory_space<vmem>>, %arg9: memref<1x32x32xf32, #tpu.memory_space<vmem>>) attributes {dimension_semantics = [#tpu.dimension_semantics<parallel>], iteration_bounds = array<i64: 2>, scalar_prefetch = 0 : i64, scratch_operands = 0 : i64, tpu.core_type = #tpu.core_type<tc>, window_params = [{transform_indices = @transform_0, window_bounds = array<i64: 1, 32, 32>}, {transform_indices = @transform_1, window_bounds = array<i64: 1, 32, 32>}, {transform_indices = @transform_2, window_bounds = array<i64: 1, 32, 32>}, {transform_indices = @transform_3, window_bounds = array<i64: 1, 32, 32>}, {pipeline_mode = #tpu.pipeline_mode<synchronous>, transform_indices = @transform_4, window_bounds = array<i64: 32, 32>}, {pipeline_mode = #tpu.pipeline_mode<synchronous>, transform_indices = @transform_5, window_bounds = array<i64: 1, 32>}, {pipeline_mode = #tpu.pipeline_mode<synchronous>, transform_indices = @transform_6, window_bounds = array<i64: 1, 32>}, {pipeline_mode = #tpu.pipeline_mode<synchronous>, transform_indices = @transform_7, window_bounds = array<i64: 1, 32>}, {transform_indices = @transform_8, window_bounds = array<i64: 1, 32, 32>}]} {
    %c0 = arith.constant 0 : index
    %c0_0 = arith.constant 0 : index
    %c0_1 = arith.constant 0 : index
    %0 = vector.load %arg1[%c0, %c0_0, %c0_1] : memref<1x32x32xbf16, #tpu.memory_space<vmem>>, vector<1x32x32xbf16>
    %1 = vector.shape_cast %0 : vector<1x32x32xbf16> to vector<32x32xbf16>
    %c0_2 = arith.constant 0 : index
    %c0_3 = arith.constant 0 : index
    %c0_4 = arith.constant 0 : index
    %2 = vector.load %arg2[%c0_2, %c0_3, %c0_4] : memref<1x32x32xbf16, #tpu.memory_space<vmem>>, vector<1x32x32xbf16>
    %3 = vector.shape_cast %2 : vector<1x32x32xbf16> to vector<32x32xbf16>
    %c0_5 = arith.constant 0 : index
    %c0_6 = arith.constant 0 : index
    %c0_7 = arith.constant 0 : index
    %4 = vector.load %arg3[%c0_5, %c0_6, %c0_7] : memref<1x32x32xbf16, #tpu.memory_space<vmem>>, vector<1x32x32xbf16>
    %5 = vector.shape_cast %4 : vector<1x32x32xbf16> to vector<32x32xbf16>
    %6 = tpu.iota {dimensions = array<i32: 0>} : vector<32x1xi32>
    %7 = tpu.iota {dimensions = array<i32: 1>} : vector<1x32xi32>
    %8 = vector.broadcast %6 : vector<32x1xi32> to vector<32x32xi32>
    %9 = vector.broadcast %7 : vector<1x32xi32> to vector<32x32xi32>
    %10 = arith.cmpi sge, %8, %9 : vector<32x32xi32>
    %c3_i32 = arith.constant 3 : i32
    %11 = vector.broadcast %c3_i32 : i32 to vector<32x1xi32>
    %12 = arith.andi %6, %11 : vector<32x1xi32>
    %c3_i32_8 = arith.constant 3 : i32
    %13 = vector.broadcast %c3_i32_8 : i32 to vector<1x32xi32>
    %14 = arith.andi %7, %13 : vector<1x32xi32>
    %15 = vector.broadcast %12 : vector<32x1xi32> to vector<32x32xi32>
    %16 = vector.broadcast %14 : vector<1x32xi32> to vector<32x32xi32>
    %17 = arith.cmpi eq, %15, %16 : vector<32x32xi32>
    %18 = arith.andi %10, %17 : vector<32x32xi1>
    %19 = vector.extract_strided_slice %1 {offsets = [0, 0], sizes = [32, 8], strides = [1, 1]} : vector<32x32xbf16> to vector<32x8xbf16>
    %20 = vector.extract_strided_slice %3 {offsets = [0, 0], sizes = [32, 8], strides = [1, 1]} : vector<32x32xbf16> to vector<32x8xbf16>
    %cst = arith.constant dense<0.000000e+00> : vector<32x32xf32>
    %21 = tpu.matmul %19, %20, %cst {dimension_numbers = #tpu.dot_dimension_numbers<[1], [1], [0], [0], [0, 0, 1, 0], [], []>} : vector<32x8xbf16>, vector<32x8xbf16>, vector<32x32xf32> -> vector<32x32xf32>
    %cst_9 = arith.constant -1.000000e+30 : f32
    %22 = vector.broadcast %cst_9 : f32 to vector<32x32xf32>
    %23 = arith.select %18, %21, %22 : vector<32x32xi1>, vector<32x32xf32>
    %cst_10 = arith.constant dense<0xFF800000> : vector<32xf32>
    %24 = vector.multi_reduction <maximumf>, %23, %cst_10 [1] : vector<32x32xf32> to vector<32xf32>
    %25 = vector.shape_cast %24 : vector<32xf32> to vector<32x1xf32>
    %26 = vector.broadcast %25 : vector<32x1xf32> to vector<32x32xf32>
    %27 = arith.subf %23, %26 : vector<32x32xf32>
    %28 = math.exp %27 : vector<32x32xf32>
    %cst_11 = arith.constant dense<0.000000e+00> : vector<32xf32>
    %29 = vector.multi_reduction <add>, %28, %cst_11 [1] : vector<32x32xf32> to vector<32xf32>
    %30 = vector.shape_cast %29 : vector<32xf32> to vector<32x1xf32>
    %31 = vector.extract_strided_slice %5 {offsets = [0, 0], sizes = [32, 8], strides = [1, 1]} : vector<32x32xbf16> to vector<32x8xbf16>
    %32 = arith.truncf %28 : vector<32x32xf32> to vector<32x32xbf16>
    %cst_12 = arith.constant dense<0.000000e+00> : vector<32x8xf32>
    %33 = tpu.matmul %32, %31, %cst_12 {dimension_numbers = #tpu.dot_dimension_numbers<[1], [0], [0], [1], [0, 0, 1, 1], [], []>} : vector<32x32xbf16>, vector<32x8xbf16>, vector<32x8xf32> -> vector<32x8xf32>
    %34 = tpu.reciprocal %30 {approx = true} : vector<32x1xf32> -> vector<32x1xf32>
    %35 = vector.broadcast %34 : vector<32x1xf32> to vector<32x8xf32>
    %36 = arith.mulf %33, %35 : vector<32x8xf32>
    %37 = vector.extract_strided_slice %1 {offsets = [0, 8], sizes = [32, 8], strides = [1, 1]} : vector<32x32xbf16> to vector<32x8xbf16>
    %38 = vector.extract_strided_slice %3 {offsets = [0, 8], sizes = [32, 8], strides = [1, 1]} : vector<32x32xbf16> to vector<32x8xbf16>
    %cst_13 = arith.constant dense<0.000000e+00> : vector<32x32xf32>
    %39 = tpu.matmul %37, %38, %cst_13 {dimension_numbers = #tpu.dot_dimension_numbers<[1], [1], [0], [0], [0, 0, 1, 0], [], []>} : vector<32x8xbf16>, vector<32x8xbf16>, vector<32x32xf32> -> vector<32x32xf32>
    %cst_14 = arith.constant -1.000000e+30 : f32
    %40 = vector.broadcast %cst_14 : f32 to vector<32x32xf32>
    %41 = arith.select %18, %39, %40 : vector<32x32xi1>, vector<32x32xf32>
    %cst_15 = arith.constant dense<0xFF800000> : vector<32xf32>
    %42 = vector.multi_reduction <maximumf>, %41, %cst_15 [1] : vector<32x32xf32> to vector<32xf32>
    %43 = vector.shape_cast %42 : vector<32xf32> to vector<32x1xf32>
    %44 = vector.broadcast %43 : vector<32x1xf32> to vector<32x32xf32>
    %45 = arith.subf %41, %44 : vector<32x32xf32>
    %46 = math.exp %45 : vector<32x32xf32>
    %cst_16 = arith.constant dense<0.000000e+00> : vector<32xf32>
    %47 = vector.multi_reduction <add>, %46, %cst_16 [1] : vector<32x32xf32> to vector<32xf32>
    %48 = vector.shape_cast %47 : vector<32xf32> to vector<32x1xf32>
    %49 = vector.extract_strided_slice %5 {offsets = [0, 8], sizes = [32, 8], strides = [1, 1]} : vector<32x32xbf16> to vector<32x8xbf16>
    %50 = arith.truncf %46 : vector<32x32xf32> to vector<32x32xbf16>
    %cst_17 = arith.constant dense<0.000000e+00> : vector<32x8xf32>
    %51 = tpu.matmul %50, %49, %cst_17 {dimension_numbers = #tpu.dot_dimension_numbers<[1], [0], [0], [1], [0, 0, 1, 1], [], []>} : vector<32x32xbf16>, vector<32x8xbf16>, vector<32x8xf32> -> vector<32x8xf32>
    %52 = tpu.reciprocal %48 {approx = true} : vector<32x1xf32> -> vector<32x1xf32>
    %53 = vector.broadcast %52 : vector<32x1xf32> to vector<32x8xf32>
    %54 = arith.mulf %51, %53 : vector<32x8xf32>
    %55 = vector.extract_strided_slice %1 {offsets = [0, 16], sizes = [32, 8], strides = [1, 1]} : vector<32x32xbf16> to vector<32x8xbf16>
    %56 = vector.extract_strided_slice %3 {offsets = [0, 16], sizes = [32, 8], strides = [1, 1]} : vector<32x32xbf16> to vector<32x8xbf16>
    %cst_18 = arith.constant dense<0.000000e+00> : vector<32x32xf32>
    %57 = tpu.matmul %55, %56, %cst_18 {dimension_numbers = #tpu.dot_dimension_numbers<[1], [1], [0], [0], [0, 0, 1, 0], [], []>} : vector<32x8xbf16>, vector<32x8xbf16>, vector<32x32xf32> -> vector<32x32xf32>
    %cst_19 = arith.constant -1.000000e+30 : f32
    %58 = vector.broadcast %cst_19 : f32 to vector<32x32xf32>
    %59 = arith.select %18, %57, %58 : vector<32x32xi1>, vector<32x32xf32>
    %cst_20 = arith.constant dense<0xFF800000> : vector<32xf32>
    %60 = vector.multi_reduction <maximumf>, %59, %cst_20 [1] : vector<32x32xf32> to vector<32xf32>
    %61 = vector.shape_cast %60 : vector<32xf32> to vector<32x1xf32>
    %62 = vector.broadcast %61 : vector<32x1xf32> to vector<32x32xf32>
    %63 = arith.subf %59, %62 : vector<32x32xf32>
    %64 = math.exp %63 : vector<32x32xf32>
    %cst_21 = arith.constant dense<0.000000e+00> : vector<32xf32>
    %65 = vector.multi_reduction <add>, %64, %cst_21 [1] : vector<32x32xf32> to vector<32xf32>
    %66 = vector.shape_cast %65 : vector<32xf32> to vector<32x1xf32>
    %67 = vector.extract_strided_slice %5 {offsets = [0, 16], sizes = [32, 8], strides = [1, 1]} : vector<32x32xbf16> to vector<32x8xbf16>
    %68 = arith.truncf %64 : vector<32x32xf32> to vector<32x32xbf16>
    %cst_22 = arith.constant dense<0.000000e+00> : vector<32x8xf32>
    %69 = tpu.matmul %68, %67, %cst_22 {dimension_numbers = #tpu.dot_dimension_numbers<[1], [0], [0], [1], [0, 0, 1, 1], [], []>} : vector<32x32xbf16>, vector<32x8xbf16>, vector<32x8xf32> -> vector<32x8xf32>
    %70 = tpu.reciprocal %66 {approx = true} : vector<32x1xf32> -> vector<32x1xf32>
    %71 = vector.broadcast %70 : vector<32x1xf32> to vector<32x8xf32>
    %72 = arith.mulf %69, %71 : vector<32x8xf32>
    %73 = vector.extract_strided_slice %1 {offsets = [0, 24], sizes = [32, 8], strides = [1, 1]} : vector<32x32xbf16> to vector<32x8xbf16>
    %74 = vector.extract_strided_slice %3 {offsets = [0, 24], sizes = [32, 8], strides = [1, 1]} : vector<32x32xbf16> to vector<32x8xbf16>
    %cst_23 = arith.constant dense<0.000000e+00> : vector<32x32xf32>
    %75 = tpu.matmul %73, %74, %cst_23 {dimension_numbers = #tpu.dot_dimension_numbers<[1], [1], [0], [0], [0, 0, 1, 0], [], []>} : vector<32x8xbf16>, vector<32x8xbf16>, vector<32x32xf32> -> vector<32x32xf32>
    %cst_24 = arith.constant -1.000000e+30 : f32
    %76 = vector.broadcast %cst_24 : f32 to vector<32x32xf32>
    %77 = arith.select %18, %75, %76 : vector<32x32xi1>, vector<32x32xf32>
    %cst_25 = arith.constant dense<0xFF800000> : vector<32xf32>
    %78 = vector.multi_reduction <maximumf>, %77, %cst_25 [1] : vector<32x32xf32> to vector<32xf32>
    %79 = vector.shape_cast %78 : vector<32xf32> to vector<32x1xf32>
    %80 = vector.broadcast %79 : vector<32x1xf32> to vector<32x32xf32>
    %81 = arith.subf %77, %80 : vector<32x32xf32>
    %82 = math.exp %81 : vector<32x32xf32>
    %cst_26 = arith.constant dense<0.000000e+00> : vector<32xf32>
    %83 = vector.multi_reduction <add>, %82, %cst_26 [1] : vector<32x32xf32> to vector<32xf32>
    %84 = vector.shape_cast %83 : vector<32xf32> to vector<32x1xf32>
    %85 = vector.extract_strided_slice %5 {offsets = [0, 24], sizes = [32, 8], strides = [1, 1]} : vector<32x32xbf16> to vector<32x8xbf16>
    %86 = arith.truncf %82 : vector<32x32xf32> to vector<32x32xbf16>
    %cst_27 = arith.constant dense<0.000000e+00> : vector<32x8xf32>
    %87 = tpu.matmul %86, %85, %cst_27 {dimension_numbers = #tpu.dot_dimension_numbers<[1], [0], [0], [1], [0, 0, 1, 1], [], []>} : vector<32x32xbf16>, vector<32x8xbf16>, vector<32x8xf32> -> vector<32x8xf32>
    %88 = tpu.reciprocal %84 {approx = true} : vector<32x1xf32> -> vector<32x1xf32>
    %89 = vector.broadcast %88 : vector<32x1xf32> to vector<32x8xf32>
    %90 = arith.mulf %87, %89 : vector<32x8xf32>
    %91 = tpu.concatenate %36, %54, %72, %90 in 1 : vector<32x8xf32>, vector<32x8xf32>, vector<32x8xf32>, vector<32x8xf32> -> vector<32x32xf32>
    %c0_28 = arith.constant 0 : index
    %c0_29 = arith.constant 0 : index
    %c0_30 = arith.constant 0 : index
    %92 = vector.load %arg4[%c0_28, %c0_29, %c0_30] : memref<1x32x32xf32, #tpu.memory_space<vmem>>, vector<1x32x32xf32>
    %93 = vector.shape_cast %92 : vector<1x32x32xf32> to vector<32x32xf32>
    %c0_31 = arith.constant 0 : index
    %c0_32 = arith.constant 0 : index
    %94 = vector.load %arg5[%c0_31, %c0_32] : memref<32x32xbf16, #tpu.memory_space<vmem>>, vector<32x32xbf16>
    %95 = arith.truncf %91 : vector<32x32xf32> to vector<32x32xbf16>
    %cst_33 = arith.constant dense<0.000000e+00> : vector<32x32xf32>
    %96 = tpu.matmul %95, %94, %cst_33 {dimension_numbers = #tpu.dot_dimension_numbers<[1], [0], [0], [1], [0, 0, 1, 1], [], []>} : vector<32x32xbf16>, vector<32x32xbf16>, vector<32x32xf32> -> vector<32x32xf32>
    %97 = arith.addf %93, %96 : vector<32x32xf32>
    %c0_34 = arith.constant 0 : index
    %c0_35 = arith.constant 0 : index
    %98 = vector.load %arg6[%c0_34, %c0_35] : memref<1x32xf32, #tpu.memory_space<vmem>>, vector<1x32xf32>
    %99 = vector.broadcast %98 : vector<1x32xf32> to vector<32x32xf32>
    %100 = arith.addf %97, %99 : vector<32x32xf32>
    %c0_36 = arith.constant 0 : index
    %c0_37 = arith.constant 0 : index
    %101 = vector.load %arg7[%c0_36, %c0_37] : memref<1x32xf32, #tpu.memory_space<vmem>>, vector<1x32xf32>
    %c0_38 = arith.constant 0 : index
    %c0_39 = arith.constant 0 : index
    %102 = vector.load %arg8[%c0_38, %c0_39] : memref<1x32xf32, #tpu.memory_space<vmem>>, vector<1x32xf32>
    %cst_40 = arith.constant dense<0.000000e+00> : vector<32xf32>
    %103 = vector.multi_reduction <add>, %100, %cst_40 [1] : vector<32x32xf32> to vector<32xf32>
    %104 = vector.shape_cast %103 : vector<32xf32> to vector<32x1xf32>
    %cst_41 = arith.constant 3.200000e+01 : f32
    %105 = vector.broadcast %cst_41 : f32 to vector<32x1xf32>
    %106 = arith.divf %104, %105 : vector<32x1xf32>
    %107 = vector.broadcast %106 : vector<32x1xf32> to vector<32x32xf32>
    %108 = arith.subf %100, %107 : vector<32x32xf32>
    %109 = arith.mulf %108, %108 : vector<32x32xf32>
    %cst_42 = arith.constant dense<0.000000e+00> : vector<32xf32>
    %110 = vector.multi_reduction <add>, %109, %cst_42 [1] : vector<32x32xf32> to vector<32xf32>
    %111 = vector.shape_cast %110 : vector<32xf32> to vector<32x1xf32>
    %cst_43 = arith.constant 3.200000e+01 : f32
    %112 = vector.broadcast %cst_43 : f32 to vector<32x1xf32>
    %113 = arith.divf %111, %112 : vector<32x1xf32>
    %cst_44 = arith.constant 9.99999974E-6 : f32
    %114 = vector.broadcast %cst_44 : f32 to vector<32x1xf32>
    %115 = arith.addf %113, %114 : vector<32x1xf32>
    %116 = math.rsqrt %115 : vector<32x1xf32>
    %117 = vector.broadcast %116 : vector<32x1xf32> to vector<32x32xf32>
    %118 = arith.mulf %108, %117 : vector<32x32xf32>
    %119 = vector.broadcast %101 : vector<1x32xf32> to vector<32x32xf32>
    %120 = arith.mulf %118, %119 : vector<32x32xf32>
    %121 = vector.broadcast %102 : vector<1x32xf32> to vector<32x32xf32>
    %122 = arith.addf %120, %121 : vector<32x32xf32>
    %c0_45 = arith.constant 0 : index
    %c0_46 = arith.constant 0 : index
    %c0_47 = arith.constant 0 : index
    %123 = vector.load %arg9[%c0_45, %c0_46, %c0_47] : memref<1x32x32xf32, #tpu.memory_space<vmem>>, vector<1x32x32xf32>
    %124 = vector.shape_cast %123 : vector<1x32x32xf32> to vector<32x32xf32>
    %125 = vector.shape_cast %122 : vector<32x32xf32> to vector<1x32x32xf32>
    tpu.vector_store %arg9[%c0_45, %c0_46, %c0_47], %125 {strides = array<i32>} : memref<1x32x32xf32, #tpu.memory_space<vmem>>, vector<1x32x32xf32>,
    return
  }
  func.func @transform_0(%arg0: i32) -> (i32, i32, i32) {
    %c0_i32 = arith.constant 0 : i32
    %c0_i32_0 = arith.constant 0 : i32
    %c0_i32_1 = arith.constant 0 : i32
    return %arg0, %c0_i32, %c0_i32_0 : i32, i32, i32
  }
  func.func @transform_1(%arg0: i32) -> (i32, i32, i32) {
    %c0_i32 = arith.constant 0 : i32
    %c0_i32_0 = arith.constant 0 : i32
    %c0_i32_1 = arith.constant 0 : i32
    return %arg0, %c0_i32, %c0_i32_0 : i32, i32, i32
  }
  func.func @transform_2(%arg0: i32) -> (i32, i32, i32) {
    %c0_i32 = arith.constant 0 : i32
    %c0_i32_0 = arith.constant 0 : i32
    %c0_i32_1 = arith.constant 0 : i32
    return %arg0, %c0_i32, %c0_i32_0 : i32, i32, i32
  }
  func.func @transform_3(%arg0: i32) -> (i32, i32, i32) {
    %c0_i32 = arith.constant 0 : i32
    %c0_i32_0 = arith.constant 0 : i32
    %c0_i32_1 = arith.constant 0 : i32
    return %arg0, %c0_i32, %c0_i32_0 : i32, i32, i32
  }
  func.func @transform_4(%arg0: i32) -> (i32, i32) {
    %c0_i32 = arith.constant 0 : i32
    %c0_i32_0 = arith.constant 0 : i32
    %c0_i32_1 = arith.constant 0 : i32
    return %c0_i32, %c0_i32_0 : i32, i32
  }
  func.func @transform_5(%arg0: i32) -> (i32, i32) {
    %c0_i32 = arith.constant 0 : i32
    %c0_i32_0 = arith.constant 0 : i32
    %c0_i32_1 = arith.constant 0 : i32
    return %c0_i32, %c0_i32_0 : i32, i32
  }
  func.func @transform_6(%arg0: i32) -> (i32, i32) {
    %c0_i32 = arith.constant 0 : i32
    %c0_i32_0 = arith.constant 0 : i32
    %c0_i32_1 = arith.constant 0 : i32
    return %c0_i32, %c0_i32_0 : i32, i32
  }
  func.func @transform_7(%arg0: i32) -> (i32, i32) {
    %c0_i32 = arith.constant 0 : i32
    %c0_i32_0 = arith.constant 0 : i32
    %c0_i32_1 = arith.constant 0 : i32
    return %c0_i32, %c0_i32_0 : i32, i32
  }
  func.func @transform_8(%arg0: i32) -> (i32, i32, i32) {
    %c0_i32 = arith.constant 0 : i32
    %c0_i32_0 = arith.constant 0 : i32
    %c0_i32_1 = arith.constant 0 : i32
    return %arg0, %c0_i32, %c0_i32_0 : i32, i32, i32
  }
}

module attributes {stable_mosaic.version = 11 : i64} {
  func.func @_ffn_kernel(%arg0: i32, %arg1: memref<8x8x32xf32, #tpu.memory_space<vmem>>, %arg2: memref<8x1x32xf32, #tpu.memory_space<vmem>>, %arg3: memref<32x64xbf16, #tpu.memory_space<vmem>>, %arg4: memref<1x64xf32, #tpu.memory_space<vmem>>, %arg5: memref<64x32xbf16, #tpu.memory_space<vmem>>, %arg6: memref<1x32xf32, #tpu.memory_space<vmem>>, %arg7: memref<8x8x32xf32, #tpu.memory_space<vmem>>) attributes {dimension_semantics = [#tpu.dimension_semantics<parallel>], iteration_bounds = array<i64: 1>, scalar_prefetch = 0 : i64, scratch_operands = 0 : i64, tpu.core_type = #tpu.core_type<tc>, window_params = [{transform_indices = @transform_0, window_bounds = array<i64: 8, 8, 32>}, {transform_indices = @transform_1, window_bounds = array<i64: 8, 1, 32>}, {pipeline_mode = #tpu.pipeline_mode<synchronous>, transform_indices = @transform_2, window_bounds = array<i64: 32, 64>}, {pipeline_mode = #tpu.pipeline_mode<synchronous>, transform_indices = @transform_3, window_bounds = array<i64: 1, 64>}, {pipeline_mode = #tpu.pipeline_mode<synchronous>, transform_indices = @transform_4, window_bounds = array<i64: 64, 32>}, {pipeline_mode = #tpu.pipeline_mode<synchronous>, transform_indices = @transform_5, window_bounds = array<i64: 1, 32>}, {transform_indices = @transform_6, window_bounds = array<i64: 8, 8, 32>}]} {
    %0 = tpu.iota {dimensions = array<i32: 0>} : vector<8x1xi32>
    %c5_i32 = arith.constant 5 : i32
    %1 = vector.broadcast %c5_i32 : i32 to vector<8x1xi32>
    %2 = arith.cmpi eq, %0, %1 : vector<8x1xi32>
    %c0 = arith.constant 0 : index
    %c0_0 = arith.constant 0 : index
    %c0_1 = arith.constant 0 : index
    %3 = vector.load %arg1[%c0, %c0_0, %c0_1] : memref<8x8x32xf32, #tpu.memory_space<vmem>>, vector<1x8x32xf32>
    %4 = vector.shape_cast %3 : vector<1x8x32xf32> to vector<8x32xf32>
    %c0_2 = arith.constant 0 : index
    %c0_3 = arith.constant 0 : index
    %c0_4 = arith.constant 0 : index
    %5 = vector.load %arg2[%c0_2, %c0_3, %c0_4] : memref<8x1x32xf32, #tpu.memory_space<vmem>>, vector<1x1x32xf32>
    %6 = vector.shape_cast %5 : vector<1x1x32xf32> to vector<1x32xf32>
    %7 = vector.broadcast %6 : vector<1x32xf32> to vector<8x32xf32>
    %8 = arith.addf %4, %7 : vector<8x32xf32>
    %9 = vector.shape_cast %2 : vector<8x1xi1> to vector<8x1xi1>
    %10 = vector.broadcast %9 : vector<8x1xi1> to vector<8x32xi1>
    %11 = arith.select %10, %8, %4 : vector<8x32xi1>, vector<8x32xf32>
    %c0_5 = arith.constant 0 : index
    %c0_6 = arith.constant 0 : index
    %12 = vector.load %arg3[%c0_5, %c0_6] : memref<32x64xbf16, #tpu.memory_space<vmem>>, vector<32x64xbf16>
    %13 = arith.truncf %11 : vector<8x32xf32> to vector<8x32xbf16>
    %cst = arith.constant dense<0.000000e+00> : vector<8x64xf32>
    %14 = tpu.matmul %13, %12, %cst {dimension_numbers = #tpu.dot_dimension_numbers<[1], [0], [0], [1], [0, 0, 1, 1], [], []>} : vector<8x32xbf16>, vector<32x64xbf16>, vector<8x64xf32> -> vector<8x64xf32>
    %c0_7 = arith.constant 0 : index
    %c0_8 = arith.constant 0 : index
    %15 = vector.load %arg4[%c0_7, %c0_8] : memref<1x64xf32, #tpu.memory_space<vmem>>, vector<1x64xf32>
    %16 = vector.broadcast %15 : vector<1x64xf32> to vector<8x64xf32>
    %17 = arith.addf %14, %16 : vector<8x64xf32>
    %cst_9 = arith.constant 0.000000e+00 : f32
    %18 = vector.broadcast %cst_9 : f32 to vector<8x64xf32>
    %19 = arith.maximumf %17, %18 : vector<8x64xf32>
    %cst_10 = arith.constant 2.000000e+00 : f32
    %20 = vector.broadcast %cst_10 : f32 to vector<8x64xf32>
    %21 = arith.mulf %19, %20 : vector<8x64xf32>
    %c0_11 = arith.constant 0 : index
    %c0_12 = arith.constant 0 : index
    %22 = vector.load %arg5[%c0_11, %c0_12] : memref<64x32xbf16, #tpu.memory_space<vmem>>, vector<64x32xbf16>
    %23 = arith.truncf %21 : vector<8x64xf32> to vector<8x64xbf16>
    %cst_13 = arith.constant dense<0.000000e+00> : vector<8x32xf32>
    %24 = tpu.matmul %23, %22, %cst_13 {dimension_numbers = #tpu.dot_dimension_numbers<[1], [0], [0], [1], [0, 0, 1, 1], [], []>} : vector<8x64xbf16>, vector<64x32xbf16>, vector<8x32xf32> -> vector<8x32xf32>
    %c0_14 = arith.constant 0 : index
    %c0_15 = arith.constant 0 : index
    %25 = vector.load %arg6[%c0_14, %c0_15] : memref<1x32xf32, #tpu.memory_space<vmem>>, vector<1x32xf32>
    %26 = vector.broadcast %25 : vector<1x32xf32> to vector<8x32xf32>
    %27 = arith.addf %24, %26 : vector<8x32xf32>
    %c0_16 = arith.constant 0 : index
    %c0_17 = arith.constant 0 : index
    %c0_18 = arith.constant 0 : index
    %28 = vector.load %arg7[%c0_16, %c0_17, %c0_18] : memref<8x8x32xf32, #tpu.memory_space<vmem>>, vector<1x8x32xf32>
    %29 = vector.shape_cast %28 : vector<1x8x32xf32> to vector<8x32xf32>
    %30 = vector.shape_cast %27 : vector<8x32xf32> to vector<1x8x32xf32>
    tpu.vector_store %arg7[%c0_16, %c0_17, %c0_18], %30 {strides = array<i32>} : memref<8x8x32xf32, #tpu.memory_space<vmem>>, vector<1x8x32xf32>,
    %c1 = arith.constant 1 : index
    %c0_19 = arith.constant 0 : index
    %c0_20 = arith.constant 0 : index
    %31 = vector.load %arg1[%c1, %c0_19, %c0_20] : memref<8x8x32xf32, #tpu.memory_space<vmem>>, vector<1x8x32xf32>
    %32 = vector.shape_cast %31 : vector<1x8x32xf32> to vector<8x32xf32>
    %c1_21 = arith.constant 1 : index
    %c0_22 = arith.constant 0 : index
    %c0_23 = arith.constant 0 : index
    %33 = vector.load %arg2[%c1_21, %c0_22, %c0_23] : memref<8x1x32xf32, #tpu.memory_space<vmem>>, vector<1x1x32xf32>
    %34 = vector.shape_cast %33 : vector<1x1x32xf32> to vector<1x32xf32>
    %35 = vector.broadcast %34 : vector<1x32xf32> to vector<8x32xf32>
    %36 = arith.addf %32, %35 : vector<8x32xf32>
    %37 = vector.shape_cast %2 : vector<8x1xi1> to vector<8x1xi1>
    %38 = vector.broadcast %37 : vector<8x1xi1> to vector<8x32xi1>
    %39 = arith.select %38, %36, %32 : vector<8x32xi1>, vector<8x32xf32>
    %c0_24 = arith.constant 0 : index
    %c0_25 = arith.constant 0 : index
    %40 = vector.load %arg3[%c0_24, %c0_25] : memref<32x64xbf16, #tpu.memory_space<vmem>>, vector<32x64xbf16>
    %41 = arith.truncf %39 : vector<8x32xf32> to vector<8x32xbf16>
    %cst_26 = arith.constant dense<0.000000e+00> : vector<8x64xf32>
    %42 = tpu.matmul %41, %40, %cst_26 {dimension_numbers = #tpu.dot_dimension_numbers<[1], [0], [0], [1], [0, 0, 1, 1], [], []>} : vector<8x32xbf16>, vector<32x64xbf16>, vector<8x64xf32> -> vector<8x64xf32>
    %c0_27 = arith.constant 0 : index
    %c0_28 = arith.constant 0 : index
    %43 = vector.load %arg4[%c0_27, %c0_28] : memref<1x64xf32, #tpu.memory_space<vmem>>, vector<1x64xf32>
    %44 = vector.broadcast %43 : vector<1x64xf32> to vector<8x64xf32>
    %45 = arith.addf %42, %44 : vector<8x64xf32>
    %cst_29 = arith.constant 0.000000e+00 : f32
    %46 = vector.broadcast %cst_29 : f32 to vector<8x64xf32>
    %47 = arith.maximumf %45, %46 : vector<8x64xf32>
    %cst_30 = arith.constant 2.000000e+00 : f32
    %48 = vector.broadcast %cst_30 : f32 to vector<8x64xf32>
    %49 = arith.mulf %47, %48 : vector<8x64xf32>
    %c0_31 = arith.constant 0 : index
    %c0_32 = arith.constant 0 : index
    %50 = vector.load %arg5[%c0_31, %c0_32] : memref<64x32xbf16, #tpu.memory_space<vmem>>, vector<64x32xbf16>
    %51 = arith.truncf %49 : vector<8x64xf32> to vector<8x64xbf16>
    %cst_33 = arith.constant dense<0.000000e+00> : vector<8x32xf32>
    %52 = tpu.matmul %51, %50, %cst_33 {dimension_numbers = #tpu.dot_dimension_numbers<[1], [0], [0], [1], [0, 0, 1, 1], [], []>} : vector<8x64xbf16>, vector<64x32xbf16>, vector<8x32xf32> -> vector<8x32xf32>
    %c0_34 = arith.constant 0 : index
    %c0_35 = arith.constant 0 : index
    %53 = vector.load %arg6[%c0_34, %c0_35] : memref<1x32xf32, #tpu.memory_space<vmem>>, vector<1x32xf32>
    %54 = vector.broadcast %53 : vector<1x32xf32> to vector<8x32xf32>
    %55 = arith.addf %52, %54 : vector<8x32xf32>
    %c1_36 = arith.constant 1 : index
    %c0_37 = arith.constant 0 : index
    %c0_38 = arith.constant 0 : index
    %56 = vector.load %arg7[%c1_36, %c0_37, %c0_38] : memref<8x8x32xf32, #tpu.memory_space<vmem>>, vector<1x8x32xf32>
    %57 = vector.shape_cast %56 : vector<1x8x32xf32> to vector<8x32xf32>
    %58 = vector.shape_cast %55 : vector<8x32xf32> to vector<1x8x32xf32>
    tpu.vector_store %arg7[%c1_36, %c0_37, %c0_38], %58 {strides = array<i32>} : memref<8x8x32xf32, #tpu.memory_space<vmem>>, vector<1x8x32xf32>,
    %c2 = arith.constant 2 : index
    %c0_39 = arith.constant 0 : index
    %c0_40 = arith.constant 0 : index
    %59 = vector.load %arg1[%c2, %c0_39, %c0_40] : memref<8x8x32xf32, #tpu.memory_space<vmem>>, vector<1x8x32xf32>
    %60 = vector.shape_cast %59 : vector<1x8x32xf32> to vector<8x32xf32>
    %c2_41 = arith.constant 2 : index
    %c0_42 = arith.constant 0 : index
    %c0_43 = arith.constant 0 : index
    %61 = vector.load %arg2[%c2_41, %c0_42, %c0_43] : memref<8x1x32xf32, #tpu.memory_space<vmem>>, vector<1x1x32xf32>
    %62 = vector.shape_cast %61 : vector<1x1x32xf32> to vector<1x32xf32>
    %63 = vector.broadcast %62 : vector<1x32xf32> to vector<8x32xf32>
    %64 = arith.addf %60, %63 : vector<8x32xf32>
    %65 = vector.shape_cast %2 : vector<8x1xi1> to vector<8x1xi1>
    %66 = vector.broadcast %65 : vector<8x1xi1> to vector<8x32xi1>
    %67 = arith.select %66, %64, %60 : vector<8x32xi1>, vector<8x32xf32>
    %c0_44 = arith.constant 0 : index
    %c0_45 = arith.constant 0 : index
    %68 = vector.load %arg3[%c0_44, %c0_45] : memref<32x64xbf16, #tpu.memory_space<vmem>>, vector<32x64xbf16>
    %69 = arith.truncf %67 : vector<8x32xf32> to vector<8x32xbf16>
    %cst_46 = arith.constant dense<0.000000e+00> : vector<8x64xf32>
    %70 = tpu.matmul %69, %68, %cst_46 {dimension_numbers = #tpu.dot_dimension_numbers<[1], [0], [0], [1], [0, 0, 1, 1], [], []>} : vector<8x32xbf16>, vector<32x64xbf16>, vector<8x64xf32> -> vector<8x64xf32>
    %c0_47 = arith.constant 0 : index
    %c0_48 = arith.constant 0 : index
    %71 = vector.load %arg4[%c0_47, %c0_48] : memref<1x64xf32, #tpu.memory_space<vmem>>, vector<1x64xf32>
    %72 = vector.broadcast %71 : vector<1x64xf32> to vector<8x64xf32>
    %73 = arith.addf %70, %72 : vector<8x64xf32>
    %cst_49 = arith.constant 0.000000e+00 : f32
    %74 = vector.broadcast %cst_49 : f32 to vector<8x64xf32>
    %75 = arith.maximumf %73, %74 : vector<8x64xf32>
    %cst_50 = arith.constant 2.000000e+00 : f32
    %76 = vector.broadcast %cst_50 : f32 to vector<8x64xf32>
    %77 = arith.mulf %75, %76 : vector<8x64xf32>
    %c0_51 = arith.constant 0 : index
    %c0_52 = arith.constant 0 : index
    %78 = vector.load %arg5[%c0_51, %c0_52] : memref<64x32xbf16, #tpu.memory_space<vmem>>, vector<64x32xbf16>
    %79 = arith.truncf %77 : vector<8x64xf32> to vector<8x64xbf16>
    %cst_53 = arith.constant dense<0.000000e+00> : vector<8x32xf32>
    %80 = tpu.matmul %79, %78, %cst_53 {dimension_numbers = #tpu.dot_dimension_numbers<[1], [0], [0], [1], [0, 0, 1, 1], [], []>} : vector<8x64xbf16>, vector<64x32xbf16>, vector<8x32xf32> -> vector<8x32xf32>
    %c0_54 = arith.constant 0 : index
    %c0_55 = arith.constant 0 : index
    %81 = vector.load %arg6[%c0_54, %c0_55] : memref<1x32xf32, #tpu.memory_space<vmem>>, vector<1x32xf32>
    %82 = vector.broadcast %81 : vector<1x32xf32> to vector<8x32xf32>
    %83 = arith.addf %80, %82 : vector<8x32xf32>
    %c2_56 = arith.constant 2 : index
    %c0_57 = arith.constant 0 : index
    %c0_58 = arith.constant 0 : index
    %84 = vector.load %arg7[%c2_56, %c0_57, %c0_58] : memref<8x8x32xf32, #tpu.memory_space<vmem>>, vector<1x8x32xf32>
    %85 = vector.shape_cast %84 : vector<1x8x32xf32> to vector<8x32xf32>
    %86 = vector.shape_cast %83 : vector<8x32xf32> to vector<1x8x32xf32>
    tpu.vector_store %arg7[%c2_56, %c0_57, %c0_58], %86 {strides = array<i32>} : memref<8x8x32xf32, #tpu.memory_space<vmem>>, vector<1x8x32xf32>,
    %c3 = arith.constant 3 : index
    %c0_59 = arith.constant 0 : index
    %c0_60 = arith.constant 0 : index
    %87 = vector.load %arg1[%c3, %c0_59, %c0_60] : memref<8x8x32xf32, #tpu.memory_space<vmem>>, vector<1x8x32xf32>
    %88 = vector.shape_cast %87 : vector<1x8x32xf32> to vector<8x32xf32>
    %c3_61 = arith.constant 3 : index
    %c0_62 = arith.constant 0 : index
    %c0_63 = arith.constant 0 : index
    %89 = vector.load %arg2[%c3_61, %c0_62, %c0_63] : memref<8x1x32xf32, #tpu.memory_space<vmem>>, vector<1x1x32xf32>
    %90 = vector.shape_cast %89 : vector<1x1x32xf32> to vector<1x32xf32>
    %91 = vector.broadcast %90 : vector<1x32xf32> to vector<8x32xf32>
    %92 = arith.addf %88, %91 : vector<8x32xf32>
    %93 = vector.shape_cast %2 : vector<8x1xi1> to vector<8x1xi1>
    %94 = vector.broadcast %93 : vector<8x1xi1> to vector<8x32xi1>
    %95 = arith.select %94, %92, %88 : vector<8x32xi1>, vector<8x32xf32>
    %c0_64 = arith.constant 0 : index
    %c0_65 = arith.constant 0 : index
    %96 = vector.load %arg3[%c0_64, %c0_65] : memref<32x64xbf16, #tpu.memory_space<vmem>>, vector<32x64xbf16>
    %97 = arith.truncf %95 : vector<8x32xf32> to vector<8x32xbf16>
    %cst_66 = arith.constant dense<0.000000e+00> : vector<8x64xf32>
    %98 = tpu.matmul %97, %96, %cst_66 {dimension_numbers = #tpu.dot_dimension_numbers<[1], [0], [0], [1], [0, 0, 1, 1], [], []>} : vector<8x32xbf16>, vector<32x64xbf16>, vector<8x64xf32> -> vector<8x64xf32>
    %c0_67 = arith.constant 0 : index
    %c0_68 = arith.constant 0 : index
    %99 = vector.load %arg4[%c0_67, %c0_68] : memref<1x64xf32, #tpu.memory_space<vmem>>, vector<1x64xf32>
    %100 = vector.broadcast %99 : vector<1x64xf32> to vector<8x64xf32>
    %101 = arith.addf %98, %100 : vector<8x64xf32>
    %cst_69 = arith.constant 0.000000e+00 : f32
    %102 = vector.broadcast %cst_69 : f32 to vector<8x64xf32>
    %103 = arith.maximumf %101, %102 : vector<8x64xf32>
    %cst_70 = arith.constant 2.000000e+00 : f32
    %104 = vector.broadcast %cst_70 : f32 to vector<8x64xf32>
    %105 = arith.mulf %103, %104 : vector<8x64xf32>
    %c0_71 = arith.constant 0 : index
    %c0_72 = arith.constant 0 : index
    %106 = vector.load %arg5[%c0_71, %c0_72] : memref<64x32xbf16, #tpu.memory_space<vmem>>, vector<64x32xbf16>
    %107 = arith.truncf %105 : vector<8x64xf32> to vector<8x64xbf16>
    %cst_73 = arith.constant dense<0.000000e+00> : vector<8x32xf32>
    %108 = tpu.matmul %107, %106, %cst_73 {dimension_numbers = #tpu.dot_dimension_numbers<[1], [0], [0], [1], [0, 0, 1, 1], [], []>} : vector<8x64xbf16>, vector<64x32xbf16>, vector<8x32xf32> -> vector<8x32xf32>
    %c0_74 = arith.constant 0 : index
    %c0_75 = arith.constant 0 : index
    %109 = vector.load %arg6[%c0_74, %c0_75] : memref<1x32xf32, #tpu.memory_space<vmem>>, vector<1x32xf32>
    %110 = vector.broadcast %109 : vector<1x32xf32> to vector<8x32xf32>
    %111 = arith.addf %108, %110 : vector<8x32xf32>
    %c3_76 = arith.constant 3 : index
    %c0_77 = arith.constant 0 : index
    %c0_78 = arith.constant 0 : index
    %112 = vector.load %arg7[%c3_76, %c0_77, %c0_78] : memref<8x8x32xf32, #tpu.memory_space<vmem>>, vector<1x8x32xf32>
    %113 = vector.shape_cast %112 : vector<1x8x32xf32> to vector<8x32xf32>
    %114 = vector.shape_cast %111 : vector<8x32xf32> to vector<1x8x32xf32>
    tpu.vector_store %arg7[%c3_76, %c0_77, %c0_78], %114 {strides = array<i32>} : memref<8x8x32xf32, #tpu.memory_space<vmem>>, vector<1x8x32xf32>,
    %c4 = arith.constant 4 : index
    %c0_79 = arith.constant 0 : index
    %c0_80 = arith.constant 0 : index
    %115 = vector.load %arg1[%c4, %c0_79, %c0_80] : memref<8x8x32xf32, #tpu.memory_space<vmem>>, vector<1x8x32xf32>
    %116 = vector.shape_cast %115 : vector<1x8x32xf32> to vector<8x32xf32>
    %c4_81 = arith.constant 4 : index
    %c0_82 = arith.constant 0 : index
    %c0_83 = arith.constant 0 : index
    %117 = vector.load %arg2[%c4_81, %c0_82, %c0_83] : memref<8x1x32xf32, #tpu.memory_space<vmem>>, vector<1x1x32xf32>
    %118 = vector.shape_cast %117 : vector<1x1x32xf32> to vector<1x32xf32>
    %119 = vector.broadcast %118 : vector<1x32xf32> to vector<8x32xf32>
    %120 = arith.addf %116, %119 : vector<8x32xf32>
    %121 = vector.shape_cast %2 : vector<8x1xi1> to vector<8x1xi1>
    %122 = vector.broadcast %121 : vector<8x1xi1> to vector<8x32xi1>
    %123 = arith.select %122, %120, %116 : vector<8x32xi1>, vector<8x32xf32>
    %c0_84 = arith.constant 0 : index
    %c0_85 = arith.constant 0 : index
    %124 = vector.load %arg3[%c0_84, %c0_85] : memref<32x64xbf16, #tpu.memory_space<vmem>>, vector<32x64xbf16>
    %125 = arith.truncf %123 : vector<8x32xf32> to vector<8x32xbf16>
    %cst_86 = arith.constant dense<0.000000e+00> : vector<8x64xf32>
    %126 = tpu.matmul %125, %124, %cst_86 {dimension_numbers = #tpu.dot_dimension_numbers<[1], [0], [0], [1], [0, 0, 1, 1], [], []>} : vector<8x32xbf16>, vector<32x64xbf16>, vector<8x64xf32> -> vector<8x64xf32>
    %c0_87 = arith.constant 0 : index
    %c0_88 = arith.constant 0 : index
    %127 = vector.load %arg4[%c0_87, %c0_88] : memref<1x64xf32, #tpu.memory_space<vmem>>, vector<1x64xf32>
    %128 = vector.broadcast %127 : vector<1x64xf32> to vector<8x64xf32>
    %129 = arith.addf %126, %128 : vector<8x64xf32>
    %cst_89 = arith.constant 0.000000e+00 : f32
    %130 = vector.broadcast %cst_89 : f32 to vector<8x64xf32>
    %131 = arith.maximumf %129, %130 : vector<8x64xf32>
    %cst_90 = arith.constant 2.000000e+00 : f32
    %132 = vector.broadcast %cst_90 : f32 to vector<8x64xf32>
    %133 = arith.mulf %131, %132 : vector<8x64xf32>
    %c0_91 = arith.constant 0 : index
    %c0_92 = arith.constant 0 : index
    %134 = vector.load %arg5[%c0_91, %c0_92] : memref<64x32xbf16, #tpu.memory_space<vmem>>, vector<64x32xbf16>
    %135 = arith.truncf %133 : vector<8x64xf32> to vector<8x64xbf16>
    %cst_93 = arith.constant dense<0.000000e+00> : vector<8x32xf32>
    %136 = tpu.matmul %135, %134, %cst_93 {dimension_numbers = #tpu.dot_dimension_numbers<[1], [0], [0], [1], [0, 0, 1, 1], [], []>} : vector<8x64xbf16>, vector<64x32xbf16>, vector<8x32xf32> -> vector<8x32xf32>
    %c0_94 = arith.constant 0 : index
    %c0_95 = arith.constant 0 : index
    %137 = vector.load %arg6[%c0_94, %c0_95] : memref<1x32xf32, #tpu.memory_space<vmem>>, vector<1x32xf32>
    %138 = vector.broadcast %137 : vector<1x32xf32> to vector<8x32xf32>
    %139 = arith.addf %136, %138 : vector<8x32xf32>
    %c4_96 = arith.constant 4 : index
    %c0_97 = arith.constant 0 : index
    %c0_98 = arith.constant 0 : index
    %140 = vector.load %arg7[%c4_96, %c0_97, %c0_98] : memref<8x8x32xf32, #tpu.memory_space<vmem>>, vector<1x8x32xf32>
    %141 = vector.shape_cast %140 : vector<1x8x32xf32> to vector<8x32xf32>
    %142 = vector.shape_cast %139 : vector<8x32xf32> to vector<1x8x32xf32>
    tpu.vector_store %arg7[%c4_96, %c0_97, %c0_98], %142 {strides = array<i32>} : memref<8x8x32xf32, #tpu.memory_space<vmem>>, vector<1x8x32xf32>,
    %c5 = arith.constant 5 : index
    %c0_99 = arith.constant 0 : index
    %c0_100 = arith.constant 0 : index
    %143 = vector.load %arg1[%c5, %c0_99, %c0_100] : memref<8x8x32xf32, #tpu.memory_space<vmem>>, vector<1x8x32xf32>
    %144 = vector.shape_cast %143 : vector<1x8x32xf32> to vector<8x32xf32>
    %c5_101 = arith.constant 5 : index
    %c0_102 = arith.constant 0 : index
    %c0_103 = arith.constant 0 : index
    %145 = vector.load %arg2[%c5_101, %c0_102, %c0_103] : memref<8x1x32xf32, #tpu.memory_space<vmem>>, vector<1x1x32xf32>
    %146 = vector.shape_cast %145 : vector<1x1x32xf32> to vector<1x32xf32>
    %147 = vector.broadcast %146 : vector<1x32xf32> to vector<8x32xf32>
    %148 = arith.addf %144, %147 : vector<8x32xf32>
    %149 = vector.shape_cast %2 : vector<8x1xi1> to vector<8x1xi1>
    %150 = vector.broadcast %149 : vector<8x1xi1> to vector<8x32xi1>
    %151 = arith.select %150, %148, %144 : vector<8x32xi1>, vector<8x32xf32>
    %c0_104 = arith.constant 0 : index
    %c0_105 = arith.constant 0 : index
    %152 = vector.load %arg3[%c0_104, %c0_105] : memref<32x64xbf16, #tpu.memory_space<vmem>>, vector<32x64xbf16>
    %153 = arith.truncf %151 : vector<8x32xf32> to vector<8x32xbf16>
    %cst_106 = arith.constant dense<0.000000e+00> : vector<8x64xf32>
    %154 = tpu.matmul %153, %152, %cst_106 {dimension_numbers = #tpu.dot_dimension_numbers<[1], [0], [0], [1], [0, 0, 1, 1], [], []>} : vector<8x32xbf16>, vector<32x64xbf16>, vector<8x64xf32> -> vector<8x64xf32>
    %c0_107 = arith.constant 0 : index
    %c0_108 = arith.constant 0 : index
    %155 = vector.load %arg4[%c0_107, %c0_108] : memref<1x64xf32, #tpu.memory_space<vmem>>, vector<1x64xf32>
    %156 = vector.broadcast %155 : vector<1x64xf32> to vector<8x64xf32>
    %157 = arith.addf %154, %156 : vector<8x64xf32>
    %cst_109 = arith.constant 0.000000e+00 : f32
    %158 = vector.broadcast %cst_109 : f32 to vector<8x64xf32>
    %159 = arith.maximumf %157, %158 : vector<8x64xf32>
    %cst_110 = arith.constant 2.000000e+00 : f32
    %160 = vector.broadcast %cst_110 : f32 to vector<8x64xf32>
    %161 = arith.mulf %159, %160 : vector<8x64xf32>
    %c0_111 = arith.constant 0 : index
    %c0_112 = arith.constant 0 : index
    %162 = vector.load %arg5[%c0_111, %c0_112] : memref<64x32xbf16, #tpu.memory_space<vmem>>, vector<64x32xbf16>
    %163 = arith.truncf %161 : vector<8x64xf32> to vector<8x64xbf16>
    %cst_113 = arith.constant dense<0.000000e+00> : vector<8x32xf32>
    %164 = tpu.matmul %163, %162, %cst_113 {dimension_numbers = #tpu.dot_dimension_numbers<[1], [0], [0], [1], [0, 0, 1, 1], [], []>} : vector<8x64xbf16>, vector<64x32xbf16>, vector<8x32xf32> -> vector<8x32xf32>
    %c0_114 = arith.constant 0 : index
    %c0_115 = arith.constant 0 : index
    %165 = vector.load %arg6[%c0_114, %c0_115] : memref<1x32xf32, #tpu.memory_space<vmem>>, vector<1x32xf32>
    %166 = vector.broadcast %165 : vector<1x32xf32> to vector<8x32xf32>
    %167 = arith.addf %164, %166 : vector<8x32xf32>
    %c5_116 = arith.constant 5 : index
    %c0_117 = arith.constant 0 : index
    %c0_118 = arith.constant 0 : index
    %168 = vector.load %arg7[%c5_116, %c0_117, %c0_118] : memref<8x8x32xf32, #tpu.memory_space<vmem>>, vector<1x8x32xf32>
    %169 = vector.shape_cast %168 : vector<1x8x32xf32> to vector<8x32xf32>
    %170 = vector.shape_cast %167 : vector<8x32xf32> to vector<1x8x32xf32>
    tpu.vector_store %arg7[%c5_116, %c0_117, %c0_118], %170 {strides = array<i32>} : memref<8x8x32xf32, #tpu.memory_space<vmem>>, vector<1x8x32xf32>,
    %c6 = arith.constant 6 : index
    %c0_119 = arith.constant 0 : index
    %c0_120 = arith.constant 0 : index
    %171 = vector.load %arg1[%c6, %c0_119, %c0_120] : memref<8x8x32xf32, #tpu.memory_space<vmem>>, vector<1x8x32xf32>
    %172 = vector.shape_cast %171 : vector<1x8x32xf32> to vector<8x32xf32>
    %c6_121 = arith.constant 6 : index
    %c0_122 = arith.constant 0 : index
    %c0_123 = arith.constant 0 : index
    %173 = vector.load %arg2[%c6_121, %c0_122, %c0_123] : memref<8x1x32xf32, #tpu.memory_space<vmem>>, vector<1x1x32xf32>
    %174 = vector.shape_cast %173 : vector<1x1x32xf32> to vector<1x32xf32>
    %175 = vector.broadcast %174 : vector<1x32xf32> to vector<8x32xf32>
    %176 = arith.addf %172, %175 : vector<8x32xf32>
    %177 = vector.shape_cast %2 : vector<8x1xi1> to vector<8x1xi1>
    %178 = vector.broadcast %177 : vector<8x1xi1> to vector<8x32xi1>
    %179 = arith.select %178, %176, %172 : vector<8x32xi1>, vector<8x32xf32>
    %c0_124 = arith.constant 0 : index
    %c0_125 = arith.constant 0 : index
    %180 = vector.load %arg3[%c0_124, %c0_125] : memref<32x64xbf16, #tpu.memory_space<vmem>>, vector<32x64xbf16>
    %181 = arith.truncf %179 : vector<8x32xf32> to vector<8x32xbf16>
    %cst_126 = arith.constant dense<0.000000e+00> : vector<8x64xf32>
    %182 = tpu.matmul %181, %180, %cst_126 {dimension_numbers = #tpu.dot_dimension_numbers<[1], [0], [0], [1], [0, 0, 1, 1], [], []>} : vector<8x32xbf16>, vector<32x64xbf16>, vector<8x64xf32> -> vector<8x64xf32>
    %c0_127 = arith.constant 0 : index
    %c0_128 = arith.constant 0 : index
    %183 = vector.load %arg4[%c0_127, %c0_128] : memref<1x64xf32, #tpu.memory_space<vmem>>, vector<1x64xf32>
    %184 = vector.broadcast %183 : vector<1x64xf32> to vector<8x64xf32>
    %185 = arith.addf %182, %184 : vector<8x64xf32>
    %cst_129 = arith.constant 0.000000e+00 : f32
    %186 = vector.broadcast %cst_129 : f32 to vector<8x64xf32>
    %187 = arith.maximumf %185, %186 : vector<8x64xf32>
    %cst_130 = arith.constant 2.000000e+00 : f32
    %188 = vector.broadcast %cst_130 : f32 to vector<8x64xf32>
    %189 = arith.mulf %187, %188 : vector<8x64xf32>
    %c0_131 = arith.constant 0 : index
    %c0_132 = arith.constant 0 : index
    %190 = vector.load %arg5[%c0_131, %c0_132] : memref<64x32xbf16, #tpu.memory_space<vmem>>, vector<64x32xbf16>
    %191 = arith.truncf %189 : vector<8x64xf32> to vector<8x64xbf16>
    %cst_133 = arith.constant dense<0.000000e+00> : vector<8x32xf32>
    %192 = tpu.matmul %191, %190, %cst_133 {dimension_numbers = #tpu.dot_dimension_numbers<[1], [0], [0], [1], [0, 0, 1, 1], [], []>} : vector<8x64xbf16>, vector<64x32xbf16>, vector<8x32xf32> -> vector<8x32xf32>
    %c0_134 = arith.constant 0 : index
    %c0_135 = arith.constant 0 : index
    %193 = vector.load %arg6[%c0_134, %c0_135] : memref<1x32xf32, #tpu.memory_space<vmem>>, vector<1x32xf32>
    %194 = vector.broadcast %193 : vector<1x32xf32> to vector<8x32xf32>
    %195 = arith.addf %192, %194 : vector<8x32xf32>
    %c6_136 = arith.constant 6 : index
    %c0_137 = arith.constant 0 : index
    %c0_138 = arith.constant 0 : index
    %196 = vector.load %arg7[%c6_136, %c0_137, %c0_138] : memref<8x8x32xf32, #tpu.memory_space<vmem>>, vector<1x8x32xf32>
    %197 = vector.shape_cast %196 : vector<1x8x32xf32> to vector<8x32xf32>
    %198 = vector.shape_cast %195 : vector<8x32xf32> to vector<1x8x32xf32>
    tpu.vector_store %arg7[%c6_136, %c0_137, %c0_138], %198 {strides = array<i32>} : memref<8x8x32xf32, #tpu.memory_space<vmem>>, vector<1x8x32xf32>,
    %c7 = arith.constant 7 : index
    %c0_139 = arith.constant 0 : index
    %c0_140 = arith.constant 0 : index
    %199 = vector.load %arg1[%c7, %c0_139, %c0_140] : memref<8x8x32xf32, #tpu.memory_space<vmem>>, vector<1x8x32xf32>
    %200 = vector.shape_cast %199 : vector<1x8x32xf32> to vector<8x32xf32>
    %c7_141 = arith.constant 7 : index
    %c0_142 = arith.constant 0 : index
    %c0_143 = arith.constant 0 : index
    %201 = vector.load %arg2[%c7_141, %c0_142, %c0_143] : memref<8x1x32xf32, #tpu.memory_space<vmem>>, vector<1x1x32xf32>
    %202 = vector.shape_cast %201 : vector<1x1x32xf32> to vector<1x32xf32>
    %203 = vector.broadcast %202 : vector<1x32xf32> to vector<8x32xf32>
    %204 = arith.addf %200, %203 : vector<8x32xf32>
    %205 = vector.shape_cast %2 : vector<8x1xi1> to vector<8x1xi1>
    %206 = vector.broadcast %205 : vector<8x1xi1> to vector<8x32xi1>
    %207 = arith.select %206, %204, %200 : vector<8x32xi1>, vector<8x32xf32>
    %c0_144 = arith.constant 0 : index
    %c0_145 = arith.constant 0 : index
    %208 = vector.load %arg3[%c0_144, %c0_145] : memref<32x64xbf16, #tpu.memory_space<vmem>>, vector<32x64xbf16>
    %209 = arith.truncf %207 : vector<8x32xf32> to vector<8x32xbf16>
    %cst_146 = arith.constant dense<0.000000e+00> : vector<8x64xf32>
    %210 = tpu.matmul %209, %208, %cst_146 {dimension_numbers = #tpu.dot_dimension_numbers<[1], [0], [0], [1], [0, 0, 1, 1], [], []>} : vector<8x32xbf16>, vector<32x64xbf16>, vector<8x64xf32> -> vector<8x64xf32>
    %c0_147 = arith.constant 0 : index
    %c0_148 = arith.constant 0 : index
    %211 = vector.load %arg4[%c0_147, %c0_148] : memref<1x64xf32, #tpu.memory_space<vmem>>, vector<1x64xf32>
    %212 = vector.broadcast %211 : vector<1x64xf32> to vector<8x64xf32>
    %213 = arith.addf %210, %212 : vector<8x64xf32>
    %cst_149 = arith.constant 0.000000e+00 : f32
    %214 = vector.broadcast %cst_149 : f32 to vector<8x64xf32>
    %215 = arith.maximumf %213, %214 : vector<8x64xf32>
    %cst_150 = arith.constant 2.000000e+00 : f32
    %216 = vector.broadcast %cst_150 : f32 to vector<8x64xf32>
    %217 = arith.mulf %215, %216 : vector<8x64xf32>
    %c0_151 = arith.constant 0 : index
    %c0_152 = arith.constant 0 : index
    %218 = vector.load %arg5[%c0_151, %c0_152] : memref<64x32xbf16, #tpu.memory_space<vmem>>, vector<64x32xbf16>
    %219 = arith.truncf %217 : vector<8x64xf32> to vector<8x64xbf16>
    %cst_153 = arith.constant dense<0.000000e+00> : vector<8x32xf32>
    %220 = tpu.matmul %219, %218, %cst_153 {dimension_numbers = #tpu.dot_dimension_numbers<[1], [0], [0], [1], [0, 0, 1, 1], [], []>} : vector<8x64xbf16>, vector<64x32xbf16>, vector<8x32xf32> -> vector<8x32xf32>
    %c0_154 = arith.constant 0 : index
    %c0_155 = arith.constant 0 : index
    %221 = vector.load %arg6[%c0_154, %c0_155] : memref<1x32xf32, #tpu.memory_space<vmem>>, vector<1x32xf32>
    %222 = vector.broadcast %221 : vector<1x32xf32> to vector<8x32xf32>
    %223 = arith.addf %220, %222 : vector<8x32xf32>
    %c7_156 = arith.constant 7 : index
    %c0_157 = arith.constant 0 : index
    %c0_158 = arith.constant 0 : index
    %224 = vector.load %arg7[%c7_156, %c0_157, %c0_158] : memref<8x8x32xf32, #tpu.memory_space<vmem>>, vector<1x8x32xf32>
    %225 = vector.shape_cast %224 : vector<1x8x32xf32> to vector<8x32xf32>
    %226 = vector.shape_cast %223 : vector<8x32xf32> to vector<1x8x32xf32>
    tpu.vector_store %arg7[%c7_156, %c0_157, %c0_158], %226 {strides = array<i32>} : memref<8x8x32xf32, #tpu.memory_space<vmem>>, vector<1x8x32xf32>,
    return
  }
  func.func @transform_0(%arg0: i32) -> (i32, i32, i32) {
    %c0_i32 = arith.constant 0 : i32
    %c0_i32_0 = arith.constant 0 : i32
    %c0_i32_1 = arith.constant 0 : i32
    return %arg0, %c0_i32, %c0_i32_0 : i32, i32, i32
  }
  func.func @transform_1(%arg0: i32) -> (i32, i32, i32) {
    %c0_i32 = arith.constant 0 : i32
    %c0_i32_0 = arith.constant 0 : i32
    %c0_i32_1 = arith.constant 0 : i32
    return %arg0, %c0_i32, %c0_i32_0 : i32, i32, i32
  }
  func.func @transform_2(%arg0: i32) -> (i32, i32) {
    %c0_i32 = arith.constant 0 : i32
    %c0_i32_0 = arith.constant 0 : i32
    %c0_i32_1 = arith.constant 0 : i32
    return %c0_i32, %c0_i32_0 : i32, i32
  }
  func.func @transform_3(%arg0: i32) -> (i32, i32) {
    %c0_i32 = arith.constant 0 : i32
    %c0_i32_0 = arith.constant 0 : i32
    %c0_i32_1 = arith.constant 0 : i32
    return %c0_i32, %c0_i32_0 : i32, i32
  }
  func.func @transform_4(%arg0: i32) -> (i32, i32) {
    %c0_i32 = arith.constant 0 : i32
    %c0_i32_0 = arith.constant 0 : i32
    %c0_i32_1 = arith.constant 0 : i32
    return %c0_i32, %c0_i32_0 : i32, i32
  }
  func.func @transform_5(%arg0: i32) -> (i32, i32) {
    %c0_i32 = arith.constant 0 : i32
    %c0_i32_0 = arith.constant 0 : i32
    %c0_i32_1 = arith.constant 0 : i32
    return %c0_i32, %c0_i32_0 : i32, i32
  }
  func.func @transform_6(%arg0: i32) -> (i32, i32, i32) {
    %c0_i32 = arith.constant 0 : i32
    %c0_i32_0 = arith.constant 0 : i32
    %c0_i32_1 = arith.constant 0 : i32
    return %arg0, %c0_i32, %c0_i32_0 : i32, i32, i32
  }
}

module attributes {stable_mosaic.version = 11 : i64} {
  func.func @_linear_kernel(%arg0: i32, %arg1: memref<8x32xf32, #tpu.memory_space<vmem>>, %arg2: memref<32x3xbf16, #tpu.memory_space<vmem>>, %arg3: memref<1x3xf32, #tpu.memory_space<vmem>>, %arg4: memref<8x3xf32, #tpu.memory_space<vmem>>) attributes {dimension_semantics = [#tpu.dimension_semantics<parallel>], iteration_bounds = array<i64: 1>, scalar_prefetch = 0 : i64, scratch_operands = 0 : i64, tpu.core_type = #tpu.core_type<tc>, window_params = [{transform_indices = @transform_0, window_bounds = array<i64: 8, 32>}, {pipeline_mode = #tpu.pipeline_mode<synchronous>, transform_indices = @transform_1, window_bounds = array<i64: 32, 3>}, {pipeline_mode = #tpu.pipeline_mode<synchronous>, transform_indices = @transform_2, window_bounds = array<i64: 1, 3>}, {transform_indices = @transform_3, window_bounds = array<i64: 8, 3>}]} {
    %c0 = arith.constant 0 : index
    %c0_0 = arith.constant 0 : index
    %0 = vector.load %arg1[%c0, %c0_0] : memref<8x32xf32, #tpu.memory_space<vmem>>, vector<8x32xf32>
    %c0_1 = arith.constant 0 : index
    %c0_2 = arith.constant 0 : index
    %1 = vector.load %arg2[%c0_1, %c0_2] : memref<32x3xbf16, #tpu.memory_space<vmem>>, vector<32x3xbf16>
    %2 = arith.truncf %0 : vector<8x32xf32> to vector<8x32xbf16>
    %cst = arith.constant dense<0.000000e+00> : vector<8x3xf32>
    %3 = tpu.matmul %2, %1, %cst {dimension_numbers = #tpu.dot_dimension_numbers<[1], [0], [0], [1], [0, 0, 1, 1], [], []>} : vector<8x32xbf16>, vector<32x3xbf16>, vector<8x3xf32> -> vector<8x3xf32>
    %c0_3 = arith.constant 0 : index
    %c0_4 = arith.constant 0 : index
    %4 = vector.load %arg3[%c0_3, %c0_4] : memref<1x3xf32, #tpu.memory_space<vmem>>, vector<1x3xf32>
    %5 = vector.broadcast %4 : vector<1x3xf32> to vector<8x3xf32>
    %6 = arith.addf %3, %5 : vector<8x3xf32>
    %c0_5 = arith.constant 0 : index
    %c0_6 = arith.constant 0 : index
    %7 = vector.load %arg4[%c0_5, %c0_6] : memref<8x3xf32, #tpu.memory_space<vmem>>, vector<8x3xf32>
    tpu.vector_store %arg4[%c0_5, %c0_6], %6 {strides = array<i32>} : memref<8x3xf32, #tpu.memory_space<vmem>>, vector<8x3xf32>,
    return
  }
  func.func @transform_0(%arg0: i32) -> (i32, i32) {
    %c0_i32 = arith.constant 0 : i32
    %c0_i32_0 = arith.constant 0 : i32
    return %arg0, %c0_i32 : i32, i32
  }
  func.func @transform_1(%arg0: i32) -> (i32, i32) {
    %c0_i32 = arith.constant 0 : i32
    %c0_i32_0 = arith.constant 0 : i32
    %c0_i32_1 = arith.constant 0 : i32
    return %c0_i32, %c0_i32_0 : i32, i32
  }
  func.func @transform_2(%arg0: i32) -> (i32, i32) {
    %c0_i32 = arith.constant 0 : i32
    %c0_i32_0 = arith.constant 0 : i32
    %c0_i32_1 = arith.constant 0 : i32
    return %c0_i32, %c0_i32_0 : i32, i32
  }
  func.func @transform_3(%arg0: i32) -> (i32, i32) {
    %c0_i32 = arith.constant 0 : i32
    %c0_i32_0 = arith.constant 0 : i32
    return %arg0, %c0_i32 : i32, i32
  }
}

</mosaic_0001>

<bundles_post_ra>
// kernel: fwd.12
= control target key start
LH: loop header
LB: loop body
LE: loop exit
PB: predicated region body
PF: predicated region fallthrough
CT: control target
= control target key end

     0   :  { %vm36_vm0 = vcmask 1045504   ;;  %v101_v0 = vmov 0.0   ;;  %vm102_vm1 = vmmov 0   ;;  %vm32_vm2 = vcmask 97280   ;;  %s141_s1 = inlined_call_operand.vmem [shape: bf16[12,128], index: 1, kind: input, shape index: {}]   ;;  %s142_s0 = inlined_call_operand.vmem [shape: f32[16,12], index: 0, kind: input, shape index: {}]   ;;  %s143_s2 = inlined_call_operand.vmem [shape: f32[1,128], index: 2, kind: input, shape index: {}]   ;;  %s144_s3 = inlined_call_operand.vmem [shape: f32[16,128], index: 3, kind: output, shape index: {}]  }
   0x1   :  { %92 = vmatprep.subr.bf16.mxu0 %v101_v0  ;;  %v100_v1 = vld [vmem:[%s141_s1] sm:$0x3f]   ;;  %94 = vmatprep.mubr.msk.bf16.mxu0 %vm102_vm1, %v101_v0  ;;  %v16_v3 = vld [vmem:[%s142_s0 + $0x8] sm:$0xff] }
   0x2   :  { %v15_v2 = vld [vmem:[%s142_s0] sm:$0xff]  ;;  %v38_v4 = vsel %vm36_vm0, %v100_v1, 0 }
   0x3   :  { %v19_v5 = vpack.c.bf16 %v16_v3, %v15_v2  ;;  %93 = vmatpush3.bf16.msra.mxu0 %v38_v4  ;;  %v87_v6 = vld [vmem:[%s143_s2] ss:$0 sm:$0xff] }
   0x6   :  { %95 = vmatmul.mubr.msk.bf16.vlgmr.msra.gmra.mrb[0].mxu0 %vm32_vm2, %v19_v5 }
  0xd9   :  { %v74_v7 = vpop.f32.mrb[0].mxu0 }
  0xda   :  { %v75_v8 = vadd.f32 %v87_v6, %v74_v7  ;;  %v96_v9 = vpop.f32.mrb[1].mxu0 }
  0xdb   :  { %v77_v10 = vpop.f32.mrb[2].mxu0 }
  0xdc   :  { %81 = vst [vmem:[%s144_s3] sm:$0xff] %v75_v8  ;;  %v78_v11 = vadd.f32 %v87_v6, %v77_v10  ;;  %v97_v12 = vpop.f32.mrb[3].mxu0 }
  0xde   :  { %82 = vst [vmem:[%s144_s3 + $0x8] sm:$0xff] %v78_v11 }

// kernel: fwd.15
= control target key start
LH: loop header
LB: loop body
LE: loop exit
PB: predicated region body
PF: predicated region fallthrough
CT: control target
= control target key end

     0   :  { %v136_v0 = vmov 0.0   ;;  %vm137_vm0 = vmmov 0   ;;  %vm43_vm1 = vcmask 261120   ;;  %vm88_vm2 = vcmask 257024   ;;  %s139_s27 = smov 64   ;;  %s191_s1 = inlined_call_operand.vmem [shape: bf16[32,96], index: 1, kind: input, shape index: {}]   ;;  %s192_s0 = inlined_call_operand.vmem [shape: f32[8,32], index: 0, kind: input, shape index: {}]   ;;  %s193_s2 = inlined_call_operand.vmem [shape: f32[1,96], index: 2, kind: input, shape index: {}]   ;;  %s194_s3 = inlined_call_operand.vmem [shape: bf16[8,32], index: 3, kind: output, shape index: {0}]   ;;  %s195_s4 = inlined_call_operand.vmem [shape: bf16[8,32], index: 4, kind: output, shape index: {1}]   ;;  %s196_s5 = inlined_call_operand.vmem [shape: bf16[8,32], index: 5, kind: output, shape index: {2}]  }
   0x1   :  { %122 = vmatprep.subr.bf16.mxu0 %v136_v0  ;;  %v134_v1 = vld [vmem:[%s191_s1] sm:$0xff]   ;;  %126 = vmatprep.mubr.msk.bf16.mxu0 %vm137_vm0, %v136_v0  ;;  %v135_v2 = vld [vmem:[%s191_s1 + $0x8] sm:$0xff]   ;;  %s138_s1 = smov 96  }
   0x2   :  { %123 = vmatpush3.bf16.msra.mxu0 %v134_v1  ;;  %v18_v3 = vld [vmem:[%s192_s0] sm:$0xff] }
   0x3   :  { %124 = vmatprep.subr.bf16.mxu0 %v136_v0  ;;  %v23_v4 = vpack.c.bf16 %v18_v3, %v18_v3  ;;  %v113_v5 = vld [vmem:[%s193_s2] ss:$0 sm:$0xff] }
   0x6   :  { %125 = vmatpush3.bf16.msra.mxu0 %v135_v2 }
   0x9   :  { %127 = vmatmul.mubr.msk.bf16.vlgmr.msra.gmra.mrb[0].mxu0 %vm43_vm1, %v23_v4 }
  0xdc   :  { %v81_v6 = vpop.f32.mrb[0].mxu0 }
  0xdd   :  { %v82_v7 = vadd.f32 %v113_v5, %v81_v6  ;;  %v128_v8 = vpop.f32.mrb[1].mxu0 }
  0xde   :  { %v84_v9 = vpop.f32.mrb[2].mxu0 }
  0xdf   :  { %v87_v10 = vpack.c.bf16 %v82_v7, %v82_v7  ;;  %v129_v11 = vpop.f32.mrb[3].mxu0 }
  0xe1   :  { %93 = vrot.lane.b32.xlu0 %v87_v10, %s138_s1  ;;  %89 = vst.msk [vmem:[%s194_s3] sm:$0xf] %vm88_vm2, %v87_v10 }
  0xe5   :  { %97 = vrot.lane.b32.xlu0 %v87_v10, %s139_s27 }
 0x153   :  { %v94_v12 = vpop.permute.xlu0 %93 }
 0x154   :  { %96 = vst.msk [vmem:[%s195_s4] sm:$0xf] %vm88_vm2, %v94_v12 }
 0x157   :  { %v98_v13 = vpop.permute.xlu0 %97 }
 0x158   :  { %100 = vst.msk [vmem:[%s196_s5] sm:$0xf] %vm88_vm2, %v98_v13 }

// kernel: fwd.16
= control target key start
LH: loop header
LB: loop body
LE: loop exit
PB: predicated region body
PF: predicated region fallthrough
CT: control target
= control target key end

     0   :  { %s1227_s27 = smov 0   ;;  %s1355_s0 = inlined_call_operand.vmem [shape: bf16[2,4,32], index: 0, kind: input, shape index: {}]   ;;  %s1356_s1 = inlined_call_operand.vmem [shape: bf16[2,4,32], index: 1, kind: input, shape index: {}]   ;;  %s1357_s2 = inlined_call_operand.vmem [shape: bf16[2,4,32], index: 2, kind: input, shape index: {}]   ;;  %s1358_s3 = inlined_call_operand.vmem [shape: f32[2,4,32], index: 3, kind: input, shape index: {}]   ;;  %s1359_s4 = inlined_call_operand.vmem [shape: bf16[32,32], index: 4, kind: input, shape index: {}]   ;;  %s1360_s5 = inlined_call_operand.vmem [shape: f32[1,32], index: 5, kind: input, shape index: {}]   ;;  %s1361_s6 = inlined_call_operand.vmem [shape: f32[1,32], index: 6, kind: input, shape index: {}]   ;;  %s1362_s7 = inlined_call_operand.vmem [shape: f32[1,32], index: 7, kind: input, shape index: {}]   ;;  %s1363_s8 = inlined_call_operand.vmem [shape: f32[2,4,32], index: 8, kind: output, shape index: {}]  }
   0x1 LB: > { %s1027_s28 = sadd.s32 4294967295, %s1171_s27   ;;  %p1031_p0 = scmp.ge.s32.totalorder %s1171_s27, 1  ;;  %s1171_s27 = sphi %s1227_s27, %s18_s27  }
   0x2   : > { %p288_p1 = scmp.lt.s32.totalorder %s1171_s27, 3 }
   0x4   : > { %p289_p2 = pnand %p1031_p0, %p288_p1 }
   0x5   : > { %p332_p3 = scmp.lt.s32.totalorder (!%p289_p2), %s1027_s28, 1  ;;  %v1173_v0 = vmov (!%p289_p2), 0.0   ;;  %vm1174_vm0 = vmmov (!%p289_p2), 0   ;;  %vm356_vm1 = vcmask (!%p289_p2), 64512   ;;  %v1175_v4 = vmov (!%p289_p2), 1983009808  }
   0x6   : > { %292 = sbr.rel (%p289_p2) target bundleno = 1692 (0x69c), region = 52  ;;  %1072 = vmatprep.subr.bf16.mxu0 (!%p289_p2), %v1173_v0  ;;  %1078 = vmatprep.subr.bf16.mxu1 (!%p289_p2), %v1173_v0  ;;  %v466_v5 = vunpack.c.l.s4 (!%p289_p2), %v1175_v4  ;;  %v468_v6 = vlaneseq (!%p289_p2)  ;;  %s1176_s14 = smov (!%p289_p2), 120   ;;  %vm403_vm2 = vcmask (!%p289_p2), 27648   ;;  %vm418_vm3 = vcmask (!%p289_p2), 1041408  }
   0x7   : > { %1074 = vmatprep.mubr.msk.bf16.mxu0 (!%p289_p2), %vm1174_vm0, %v1173_v0  ;;  %1080 = vmatprep.mubr.msk.bf16.mxu1 (!%p289_p2), %vm1174_vm0, %v1173_v0  ;;  %s1177_s15 = smov (!%p289_p2), 112   ;;  %s1178_s16 = smov (!%p289_p2), 104   ;;  %vm414_vm4 = vcmask (!%p289_p2), 31744   ;;  %vm831_vm5 = vcmask (!%p289_p2), 130048   ;;  %vm833_vm6 = vcmask (!%p289_p2), 195584   ;;  %vm853_vm7 = vcmask (!%p289_p2), 261120  }
   0x8   : > { %v467_v7 = vunpack.c.0.s8 (!%p289_p2), %v466_v5  ;;  %v469_v8 = vshrl.u32 (!%p289_p2), %v468_v6, 7  ;;  %s1179_s24 = smov (!%p289_p2), 8   ;;  %s1180_s25 = smov (!%p289_p2), 16   ;;  %vm908_vm8 = vcmask (!%p289_p2), 257024  }
   0x9   : > { %s1181_s26 = smov (!%p289_p2), 24  }
   0xa   : > { %v1259_v9 = vsub.s32 (!%p289_p2), %v467_v7, %v469_v8 }
   0xd   : > { %s1365_s28 = smov (!%p332_p3, %s1027_s28), 1 }
   0xe   : > { %s1244_s29 = sshll.u32 %s1365_s28, 1 }
   0xf   : > { %s339_s10 = scalar_lea.vmem %s1356_s1, %s1244_s29  ;;  %s335_s13 = scalar_lea.vmem %s1355_s0, %s1244_s29 }
  0x10   : > { %v354_v1 = vld [vmem:[%s339_s10] sm:$0x3]  ;;  %s343_s19 = scalar_lea.vmem %s1357_s2, %s1244_s29  ;;  %s1035_s29 = sshll.u32 %s1365_s28, 2 }
  0x11   : > { %v361_v2 = vsel %vm356_vm1, %v354_v1, 0  ;;  %v353_v3 = vld [vmem:[%s335_s13] sm:$0x3]  ;;  %v481_v11 = vrot.slane %v354_v1, %v1259_v9  ;;  %s347_s10 = scalar_lea.vmem %s1358_s3, %s1035_s29  ;;  %s351_s18 = scalar_lea.vmem %s1363_s8, %s1035_s29 }
  0x12   : > { %1073 = vmatpush3.bf16.xpose.msra.mxu0 %v361_v2  ;;  %v471_v10 = vrot.slane %v353_v3, %v1259_v9  ;;  %v355_v17 = vld [vmem:[%s343_s19] sm:$0x3] }
  0x13   : > { %1090 = vmatprep.subr.bf16.mxu0 %v1173_v0  ;;  %v420_v18 = vsel %vm418_vm3, %v355_v17, 0  ;;  %v547_v47 = vrot.slane %v355_v17, %v1259_v9  ;;  %v1145_v17 = vld [vmem:[%s1359_s4] sm:$0xff]  }
  0x14   : > { %472 = vrot.lane.b32.xlu1 %v471_v10, %s1176_s14  ;;  %1079 = vmatpush3.bf16.msra.mxu1 %v420_v18 }
  0x15   : > { %1084 = vmatprep.subr.bf16.mxu1 %v1173_v0 }
  0x18   : > { %600 = vrot.lane.b32.xlu1 %v481_v11, %s1177_s15 }
  0x19   : > { %1075 = vmatmul.mubr.msk.bf16.vlgmr.msra.gmra.mrb[0].mxu0 %vm356_vm1, %v353_v3 }
  0x1a   : > { %1092 = vmatprep.mubr.msk.bf16.mxu0 %vm1174_vm0, %v1173_v0 }
  0x1c   : > { %598 = vrot.lane.b32.xlu1 %v471_v10, %s1177_s15 }
  0x20   : > { %710 = vrot.lane.b32.xlu1 %v481_v11, %s1178_s16 }
  0x24   : > { %708 = vrot.lane.b32.xlu1 %v471_v10, %s1178_s16 }
  0x86   : > { %v473_v24 = vpop.permute.xlu1 %472 }
  0x8a   : > { %v601_v27 = vpop.permute.xlu1 %600 }
  0x8b   : > { %v606_v28 = vsel %vm356_vm1, %v601_v27, 0 }
  0x8e   : > { %v599_v29 = vpop.permute.xlu1 %598 }
  0x92   : > { %v711_v30 = vpop.permute.xlu1 %710 }
  0x93   : > { %v716_v31 = vsel %vm356_vm1, %v711_v30, 0 }
  0x96   : > { %v709_v32 = vpop.permute.xlu1 %708 }
  0xec   : > { %v397_v12 = vpop.f32.mrb[0].mxu0 }
  0xed   : > { %v1076_v13 = vpop.f32.mrb[1].mxu0  ;;  %v404_v14 = vsel %vm403_vm2, %v397_v12, -inf }
  0xee   : > { %405 = vmax.xlane.f32.xlu0 %v404_v14  ;;  %v400_v15 = vpop.f32.mrb[2].mxu0 }
  0xef   : > { %v1077_v16 = vpop.f32.mrb[3].mxu0 }
 0x104   : > { %482 = vrot.lane.b32.xlu0 %v481_v11, %s1176_s14 }
 0x17b   : > { %v406_v19 = vpop.xlane.xlu0 %405 }
 0x17c   : > { %v407_v20 = vsub.f32 %v397_v12, %v406_v19 }
 0x17e   : > { %v408_v21 = vmul.f32 1.442695, %v407_v20  ;;  %v1146_v20 = vld [vmem:[%s1359_s4 + $0x8] sm:$0xff]  }
 0x17f   : > { %v483_v22 = vpop.permute.xlu0 %482 }
 0x180   : > { %1147 = vpow2.f32 %v408_v21  ;;  %v488_v25 = vsel %vm356_vm1, %v483_v22, 0 }
 0x18a   : > { %v1276_v23 = vpop.eup %1147 }
 0x18b   : > { %v413_v26 = vpack.c.bf16 %v1276_v23, %v1276_v23  ;;  %v410_v14 = vsel %vm403_vm2, %v1276_v23, 0.0 }
 0x18d   : > { %1081 = vmatmul.mubr.msk.bf16.vlgmr.msra.gmra.mrb[0].mxu1 %vm414_vm4, %v413_v26 }
 0x18e   : > { %1085 = vmatpush3.bf16.xpose.msra.mxu1 %v488_v25  ;;  %1086 = vmatprep.mubr.msk.bf16.mxu1 %vm1174_vm0, %v1173_v0 }
 0x18f   : > { %1096 = vmatprep.subr.bf16.mxu1 %v1173_v0 }
 0x195   : > { %1087 = vmatmul.mubr.msk.bf16.vlgmr.msra.gmra.mrb[4].mxu1 %vm356_vm1, %v473_v24 }
 0x196   : > { %1097 = vmatpush3.bf16.xpose.msra.mxu1 %v606_v28  ;;  %1098 = vmatprep.mubr.msk.bf16.mxu1 %vm1174_vm0, %v1173_v0 }
 0x197   : > { %1108 = vmatprep.subr.bf16.mxu1 %v1173_v0 }
 0x19d   : > { %1099 = vmatmul.mubr.msk.bf16.vlgmr.msra.gmra.mrb[8].mxu1 %vm356_vm1, %v599_v29 }
 0x19e   : > { %1109 = vmatpush3.bf16.xpose.msra.mxu1 %v716_v31  ;;  %1110 = vmatprep.mubr.msk.bf16.mxu1 %vm1174_vm0, %v1173_v0 }
 0x19f   : > { %1120 = vmatprep.subr.bf16.mxu1 %v1173_v0 }
 0x1a5   : > { %1111 = vmatmul.mubr.msk.bf16.vlgmr.msra.gmra.mrb[12].mxu1 %vm356_vm1, %v709_v32 }
 0x1a6   : > { %1124 = vmatprep.mubr.msk.bf16.mxu1 %vm1174_vm0, %v1173_v0  ;;  %1121 = vmatpush3.bf16.msra.mxu1 %v1145_v17 }
 0x1a7   : > { %1122 = vmatprep.subr.bf16.mxu1 %v1173_v0 }
 0x1aa   : > { %1123 = vmatpush3.bf16.msra.mxu1 %v1146_v20 }
 0x260   : > { %v1298_v33 = vpop.f32.mrb[0].mxu1 }
 0x261   : > { %v1082_v34 = vpop.f32.mrb[1].mxu1 }
 0x262   : > { %v459_v35 = vpop.f32.mrb[2].mxu1 }
 0x263   : > { %v1083_v36 = vpop.f32.mrb[3].mxu1 }
 0x268   : > { %v524_v37 = vpop.f32.mrb[4].mxu1 }
 0x269   : > { %v1088_v38 = vpop.f32.mrb[5].mxu1  ;;  %v530_v39 = vsel %vm403_vm2, %v524_v37, -inf }
 0x26a   : > { %531 = vmax.xlane.f32.xlu1 %v530_v39  ;;  %v527_v40 = vpop.f32.mrb[6].mxu1 }
 0x26b   : > { %v1089_v41 = vpop.f32.mrb[7].mxu1 }
 0x270   : > { %v642_v42 = vpop.f32.mrb[8].mxu1 }
 0x271   : > { %v648_v43 = vsel %vm403_vm2, %v642_v42, -inf  ;;  %v1100_v44 = vpop.f32.mrb[9].mxu1 }
 0x272   : > { %649 = vmax.xlane.f32.xlu0 %v648_v43  ;;  %v645_v45 = vpop.f32.mrb[10].mxu1 }
 0x273   : > { %v1101_v46 = vpop.f32.mrb[11].mxu1 }
 0x278   : > { %v752_v48 = vpop.f32.mrb[12].mxu1 }
 0x279   : > { %v1112_v49 = vpop.f32.mrb[13].mxu1  ;;  %v758_v52 = vsel %vm403_vm2, %v752_v48, -inf }
 0x27a   : > { %v755_v50 = vpop.f32.mrb[14].mxu1 }
 0x27b   : > { %658 = vrot.lane.b32.xlu1 %v547_v47, %s1177_s15  ;;  %v1113_v51 = vpop.f32.mrb[15].mxu1 }
 0x288   : > { %548 = vrot.lane.b32.xlu0 %v547_v47, %s1176_s14 }
 0x29f   : > { %759 = vmax.xlane.f32.xlu1 %v758_v52 }
 0x2b0   : > { %768 = vrot.lane.b32.xlu1 %v547_v47, %s1178_s16 }
 0x2f7   : > { %v532_v53 = vpop.xlane.xlu1 %531 }
 0x2f8   : > { %v533_v54 = vsub.f32 %v524_v37, %v532_v53 }
 0x2fa   : > { %v534_v55 = vmul.f32 1.442695, %v533_v54 }
 0x2fb   : > { %v659_v62 = vpop.permute.xlu1 %658 }
 0x2fc   : > { %1149 = vpow2.f32 %v534_v55  ;;  %v664_v2 = vsel %vm418_vm3, %v659_v62, 0 }
 0x2ff   : > { %v650_v56 = vpop.xlane.xlu0 %649 }
 0x300   : > { %v651_v57 = vsub.f32 %v642_v42, %v650_v56 }
 0x302   : > { %v652_v58 = vmul.f32 1.442695, %v651_v57 }
 0x303   : > { %v549_v59 = vpop.permute.xlu0 %548 }
 0x304   : > { %1151 = vpow2.f32 %v652_v58  ;;  %v554_v60 = vsel %vm418_vm3, %v549_v59, 0 }
 0x305   : > { %1091 = vmatpush3.bf16.msra.mxu0 %v554_v60 }
 0x306   : > { %v1150_v61 = vpop.eup %1149  ;;  %1102 = vmatprep.subr.bf16.mxu0 %v1173_v0 }
 0x307   : > { %v536_v63 = vsel %vm403_vm2, %v1150_v61, 0.0  ;;  %v539_v1 = vpack.c.bf16 %v1150_v61, %v1150_v61 }
 0x308   : > { %537 = vadd.xlane.f32.xlu0 %v536_v63 }
 0x309   : > { %1093 = vmatmul.mubr.msk.bf16.vlgmr.msra.gmra.mrb[4].mxu0 %vm414_vm4, %v539_v1 }
 0x30a   : > { %1103 = vmatpush3.bf16.msra.mxu0 %v664_v2  ;;  %1104 = vmatprep.mubr.msk.bf16.mxu0 %vm1174_vm0, %v1173_v0  ;;  %v1049_v2 = vld [vmem:[%s1361_s6] ss:$0 sm:$0xff] }
 0x30b   : > { %1114 = vmatprep.subr.bf16.mxu0 %v1173_v0 }
 0x30e   : > { %v1152_v3 = vpop.eup %1151 }
 0x30f   : > { %v654_v4 = vsel %vm403_vm2, %v1152_v3, 0.0  ;;  %v657_v5 = vpack.c.bf16 %v1152_v3, %v1152_v3 }
 0x310   : > { %655 = vadd.xlane.f32.xlu1 %v654_v4  ;;  %v1050_v4 = vld [vmem:[%s1362_s7] ss:$0 sm:$0xff] }
 0x311   : > { %1105 = vmatmul.mubr.msk.bf16.vlgmr.msra.gmra.mrb[8].mxu0 %vm414_vm4, %v657_v5 }
 0x312   : > { %1116 = vmatprep.mubr.msk.bf16.mxu0 %vm1174_vm0, %v1173_v0 }
 0x32c   : > { %v760_v6 = vpop.xlane.xlu1 %759 }
 0x32d   : > { %v761_v7 = vsub.f32 %v752_v48, %v760_v6  ;;  %v835_v48 = vld [vmem:[%s347_s10] sm:$0xf] }
 0x32f   : > { %v762_v8 = vmul.f32 1.442695, %v761_v7 }
 0x330   : > { %v769_v9 = vpop.permute.xlu1 %768 }
 0x331   : > { %1153 = vpow2.f32 %v762_v8  ;;  %v774_v10 = vsel %vm418_vm3, %v769_v9, 0 }
 0x332   : > { %1115 = vmatpush3.bf16.msra.mxu0 %v774_v10 }
 0x33b   : > { %v1154_v11 = vpop.eup %1153 }
 0x33c   : > { %v764_v12 = vsel %vm403_vm2, %v1154_v11, 0.0  ;;  %v767_v13 = vpack.c.bf16 %v1154_v11, %v1154_v11 }
 0x33d   : > { %765 = vadd.xlane.f32.xlu0 %v764_v12 }
 0x33e   : > { %1117 = vmatmul.mubr.msk.bf16.vlgmr.msra.gmra.mrb[12].mxu0 %vm414_vm4, %v767_v13 }
 0x341   : > { %411 = vadd.xlane.f32.xlu0 %v410_v14 }
 0x395   : > { %v538_v15 = vpop.xlane.xlu0 %537 }
 0x396   : > { %1155 = vrcp.f32 %v538_v15 }
 0x39d   : > { %v656_v16 = vpop.xlane.xlu1 %655 }
 0x39e   : > { %1157 = vrcp.f32 %v656_v16 }
 0x3a0   : > { %v1156_v18 = vpop.eup %1155 }
 0x3a8   : > { %v1158_v25 = vpop.eup %1157 }
 0x3ca   : > { %v766_v31 = vpop.xlane.xlu0 %765 }
 0x3cb   : > { %1159 = vrcp.f32 %v766_v31 }
 0x3ce   : > { %v412_v38 = vpop.xlane.xlu0 %411 }
 0x3cf   : > { %1161 = vrcp.f32 %v412_v38 }
 0x3d5   : > { %v1160_v32 = vpop.eup %1159 }
 0x3d9   : > { %v1162_v39 = vpop.eup %1161 }
 0x3da   : > { %v463_v41 = vmul.f32 %v1162_v39, %v1298_v33  ;;  %v1048_v33 = vld [vmem:[%s1360_s5] ss:$0 sm:$0xff] }
 0x3dc   : > { %v590_v19 = vpop.f32.mrb[4].mxu0 }
 0x3dd   : > { %v597_v21 = vmul.f32 %v1156_v18, %v590_v19  ;;  %v1094_v22 = vpop.f32.mrb[5].mxu0 }
 0x3de   : > { %v593_v23 = vpop.f32.mrb[6].mxu0 }
 0x3df   : > { %819 = vrot.lane.b32.xlu1 %v597_v21, %s1179_s24  ;;  %v1095_v24 = vpop.f32.mrb[7].mxu0 }
 0x3e4   : > { %v700_v26 = vpop.f32.mrb[8].mxu0 }
 0x3e5   : > { %v707_v27 = vmul.f32 %v1158_v25, %v700_v26  ;;  %v1106_v28 = vpop.f32.mrb[9].mxu0 }
 0x3e6   : > { %v703_v29 = vpop.f32.mrb[10].mxu0 }
 0x3e7   : > { %823 = vrot.lane.b32.xlu0 %v707_v27, %s1180_s25  ;;  %v1107_v30 = vpop.f32.mrb[11].mxu0 }
 0x411   : > { %v810_v34 = vpop.f32.mrb[12].mxu0 }
 0x412   : > { %v817_v35 = vmul.f32 %v1160_v32, %v810_v34  ;;  %v1118_v36 = vpop.f32.mrb[13].mxu0 }
 0x413   : > { %v813_v0 = vpop.f32.mrb[14].mxu0 }
 0x414   : > { %827 = vrot.lane.b32.xlu1 %v817_v35, %s1181_s26  ;;  %v1119_v37 = vpop.f32.mrb[15].mxu0 }
 0x451   : > { %v820_v40 = vpop.permute.xlu1 %819 }
 0x452   : > { %v830_v43 = vsel %vm356_vm1, %v463_v41, %v820_v40 }
 0x459   : > { %v824_v42 = vpop.permute.xlu0 %823 }
 0x45a   : > { %v832_v44 = vsel %vm831_vm5, %v830_v43, %v824_v42 }
 0x486   : > { %v828_v45 = vpop.permute.xlu1 %827 }
 0x487   : > { %v834_v46 = vsel %vm833_vm6, %v832_v44, %v828_v45 }
 0x488   : > { %v840_v47 = vpack.c.bf16 %v834_v46, %v834_v46 }
 0x48a   : > { %1125 = vmatmul.mubr.msk.bf16.vlgmr.msra.gmra.mrb[16].mxu1 %vm853_vm7, %v840_v47 }
 0x55d   : > { %v891_v49 = vpop.f32.mrb[16].mxu1 }
 0x55e   : > { %v897_v50 = vadd.f32 %v891_v49, %v835_v48  ;;  %v1126_v51 = vpop.f32.mrb[17].mxu1 }
 0x55f   : > { %v894_v52 = vpop.f32.mrb[18].mxu1 }
 0x560   : > { %v1127_v53 = vpop.f32.mrb[19].mxu1  ;;  %v905_v54 = vadd.f32 %v1048_v33, %v897_v50 }
 0x562   : > { %v909_v55 = vsel %vm908_vm8, %v905_v54, 0.0 }
 0x563   : > { %910 = vadd.xlane.f32.xlu1 %v909_v55 }
 0x5f0   : > { %v911_v56 = vpop.xlane.xlu1 %910 }
 0x5f1   : > { %v913_v57 = vmul.f32 0.03125, %v911_v56 }
 0x5f3   : > { %v914_v58 = vsub.f32 %v905_v54, %v913_v57 }
 0x5f5   : > { %v915_v59 = vmul.f32 %v914_v58, %v914_v58 }
 0x5f7   : > { %v916_v60 = vsel %vm908_vm8, %v915_v59, 0.0 }
 0x5f8   : > { %917 = vadd.xlane.f32.xlu0 %v916_v60 }
 0x685   : > { %v918_v61 = vpop.xlane.xlu0 %917 }
 0x686   : > { %v919_v62 = vmul.f32 0.03125, %v918_v61 }
 0x688   : > { %v920_v63 = vadd.f32 1e-05, %v919_v62 }
 0x68a   : > { %1163 = vrsqrt.f32 %v920_v63 }
 0x694   : > { %v1164_v1 = vpop.eup %1163 }
 0x695   : > { %v922_v3 = vmul.f32 %v1164_v1, %v914_v58 }
 0x697   : > { %v929_v5 = vmul.f32 %v1049_v2, %v922_v3 }
 0x699   : > { %v936_v6 = vadd.f32 %v1050_v4, %v929_v5 }
 0x69b   : > { %937 = vst.msk [vmem:[%s351_s18] sm:$0xf] %vm908_vm8, %v936_v6 }
 0x69c PF: > { %s18_s27 = sadd.s32 1, %s1171_s27  }
 0x69d   : > { %p15_p4 = scmp.ge.s32.totalorder %s18_s27, 4  }
 0x69f   :  { %17 = sbr.rel (!%p15_p4) target bundleno = 1 (0x1), region = 91 }

// kernel: fwd.13
= control target key start
LH: loop header
LB: loop body
LE: loop exit
PB: predicated region body
PF: predicated region fallthrough
CT: control target
= control target key end

     0   :  { %vm53_vm0 = vcmask 261120   ;;  %vm163_vm1 = vcmask 257024   ;;  %s297_s16 = smov 96   ;;  %s462_s1 = inlined_call_operand.vmem [shape: bf16[32,96], index: 1, kind: input, shape index: {}]   ;;  %s463_s0 = inlined_call_operand.vmem [shape: f32[64,32], index: 0, kind: input, shape index: {}]   ;;  %s464_s2 = inlined_call_operand.vmem [shape: f32[1,96], index: 2, kind: input, shape index: {}]   ;;  %s465_s3 = inlined_call_operand.vmem [shape: bf16[64,32], index: 3, kind: output, shape index: {0}]   ;;  %s466_s4 = inlined_call_operand.vmem [shape: bf16[64,32], index: 4, kind: output, shape index: {1}]   ;;  %s467_s5 = inlined_call_operand.vmem [shape: bf16[64,32], index: 5, kind: output, shape index: {2}]  }
   0x1   :  { %v295_v0 = vld [vmem:[%s462_s1] sm:$0xff]   ;;  %v296_v1 = vld [vmem:[%s462_s1 + $0x8] sm:$0xff]   ;;  %v20_v7 = vld [vmem:[%s463_s0 + $0x10] sm:$0xff]  ;;  %s298_s1 = smov 64  }
   0x2   :  { %277 = vmatprep.subr.bf16.mxu0 %v295_v0  ;;  %289 = vmatprep.subr.bf16.mxu1 %v295_v0  ;;  %v18_v2 = vld [vmem:[%s463_s0] sm:$0xff]  ;;  %v19_v3 = vld [vmem:[%s463_s0 + $0x8] sm:$0xff]  ;;  %v21_v8 = vld [vmem:[%s463_s0 + $0x18] sm:$0xff] }
   0x3   :  { %v22_v4 = vld [vmem:[%s463_s0 + $0x20] sm:$0xff]  ;;  %278 = vmatpush3.bf16.msra.mxu0 %v295_v0  ;;  %291 = vmatpush3.bf16.msra.mxu1 %v295_v0  ;;  %v30_v5 = vpack.c.bf16 %v19_v3, %v18_v2  ;;  %v23_v6 = vld [vmem:[%s463_s0 + $0x28] sm:$0xff]  ;;  %v24_v10 = vld [vmem:[%s463_s0 + $0x30] sm:$0xff]  ;;  %v31_v12 = vpack.c.bf16 %v21_v8, %v20_v7 }
   0x4   :  { %279 = vmatprep.subr.bf16.mxu0 %v296_v1  ;;  %290 = vmatprep.subr.bf16.mxu1 %v296_v1  ;;  %v32_v9 = vpack.c.bf16 %v23_v6, %v22_v4  ;;  %v25_v11 = vld [vmem:[%s463_s0 + $0x38] sm:$0xff]  ;;  %v248_v14 = vld [vmem:[%s464_s2] ss:$0 sm:$0xff] }
   0x5   :  { %281 = vmatprep.mubr.msk.bf16.mxu0 %vm53_vm0, %v30_v5  ;;  %v33_v13 = vpack.c.bf16 %v25_v11, %v24_v10 }
   0x6   :  { %285 = vmatprep.mubr.msk.bf16.mxu1 %vm53_vm0, %v32_v9 }
   0x7   :  { %280 = vmatpush3.bf16.msra.mxu0 %v296_v1  ;;  %292 = vmatpush3.bf16.msra.mxu1 %v296_v1 }
   0xa   :  { %282 = vmatmul.mubr.msk.bf16.vlgmr.msra.gmra.mrb[0].mxu0 %vm53_vm0, %v31_v12  ;;  %286 = vmatmul.mubr.msk.bf16.vlgmr.msra.gmra.mrb[0].mxu1 %vm53_vm0, %v33_v13 }
  0xdd   :  { %v283_v15 = vpop.f32.mrb[0].mxu0  ;;  %v287_v16 = vpop.f32.mrb[0].mxu1 }
  0xde   :  { %v109_v17 = vadd.f32 %v283_v15, %v248_v14  ;;  %v125_v18 = vadd.f32 %v287_v16, %v248_v14  ;;  %v100_v19 = vpop.f32.mrb[1].mxu0  ;;  %v116_v20 = vpop.f32.mrb[1].mxu1 }
  0xdf   :  { %v101_v21 = vadd.f32 %v248_v14, %v100_v19  ;;  %v117_v22 = vadd.f32 %v248_v14, %v116_v20  ;;  %v284_v23 = vpop.f32.mrb[2].mxu0  ;;  %v288_v24 = vpop.f32.mrb[2].mxu1 }
  0xe0   :  { %v265_v25 = vpack.c.bf16 %v109_v17, %v109_v17  ;;  %v269_v26 = vpack.c.bf16 %v125_v18, %v125_v18  ;;  %v112_v27 = vadd.f32 %v284_v23, %v248_v14  ;;  %v128_v28 = vadd.f32 %v288_v24, %v248_v14  ;;  %v103_v29 = vpop.f32.mrb[3].mxu0  ;;  %v119_v30 = vpop.f32.mrb[3].mxu1 }
  0xe1   :  { %v263_v31 = vpack.c.bf16 %v101_v21, %v101_v21  ;;  %v267_v32 = vpack.c.bf16 %v117_v22, %v117_v22  ;;  %v104_v33 = vadd.f32 %v248_v14, %v103_v29  ;;  %v120_v34 = vadd.f32 %v248_v14, %v119_v30 }
  0xe2   :  { %166 = vst.msk [vmem:[%s465_s3 + $0x8] sm:$0xf] %vm163_vm1, %v265_v25  ;;  %170 = vst.msk [vmem:[%s465_s3 + $0x18] sm:$0xf] %vm163_vm1, %v269_v26  ;;  %v266_v35 = vpack.c.bf16 %v112_v27, %v112_v27  ;;  %v270_v36 = vpack.c.bf16 %v128_v28, %v128_v28  ;;  %184 = vrot.lane.b32.xlu0 %v269_v26, %s297_s16  ;;  %176 = vrot.lane.b32.xlu1 %v265_v25, %s297_s16 }
  0xe3   :  { %164 = vst.msk [vmem:[%s465_s3] sm:$0xf] %vm163_vm1, %v263_v31  ;;  %168 = vst.msk [vmem:[%s465_s3 + $0x10] sm:$0xf] %vm163_vm1, %v267_v32  ;;  %v264_v37 = vpack.c.bf16 %v104_v33, %v104_v33  ;;  %v268_v38 = vpack.c.bf16 %v120_v34, %v120_v34 }
  0xe4   :  { %167 = vst.msk [vmem:[%s465_s3 + $0xc] sm:$0xf] %vm163_vm1, %v266_v35  ;;  %171 = vst.msk [vmem:[%s465_s3 + $0x1c] sm:$0xf] %vm163_vm1, %v270_v36 }
  0xe5   :  { %165 = vst.msk [vmem:[%s465_s3 + $0x4] sm:$0xf] %vm163_vm1, %v264_v37  ;;  %169 = vst.msk [vmem:[%s465_s3 + $0x14] sm:$0xf] %vm163_vm1, %v268_v38 }
  0xe6   :  { %208 = vrot.lane.b32.xlu0 %v265_v25, %s298_s1  ;;  %178 = vrot.lane.b32.xlu1 %v266_v35, %s297_s16 }
  0xea   :  { %186 = vrot.lane.b32.xlu1 %v270_v36, %s297_s16  ;;  %172 = vrot.lane.b32.xlu0 %v263_v31, %s297_s16 }
  0xee   :  { %210 = vrot.lane.b32.xlu1 %v266_v35, %s298_s1  ;;  %180 = vrot.lane.b32.xlu0 %v267_v32, %s297_s16 }
  0xf2   :  { %182 = vrot.lane.b32.xlu1 %v268_v38, %s297_s16  ;;  %204 = vrot.lane.b32.xlu0 %v263_v31, %s298_s1 }
  0xf6   :  { %206 = vrot.lane.b32.xlu1 %v264_v37, %s298_s1  ;;  %212 = vrot.lane.b32.xlu0 %v267_v32, %s298_s1 }
  0xfa   :  { %214 = vrot.lane.b32.xlu1 %v268_v38, %s298_s1  ;;  %174 = vrot.lane.b32.xlu0 %v264_v37, %s297_s16 }
  0xfe   :  { %218 = vrot.lane.b32.xlu1 %v270_v36, %s298_s1  ;;  %216 = vrot.lane.b32.xlu0 %v269_v26, %s298_s1 }
 0x154   :  { %v185_v39 = vpop.permute.xlu0 %184  ;;  %v177_v40 = vpop.permute.xlu1 %176 }
 0x155   :  { %202 = vst.msk [vmem:[%s466_s4 + $0x18] sm:$0xf] %vm163_vm1, %v185_v39  ;;  %198 = vst.msk [vmem:[%s466_s4 + $0x8] sm:$0xf] %vm163_vm1, %v177_v40 }
 0x158   :  { %v209_v41 = vpop.permute.xlu0 %208  ;;  %v179_v42 = vpop.permute.xlu1 %178 }
 0x159   :  { %230 = vst.msk [vmem:[%s467_s5 + $0x8] sm:$0xf] %vm163_vm1, %v209_v41  ;;  %199 = vst.msk [vmem:[%s466_s4 + $0xc] sm:$0xf] %vm163_vm1, %v179_v42 }
 0x15c   :  { %v187_v43 = vpop.permute.xlu1 %186  ;;  %v173_v44 = vpop.permute.xlu0 %172 }
 0x15d   :  { %203 = vst.msk [vmem:[%s466_s4 + $0x1c] sm:$0xf] %vm163_vm1, %v187_v43  ;;  %196 = vst.msk [vmem:[%s466_s4] sm:$0xf] %vm163_vm1, %v173_v44 }
 0x160   :  { %v211_v45 = vpop.permute.xlu1 %210  ;;  %v181_v46 = vpop.permute.xlu0 %180 }
 0x161   :  { %231 = vst.msk [vmem:[%s467_s5 + $0xc] sm:$0xf] %vm163_vm1, %v211_v45  ;;  %200 = vst.msk [vmem:[%s466_s4 + $0x10] sm:$0xf] %vm163_vm1, %v181_v46 }
 0x164   :  { %v183_v47 = vpop.permute.xlu1 %182  ;;  %v205_v48 = vpop.permute.xlu0 %204 }
 0x165   :  { %201 = vst.msk [vmem:[%s466_s4 + $0x14] sm:$0xf] %vm163_vm1, %v183_v47  ;;  %228 = vst.msk [vmem:[%s467_s5] sm:$0xf] %vm163_vm1, %v205_v48 }
 0x168   :  { %v207_v49 = vpop.permute.xlu1 %206  ;;  %v213_v50 = vpop.permute.xlu0 %212 }
 0x169   :  { %229 = vst.msk [vmem:[%s467_s5 + $0x4] sm:$0xf] %vm163_vm1, %v207_v49  ;;  %232 = vst.msk [vmem:[%s467_s5 + $0x10] sm:$0xf] %vm163_vm1, %v213_v50 }
 0x16c   :  { %v215_v51 = vpop.permute.xlu1 %214  ;;  %v175_v52 = vpop.permute.xlu0 %174 }
 0x16d   :  { %233 = vst.msk [vmem:[%s467_s5 + $0x14] sm:$0xf] %vm163_vm1, %v215_v51  ;;  %197 = vst.msk [vmem:[%s466_s4 + $0x4] sm:$0xf] %vm163_vm1, %v175_v52 }
 0x170   :  { %v219_v53 = vpop.permute.xlu1 %218  ;;  %v217_v54 = vpop.permute.xlu0 %216 }
 0x171   :  { %235 = vst.msk [vmem:[%s467_s5 + $0x1c] sm:$0xf] %vm163_vm1, %v219_v53  ;;  %234 = vst.msk [vmem:[%s467_s5 + $0x18] sm:$0xf] %vm163_vm1, %v217_v54 }

// kernel: fwd.14
= control target key start
LH: loop header
LB: loop body
LE: loop exit
PB: predicated region body
PF: predicated region fallthrough
CT: control target
= control target key end

     0   :  { %s1817_s27 = smov 0   ;;  %s2131_s0 = inlined_call_operand.vmem [shape: bf16[2,32,32], index: 0, kind: input, shape index: {}]   ;;  %s2132_s1 = inlined_call_operand.vmem [shape: bf16[2,32,32], index: 1, kind: input, shape index: {}]   ;;  %s2133_s2 = inlined_call_operand.vmem [shape: bf16[2,32,32], index: 2, kind: input, shape index: {}]   ;;  %s2134_s3 = inlined_call_operand.vmem [shape: f32[2,32,32], index: 3, kind: input, shape index: {}]   ;;  %s2135_s4 = inlined_call_operand.vmem [shape: bf16[32,32], index: 4, kind: input, shape index: {}]   ;;  %s2136_s5 = inlined_call_operand.vmem [shape: f32[1,32], index: 5, kind: input, shape index: {}]   ;;  %s2137_s6 = inlined_call_operand.vmem [shape: f32[1,32], index: 6, kind: input, shape index: {}]   ;;  %s2138_s7 = inlined_call_operand.vmem [shape: f32[1,32], index: 7, kind: input, shape index: {}]   ;;  %s2139_s8 = inlined_call_operand.vmem [shape: f32[2,32,32], index: 8, kind: output, shape index: {}]  }
   0x1 LB: > { %s1467_s28 = sadd.s32 4294967295, %s1764_s27   ;;  %p1471_p0 = scmp.ge.s32.totalorder %s1764_s27, 1  ;;  %s1764_s27 = sphi %s1817_s27, %s18_s27  }
   0x2   : > { %p292_p1 = scmp.lt.s32.totalorder %s1764_s27, 3 }
   0x4   : > { %p293_p2 = pnand %p1471_p0, %p292_p1 }
   0x5   : > { %p341_p3 = scmp.lt.s32.totalorder (!%p293_p2), %s1467_s28, 1  ;;  %vm423_vm0 = vcmask (!%p293_p2), 64512   ;;  %v379_v6 = vlaneseq (!%p293_p2)  ;;  %vm489_vm11 = vcmask (!%p293_p2), 261120   ;;  %s1766_s17 = smov (!%p293_p2), 120   ;;  %vm1195_vm14 = vcmask (!%p293_p2), 130048  }
   0x6   : > { %296 = sbr.rel (%p293_p2) target bundleno = 2482 (0x9b2), region = 52  ;;  %s1767_s18 = smov (!%p293_p2), 112   ;;  %vm1200_vm15 = vcmask (!%p293_p2), 195584  }
   0x7   : > { %v380_v7 = vshrl.u32 (!%p293_p2), %v379_v6, 7  ;;  %v385_v9 = vand.u32 (!%p293_p2), 127, %v379_v6  ;;  %s1768_s19 = smov (!%p293_p2), 104   ;;  %s1769_s20 = smov (!%p293_p2), 8  }
   0x8   : > { %s1770_s21 = smov (!%p293_p2), 16   ;;  %s1771_s26 = smov (!%p293_p2), 24  }
   0x9   : > { %v382_v8 = vadd.s32 (!%p293_p2), 16, %v380_v7  ;;  %v383_v10 = vadd.s32 (!%p293_p2), 24, %v380_v7  ;;  %v381_v11 = vadd.s32 (!%p293_p2), 8, %v380_v7  ;;  %v394_v13 = vand.u32 (!%p293_p2), 3, %v385_v9 }
   0xa   : > { %v390_v14 = vand.u32 (!%p293_p2), 3, %v380_v7  ;;  %vm386_vm3 = vcmp.ge.s32.totalorder (!%p293_p2), %v380_v7, %v385_v9 }
   0xb   : > { %v392_v12 = vand.u32 (!%p293_p2), 3, %v382_v8  ;;  %v393_v15 = vand.u32 (!%p293_p2), 3, %v383_v10  ;;  %v391_v16 = vand.u32 (!%p293_p2), 3, %v381_v11  ;;  %vm388_vm1 = vcmp.ge.s32.totalorder (!%p293_p2), %v382_v8, %v385_v9 }
   0xc   : > { %vm395_vm4 = vcmp.eq.s32.totalorder (!%p293_p2), %v390_v14, %v394_v13  ;;  %vm389_vm5 = vcmp.ge.s32.totalorder (!%p293_p2), %v383_v10, %v385_v9  ;;  %vm387_vm8 = vcmp.ge.s32.totalorder (!%p293_p2), %v381_v11, %v385_v9 }
   0xd   : > { %s2149_s28 = smov (!%p341_p3, %s1467_s28), 1  ;;  %vm397_vm2 = vcmp.eq.s32.totalorder %v392_v12, %v394_v13  ;;  %vm398_vm6 = vcmp.eq.s32.totalorder %v393_v15, %v394_v13  ;;  %vm396_vm9 = vcmp.eq.s32.totalorder %v391_v16, %v394_v13  ;;  %vm1862_vm10 = vmand %vm386_vm3, %vm395_vm4 }
   0xe   : > { %s1828_s29 = sshll.u32 %s2149_s28, 4  ;;  %vm1858_vm7 = vmand %vm388_vm1, %vm397_vm2 }
   0xf   : > { %s350_s10 = scalar_lea.vmem %s2132_s1, %s1828_s29  ;;  %s345_s13 = scalar_lea.vmem %s2131_s0, %s1828_s29  ;;  %vm1866_vm12 = vmand %vm389_vm5, %vm398_vm6 }
  0x10   : > { %v1838_v0 = vld [vmem:[%s350_s10] sm:$0xff]   ;;  %v1840_v1 = vld [vmem:[%s350_s10 + $0x8] sm:$0xff]   ;;  %vm1872_vm13 = vmand %vm387_vm8, %vm396_vm9  ;;  %s355_s16 = scalar_lea.vmem %s2133_s2, %s1828_s29  ;;  %s1516_s29 = sshll.u32 %s2149_s28, 5 }
  0x11   : > { %1626 = vmatprep.subr.msk.bf16.mxu0 %vm423_vm0, %v1838_v0  ;;  %v431_v2 = vsel %vm423_vm0, %v1838_v0, 0  ;;  %v1846_v3 = vld [vmem:[%s345_s13] sm:$0xff]   ;;  %v434_v4 = vsel %vm423_vm0, %v1840_v1, 0  ;;  %v1854_v5 = vld [vmem:[%s345_s13 + $0x8] sm:$0xff]   ;;  %s360_s10 = scalar_lea.vmem %s2134_s3, %s1516_s29 }
  0x12   : > { %1555 = vmatpush3.bf16.xpose.msra.mxu0 %v431_v2  ;;  %1558 = vmatprep.mubr.msk.bf16.mxu0 %vm423_vm0, %v1846_v3  ;;  %v1892_v33 = vld [vmem:[%s355_s16] sm:$0xff]   ;;  %v1895_v34 = vld [vmem:[%s355_s16 + $0x8] sm:$0xff]  }
  0x13   : > { %1627 = vmatprep.subr.msk.bf16.mxu0 %vm423_vm0, %v1840_v1  ;;  %1562 = vmatprep.subr.bf16.mxu1 %v1892_v33 }
  0x14   : > { %1563 = vmatpush3.bf16.msra.mxu1 %v1892_v33 }
  0x15   : > { %1564 = vmatprep.subr.bf16.mxu1 %v1895_v34 }
  0x18   : > { %1565 = vmatpush3.bf16.msra.mxu1 %v1895_v34 }
  0x1a   : > { %1557 = vmatpush3.bf16.xpose.msra.mxu0 %v434_v4 }
  0x21   : > { %1559 = vmatmul.mubr.msk.bf16.vlgmr.msra.gmra.mrb[0].mxu0 %vm423_vm0, %v1854_v5 }
  0xf4   : > { %v1560_v19 = vpop.f32.mrb[0].mxu0 }
  0xf5   : > { %v487_v21 = vsel %vm1858_vm7, %v1560_v19, -1e+30  ;;  %v470_v22 = vpop.f32.mrb[1].mxu0 }
  0xf6   : > { %v485_v24 = vsel %vm1862_vm10, %v470_v22, -1e+30  ;;  %v1561_v25 = vpop.f32.mrb[2].mxu0  ;;  %v496_v26 = vsel %vm489_vm11, %v487_v21, -inf }
  0xf7   : > { %v488_v27 = vsel %vm1866_vm12, %v1561_v25, -1e+30  ;;  %497 = vmax.xlane.f32.xlu1 %v496_v26  ;;  %v473_v28 = vpop.f32.mrb[3].mxu0  ;;  %v490_v29 = vsel %vm489_vm11, %v485_v24, -inf }
  0xf8   : > { %v486_v30 = vsel %vm1872_vm13, %v473_v28, -1e+30  ;;  %491 = vmax.xlane.f32.xlu0 %v490_v29  ;;  %v499_v31 = vsel %vm489_vm11, %v488_v27, -inf }
  0xf9   : > { %v493_v32 = vsel %vm489_vm11, %v486_v30, -inf }
  0xfb   : > { %500 = vmax.xlane.f32.xlu1 %v499_v31 }
  0xfc   : > { %494 = vmax.xlane.f32.xlu0 %v493_v32 }
 0x10c   : > { %609 = vrot.lane.b32.xlu1 %v1840_v1, %s1766_s17 }
 0x110   : > { %603 = vrot.lane.b32.xlu1 %v1846_v3, %s1766_s17 }
 0x112   : > { %607 = vrot.lane.b32.xlu0 %v1838_v0, %s1766_s17 }
 0x114   : > { %605 = vrot.lane.b32.xlu1 %v1854_v5, %s1766_s17 }
 0x118   : > { %716 = vrot.lane.b32.xlu1 %v1895_v34, %s1766_s17 }
 0x184   : > { %v498_v35 = vpop.xlane.xlu1 %497 }
 0x185   : > { %v492_v36 = vpop.xlane.xlu0 %491  ;;  %v504_v38 = vsub.f32 %v487_v21, %v498_v35 }
 0x186   : > { %v502_v37 = vsub.f32 %v485_v24, %v492_v36 }
 0x187   : > { %v510_v44 = vmul.f32 1.442695, %v504_v38 }
 0x188   : > { %v506_v39 = vmul.f32 1.442695, %v502_v37  ;;  %v501_v40 = vpop.xlane.xlu1 %500 }
 0x189   : > { %v505_v41 = vsub.f32 %v488_v27, %v501_v40  ;;  %v495_v42 = vpop.xlane.xlu0 %494 }
 0x18a   : > { %v503_v43 = vsub.f32 %v486_v30, %v495_v42  ;;  %1686 = vpow2.f32 %v506_v39 }
 0x18b   : > { %v512_v45 = vmul.f32 1.442695, %v505_v41 }
 0x18c   : > { %v508_v46 = vmul.f32 1.442695, %v503_v43  ;;  %v610_v48 = vpop.permute.xlu1 %609 }
 0x18d   : > { %1688 = vpow2.f32 %v512_v45  ;;  %v608_v47 = vpop.permute.xlu0 %607  ;;  %v621_v57 = vsel %vm423_vm0, %v610_v48, 0 }
 0x18e   : > { %1690 = vpow2.f32 %v508_v46  ;;  %1628 = vmatprep.subr.msk.bf16.mxu1 %vm423_vm0, %v608_v47  ;;  %v618_v54 = vsel %vm423_vm0, %v608_v47, 0 }
 0x18f   : > { %1692 = vpow2.f32 %v510_v44 }
 0x190   : > { %v604_v56 = vpop.permute.xlu1 %603 }
 0x194   : > { %v1909_v49 = vpop.eup %1686  ;;  %v606_v58 = vpop.permute.xlu1 %605 }
 0x197   : > { %v1911_v50 = vpop.eup %1688 }
 0x198   : > { %v1913_v51 = vpop.eup %1690  ;;  %v717_v15 = vpop.permute.xlu1 %716 }
 0x199   : > { %v1915_v52 = vpop.eup %1692  ;;  %v526_v53 = vpack.c.bf16 %v1913_v51, %v1909_v49 }
 0x19a   : > { %v527_v55 = vpack.c.bf16 %v1911_v50, %v1915_v52 }
 0x19b   : > { %1566 = vmatprep.mubr.msk.bf16.mxu1 %vm489_vm11, %v526_v53 }
 0x19c   : > { %1567 = vmatmul.mubr.msk.bf16.vlgmr.msra.gmra.mrb[0].mxu1 %vm489_vm11, %v527_v55 }
 0x19d   : > { %1571 = vmatpush3.bf16.xpose.msra.mxu1 %v618_v54  ;;  %1574 = vmatprep.mubr.msk.bf16.mxu1 %vm423_vm0, %v604_v56 }
 0x19e   : > { %1629 = vmatprep.subr.msk.bf16.mxu1 %vm423_vm0, %v610_v48 }
 0x1a5   : > { %1573 = vmatpush3.bf16.xpose.msra.mxu1 %v621_v57 }
 0x1ac   : > { %1575 = vmatmul.mubr.msk.bf16.vlgmr.msra.gmra.mrb[4].mxu1 %vm423_vm0, %v606_v58 }
 0x26f   : > { %v1928_v59 = vpop.f32.mrb[0].mxu1 }
 0x270   : > { %v1930_v60 = vpop.f32.mrb[1].mxu1 }
 0x271   : > { %v1932_v61 = vpop.f32.mrb[2].mxu1 }
 0x272   : > { %v1934_v62 = vpop.f32.mrb[3].mxu1 }
 0x27f   : > { %v1576_v63 = vpop.f32.mrb[4].mxu1 }
 0x280   : > { %v674_v2 = vsel %vm1858_vm7, %v1576_v63, -1e+30  ;;  %v657_v4 = vpop.f32.mrb[5].mxu1 }
 0x281   : > { %v1577_v6 = vpop.f32.mrb[6].mxu1  ;;  %v682_v7 = vsel %vm489_vm11, %v674_v2, -inf  ;;  %v672_v8 = vsel %vm1862_vm10, %v657_v4, -1e+30 }
 0x282   : > { %683 = vmax.xlane.f32.xlu0 %v682_v7  ;;  %v660_v9 = vpop.f32.mrb[7].mxu1  ;;  %v676_v12 = vsel %vm489_vm11, %v672_v8, -inf  ;;  %v675_v13 = vsel %vm1866_vm12, %v1577_v6, -1e+30 }
 0x283   : > { %v673_v10 = vsel %vm1872_vm13, %v660_v9, -1e+30  ;;  %v685_v14 = vsel %vm489_vm11, %v675_v13, -inf }
 0x284   : > { %v679_v11 = vsel %vm489_vm11, %v673_v10, -inf }
 0x285   : > { %680 = vmax.xlane.f32.xlu1 %v679_v11 }
 0x286   : > { %677 = vmax.xlane.f32.xlu0 %v676_v12 }
 0x28a   : > { %686 = vmax.xlane.f32.xlu0 %v685_v14 }
 0x296   : > { %787 = vrot.lane.b32.xlu1 %v1838_v0, %s1767_s18 }
 0x29a   : > { %789 = vrot.lane.b32.xlu1 %v1840_v1, %s1767_s18 }
 0x29e   : > { %785 = vrot.lane.b32.xlu1 %v1854_v5, %s1767_s18 }
 0x2a0   : > { %714 = vrot.lane.b32.xlu0 %v1892_v33, %s1766_s17 }
 0x2a2   : > { %896 = vrot.lane.b32.xlu1 %v1895_v34, %s1767_s18 }
 0x2a4   : > { %783 = vrot.lane.b32.xlu0 %v1846_v3, %s1767_s18 }
 0x30f   : > { %v684_v16 = vpop.xlane.xlu0 %683 }
 0x310   : > { %v690_v21 = vsub.f32 %v674_v2, %v684_v16 }
 0x312   : > { %v681_v19 = vpop.xlane.xlu1 %680  ;;  %v696_v28 = vmul.f32 1.442695, %v690_v21 }
 0x313   : > { %v689_v22 = vsub.f32 %v673_v10, %v681_v19  ;;  %v678_v24 = vpop.xlane.xlu0 %677 }
 0x314   : > { %v688_v25 = vsub.f32 %v672_v8, %v678_v24 }
 0x315   : > { %v694_v26 = vmul.f32 1.442695, %v689_v22 }
 0x316   : > { %v692_v27 = vmul.f32 1.442695, %v688_v25  ;;  %v788_v35 = vpop.permute.xlu1 %787 }
 0x317   : > { %1694 = vpow2.f32 %v694_v26  ;;  %v687_v29 = vpop.xlane.xlu0 %686  ;;  %v798_v41 = vsel %vm423_vm0, %v788_v35, 0 }
 0x318   : > { %1696 = vpow2.f32 %v692_v27  ;;  %v691_v30 = vsub.f32 %v675_v13, %v687_v29 }
 0x319   : > { %1698 = vpow2.f32 %v696_v28 }
 0x31a   : > { %v698_v31 = vmul.f32 1.442695, %v691_v30  ;;  %v790_v44 = vpop.permute.xlu1 %789 }
 0x31b   : > { %v715_v32 = vpop.permute.xlu0 %714  ;;  %v801_v45 = vsel %vm423_vm0, %v790_v44, 0 }
 0x31c   : > { %1700 = vpow2.f32 %v698_v31  ;;  %1578 = vmatprep.subr.bf16.mxu0 %v715_v32 }
 0x31d   : > { %1579 = vmatpush3.bf16.msra.mxu0 %v715_v32 }
 0x31e   : > { %1580 = vmatprep.subr.bf16.mxu0 %v717_v15  ;;  %v786_v46 = vpop.permute.xlu1 %785 }
 0x31f   : > { %v784_v43 = vpop.permute.xlu0 %783 }
 0x321   : > { %v1960_v36 = vpop.eup %1694  ;;  %1581 = vmatpush3.bf16.msra.mxu0 %v717_v15 }
 0x322   : > { %v1962_v37 = vpop.eup %1696  ;;  %1630 = vmatprep.subr.msk.bf16.mxu0 %vm423_vm0, %v788_v35  ;;  %v897_v11 = vpop.permute.xlu1 %896  ;;  %v703_v20 = vsel %vm489_vm11, %v1960_v36, 0.0 }
 0x323   : > { %v712_v38 = vpack.c.bf16 %v1960_v36, %v1962_v37  ;;  %v1967_v39 = vpop.eup %1698  ;;  %v700_v18 = vsel %vm489_vm11, %v1962_v37, 0.0 }
 0x325   : > { %1582 = vmatprep.mubr.msk.bf16.mxu0 %vm489_vm11, %v712_v38 }
 0x326   : > { %v1970_v40 = vpop.eup %1700 }
 0x327   : > { %v713_v42 = vpack.c.bf16 %v1970_v40, %v1967_v39  ;;  %v709_v23 = vsel %vm489_vm11, %v1970_v40, 0.0 }
 0x329   : > { %1583 = vmatmul.mubr.msk.bf16.vlgmr.msra.gmra.mrb[4].mxu0 %vm489_vm11, %v713_v42 }
 0x32a   : > { %1587 = vmatpush3.bf16.xpose.msra.mxu0 %v798_v41  ;;  %1590 = vmatprep.mubr.msk.bf16.mxu0 %vm423_vm0, %v784_v43 }
 0x32b   : > { %1631 = vmatprep.subr.msk.bf16.mxu0 %vm423_vm0, %v790_v44 }
 0x332   : > { %1589 = vmatpush3.bf16.xpose.msra.mxu0 %v801_v45 }
 0x339   : > { %1591 = vmatmul.mubr.msk.bf16.vlgmr.msra.gmra.mrb[8].mxu0 %vm423_vm0, %v786_v46 }
 0x3fc   : > { %v1980_v47 = vpop.f32.mrb[4].mxu0 }
 0x3fd   : > { %v1982_v48 = vpop.f32.mrb[5].mxu0 }
 0x3fe   : > { %v1984_v53 = vpop.f32.mrb[6].mxu0 }
 0x3ff   : > { %v1986_v54 = vpop.f32.mrb[7].mxu0 }
 0x40c   : > { %v1592_v55 = vpop.f32.mrb[8].mxu0 }
 0x40d   : > { %v854_v56 = vsel %vm1858_vm7, %v1592_v55, -1e+30  ;;  %v837_v57 = vpop.f32.mrb[9].mxu0 }
 0x40e   : > { %v1593_v58 = vpop.f32.mrb[10].mxu0  ;;  %v862_v63 = vsel %vm489_vm11, %v854_v56, -inf  ;;  %v852_v2 = vsel %vm1862_vm10, %v837_v57, -1e+30 }
 0x40f   : > { %863 = vmax.xlane.f32.xlu0 %v862_v63  ;;  %v840_v4 = vpop.f32.mrb[11].mxu0  ;;  %v856_v8 = vsel %vm489_vm11, %v852_v2, -inf  ;;  %v855_v9 = vsel %vm1866_vm12, %v1593_v58, -1e+30 }
 0x410   : > { %v853_v6 = vsel %vm1872_vm13, %v840_v4, -1e+30  ;;  %v865_v10 = vsel %vm489_vm11, %v855_v9, -inf }
 0x411   : > { %v859_v7 = vsel %vm489_vm11, %v853_v6, -inf }
 0x412   : > { %860 = vmax.xlane.f32.xlu1 %v859_v7 }
 0x413   : > { %857 = vmax.xlane.f32.xlu0 %v856_v8 }
 0x417   : > { %866 = vmax.xlane.f32.xlu0 %v865_v10 }
 0x423   : > { %967 = vrot.lane.b32.xlu1 %v1838_v0, %s1768_s19 }
 0x427   : > { %969 = vrot.lane.b32.xlu1 %v1840_v1, %s1768_s19 }
 0x42b   : > { %965 = vrot.lane.b32.xlu1 %v1854_v5, %s1768_s19 }
 0x42d   : > { %894 = vrot.lane.b32.xlu0 %v1892_v33, %s1767_s18 }
 0x431   : > { %963 = vrot.lane.b32.xlu0 %v1846_v3, %s1768_s19 }
 0x49c   : > { %v864_v12 = vpop.xlane.xlu0 %863 }
 0x49d   : > { %v870_v14 = vsub.f32 %v854_v56, %v864_v12 }
 0x49f   : > { %v861_v13 = vpop.xlane.xlu1 %860  ;;  %v876_v22 = vmul.f32 1.442695, %v870_v14 }
 0x4a0   : > { %v869_v15 = vsub.f32 %v853_v6, %v861_v13  ;;  %v858_v16 = vpop.xlane.xlu0 %857 }
 0x4a1   : > { %v868_v19 = vsub.f32 %v852_v2, %v858_v16 }
 0x4a2   : > { %v874_v0 = vmul.f32 1.442695, %v869_v15 }
 0x4a3   : > { %v872_v21 = vmul.f32 1.442695, %v868_v19  ;;  %v968_v3 = vpop.permute.xlu1 %967 }
 0x4a4   : > { %1702 = vpow2.f32 %v874_v0  ;;  %v867_v1 = vpop.xlane.xlu0 %866  ;;  %v978_v31 = vsel %vm423_vm0, %v968_v3, 0 }
 0x4a5   : > { %1704 = vpow2.f32 %v872_v21  ;;  %v871_v5 = vsub.f32 %v855_v9, %v867_v1 }
 0x4a6   : > { %1706 = vpow2.f32 %v876_v22 }
 0x4a7   : > { %v878_v24 = vmul.f32 1.442695, %v871_v5  ;;  %v970_v38 = vpop.permute.xlu1 %969 }
 0x4a8   : > { %v895_v25 = vpop.permute.xlu0 %894  ;;  %v981_v41 = vsel %vm423_vm0, %v970_v38, 0 }
 0x4a9   : > { %1708 = vpow2.f32 %v878_v24  ;;  %1594 = vmatprep.subr.bf16.mxu1 %v895_v25 }
 0x4aa   : > { %1595 = vmatpush3.bf16.msra.mxu1 %v895_v25 }
 0x4ab   : > { %1596 = vmatprep.subr.bf16.mxu1 %v897_v11  ;;  %v966_v42 = vpop.permute.xlu1 %965 }
 0x4ac   : > { %v964_v35 = vpop.permute.xlu0 %963 }
 0x4ae   : > { %v1703_v26 = vpop.eup %1702  ;;  %1597 = vmatpush3.bf16.msra.mxu1 %v897_v11 }
 0x4af   : > { %v1705_v27 = vpop.eup %1704  ;;  %1632 = vmatprep.subr.msk.bf16.mxu1 %vm423_vm0, %v968_v3  ;;  %v883_v10 = vsel %vm489_vm11, %v1703_v26, 0.0 }
 0x4b0   : > { %v892_v28 = vpack.c.bf16 %v1703_v26, %v1705_v27  ;;  %v1707_v29 = vpop.eup %1706  ;;  %v880_v37 = vsel %vm489_vm11, %v1705_v27, 0.0 }
 0x4b1   : > { %v886_v40 = vsel %vm489_vm11, %v1707_v29, 0.0 }
 0x4b2   : > { %1598 = vmatprep.mubr.msk.bf16.mxu1 %vm489_vm11, %v892_v28 }
 0x4b3   : > { %v1709_v30 = vpop.eup %1708 }
 0x4b4   : > { %v893_v32 = vpack.c.bf16 %v1709_v30, %v1707_v29 }
 0x4b6   : > { %1599 = vmatmul.mubr.msk.bf16.vlgmr.msra.gmra.mrb[8].mxu1 %vm489_vm11, %v893_v32 }
 0x4b7   : > { %1603 = vmatpush3.bf16.xpose.msra.mxu1 %v978_v31  ;;  %1606 = vmatprep.mubr.msk.bf16.mxu1 %vm423_vm0, %v964_v35  ;;  %v514_v35 = vsel %vm489_vm11, %v1909_v49, 0.0 }
 0x4b8   : > { %1633 = vmatprep.subr.msk.bf16.mxu1 %vm423_vm0, %v970_v38  ;;  %v517_v38 = vsel %vm489_vm11, %v1913_v51, 0.0 }
 0x4bf   : > { %1605 = vmatpush3.bf16.xpose.msra.mxu1 %v981_v41  ;;  %v520_v41 = vsel %vm489_vm11, %v1915_v52, 0.0 }
 0x4c6   : > { %1607 = vmatmul.mubr.msk.bf16.vlgmr.msra.gmra.mrb[12].mxu1 %vm423_vm0, %v966_v42  ;;  %v523_v42 = vsel %vm489_vm11, %v1911_v50, 0.0 }
 0x589   : > { %v2018_v43 = vpop.f32.mrb[8].mxu1 }
 0x58a   : > { %v2020_v44 = vpop.f32.mrb[9].mxu1 }
 0x58b   : > { %v2022_v45 = vpop.f32.mrb[10].mxu1 }
 0x58c   : > { %v2024_v46 = vpop.f32.mrb[11].mxu1 }
 0x599   : > { %v1608_v55 = vpop.f32.mrb[12].mxu1 }
 0x59a   : > { %v1034_v56 = vsel %vm1858_vm7, %v1608_v55, -1e+30  ;;  %v1017_v57 = vpop.f32.mrb[13].mxu1 }
 0x59b   : > { %v1609_v58 = vpop.f32.mrb[14].mxu1  ;;  %v1042_v63 = vsel %vm489_vm11, %v1034_v56, -inf  ;;  %v1032_v2 = vsel %vm1862_vm10, %v1017_v57, -1e+30 }
 0x59c   : > { %1043 = vmax.xlane.f32.xlu0 %v1042_v63  ;;  %v1020_v4 = vpop.f32.mrb[15].mxu1  ;;  %v1036_v8 = vsel %vm489_vm11, %v1032_v2, -inf  ;;  %v1035_v17 = vsel %vm1866_vm12, %v1609_v58, -1e+30 }
 0x59d   : > { %v1033_v6 = vsel %vm1872_vm13, %v1020_v4, -1e+30  ;;  %v1045_v9 = vsel %vm489_vm11, %v1035_v17, -inf }
 0x59e   : > { %v1039_v7 = vsel %vm489_vm11, %v1033_v6, -inf }
 0x59f   : > { %1040 = vmax.xlane.f32.xlu1 %v1039_v7 }
 0x5a0   : > { %1037 = vmax.xlane.f32.xlu0 %v1036_v8 }
 0x5a4   : > { %1046 = vmax.xlane.f32.xlu0 %v1045_v9 }
 0x5b0   : > { %1076 = vrot.lane.b32.xlu1 %v1895_v34, %s1768_s19  ;;  %v706_v34 = vsel %vm489_vm11, %v1967_v39, 0.0 }
 0x5ba   : > { %1074 = vrot.lane.b32.xlu0 %v1892_v33, %s1768_s19  ;;  %v889_v33 = vsel %vm489_vm11, %v1709_v30, 0.0  ;;  %s365_s19 = scalar_lea.vmem %s2139_s8, %s1516_s29 }
 0x5d4   : > { %701 = vadd.xlane.f32.xlu1 %v700_v18 }
 0x5d8   : > { %710 = vadd.xlane.f32.xlu1 %v709_v23 }
 0x5d9   : > { %704 = vadd.xlane.f32.xlu0 %v703_v20 }
 0x5dc   : > { %884 = vadd.xlane.f32.xlu1 %v883_v10 }
 0x5dd   : > { %707 = vadd.xlane.f32.xlu0 %v706_v34 }
 0x5e0   : > { %890 = vadd.xlane.f32.xlu1 %v889_v33 }
 0x5e1   : > { %881 = vadd.xlane.f32.xlu0 %v880_v37 }
 0x5e5   : > { %887 = vadd.xlane.f32.xlu0 %v886_v40 }
 0x629   : > { %v1044_v11 = vpop.xlane.xlu0 %1043 }
 0x62a   : > { %v1050_v12 = vsub.f32 %v1034_v56, %v1044_v11 }
 0x62c   : > { %v1041_v36 = vpop.xlane.xlu1 %1040  ;;  %v1056_v19 = vmul.f32 1.442695, %v1050_v12 }
 0x62d   : > { %v1049_v13 = vsub.f32 %v1033_v6, %v1041_v36  ;;  %v1038_v14 = vpop.xlane.xlu0 %1037 }
 0x62e   : > { %v1048_v15 = vsub.f32 %v1032_v2, %v1038_v14 }
 0x62f   : > { %v1054_v16 = vmul.f32 1.442695, %v1049_v13 }
 0x630   : > { %v1052_v0 = vmul.f32 1.442695, %v1048_v15  ;;  %v1077_v5 = vpop.permute.xlu1 %1076 }
 0x631   : > { %1710 = vpow2.f32 %v1054_v16  ;;  %v1047_v39 = vpop.xlane.xlu0 %1046 }
 0x632   : > { %1712 = vpow2.f32 %v1052_v0  ;;  %v1051_v21 = vsub.f32 %v1035_v17, %v1047_v39 }
 0x633   : > { %1714 = vpow2.f32 %v1056_v19 }
 0x634   : > { %v1058_v22 = vmul.f32 1.442695, %v1051_v21 }
 0x635   : > { %v1075_v1 = vpop.permute.xlu0 %1074 }
 0x636   : > { %1716 = vpow2.f32 %v1058_v22  ;;  %1610 = vmatprep.subr.bf16.mxu0 %v1075_v1 }
 0x637   : > { %1611 = vmatpush3.bf16.msra.mxu0 %v1075_v1 }
 0x638   : > { %1612 = vmatprep.subr.bf16.mxu0 %v1077_v5 }
 0x63b   : > { %v1711_v24 = vpop.eup %1710  ;;  %1613 = vmatpush3.bf16.msra.mxu0 %v1077_v5 }
 0x63c   : > { %v1713_v25 = vpop.eup %1712  ;;  %v1063_v3 = vsel %vm489_vm11, %v1711_v24, 0.0 }
 0x63d   : > { %1064 = vadd.xlane.f32.xlu1 %v1063_v3  ;;  %v1060_v26 = vsel %vm489_vm11, %v1713_v25, 0.0  ;;  %v1072_v27 = vpack.c.bf16 %v1711_v24, %v1713_v25  ;;  %v1715_v28 = vpop.eup %1714 }
 0x63e   : > { %1061 = vadd.xlane.f32.xlu0 %v1060_v26  ;;  %v1066_v30 = vsel %vm489_vm11, %v1715_v28, 0.0 }
 0x63f   : > { %1614 = vmatprep.mubr.msk.bf16.mxu0 %vm489_vm11, %v1072_v27 }
 0x640   : > { %v1717_v29 = vpop.eup %1716 }
 0x641   : > { %v1069_v31 = vsel %vm489_vm11, %v1717_v29, 0.0  ;;  %v1073_v32 = vpack.c.bf16 %v1717_v29, %v1715_v28 }
 0x642   : > { %1067 = vadd.xlane.f32.xlu0 %v1066_v30  ;;  %1070 = vadd.xlane.f32.xlu1 %v1069_v31 }
 0x643   : > { %1615 = vmatmul.mubr.msk.bf16.vlgmr.msra.gmra.mrb[12].mxu0 %vm489_vm11, %v1073_v32 }
 0x646   : > { %515 = vadd.xlane.f32.xlu0 %v514_v35  ;;  %518 = vadd.xlane.f32.xlu1 %v517_v38 }
 0x64a   : > { %521 = vadd.xlane.f32.xlu0 %v520_v41  ;;  %524 = vadd.xlane.f32.xlu1 %v523_v42 }
 0x661   : > { %v702_v55 = vpop.xlane.xlu1 %701 }
 0x662   : > { %1718 = vrcp.f32 %v702_v55 }
 0x665   : > { %v711_v56 = vpop.xlane.xlu1 %710 }
 0x666   : > { %v705_v57 = vpop.xlane.xlu0 %704 }
 0x667   : > { %1720 = vrcp.f32 %v705_v57 }
 0x668   : > { %1722 = vrcp.f32 %v711_v56 }
 0x669   : > { %v885_v49 = vpop.xlane.xlu1 %884 }
 0x66a   : > { %v708_v58 = vpop.xlane.xlu0 %707 }
 0x66b   : > { %1724 = vrcp.f32 %v708_v58 }
 0x66c   : > { %1726 = vrcp.f32 %v885_v49  ;;  %v1719_v2 = vpop.eup %1718 }
 0x66d   : > { %v891_v51 = vpop.xlane.xlu1 %890  ;;  %v779_v50 = vmul.f32 %v1719_v2, %v1982_v48 }
 0x66e   : > { %v882_v63 = vpop.xlane.xlu0 %881 }
 0x66f   : > { %1728 = vrcp.f32 %v882_v63 }
 0x670   : > { %1730 = vrcp.f32 %v891_v51 }
 0x671   : > { %v1721_v52 = vpop.eup %1720 }
 0x672   : > { %v888_v4 = vpop.xlane.xlu0 %887  ;;  %v780_v6 = vmul.f32 %v1721_v52, %v1986_v54  ;;  %v1723_v7 = vpop.eup %1722 }
 0x673   : > { %1732 = vrcp.f32 %v888_v4  ;;  %v782_v18 = vmul.f32 %v1723_v7, %v1984_v53  ;;  %v1684_v53 = vld [vmem:[%s2135_s4] sm:$0xff]  }
 0x674   : > { %v1648_v8 = vpack.i.bf16 %v780_v6, %v779_v50  ;;  %1618 = vmatprep.subr.bf16.mxu0 %v1684_v53 }
 0x675   : > { %v1725_v17 = vpop.eup %1724  ;;  %1619 = vmatpush3.bf16.msra.mxu0 %v1684_v53  ;;  %v1207_v53 = vld [vmem:[%s360_s10 + $0x10] sm:$0xff] }
 0x676   : > { %1649 = vrot.lane.b32.xlu0 %v1648_v8, %s1769_s20  ;;  %v781_v9 = vmul.f32 %v1725_v17, %v1980_v47  ;;  %v1727_v23 = vpop.eup %1726 }
 0x677   : > { %v960_v48 = vmul.f32 %v1727_v23, %v2024_v46 }
 0x678   : > { %v1653_v20 = vpack.i.bf16 %v782_v18, %v781_v9 }
 0x679   : > { %v1729_v10 = vpop.eup %1728 }
 0x67a   : > { %1654 = vrot.lane.b32.xlu1 %v1653_v20, %s1769_s20  ;;  %v959_v34 = vmul.f32 %v1729_v10, %v2020_v44  ;;  %v1731_v33 = vpop.eup %1730 }
 0x67b   : > { %v962_v11 = vmul.f32 %v1731_v33, %v2022_v45 }
 0x67c   : > { %v1658_v54 = vpack.i.bf16 %v960_v48, %v959_v34 }
 0x67d   : > { %v1733_v37 = vpop.eup %1732 }
 0x67e   : > { %1659 = vrot.lane.b32.xlu1 %v1658_v54, %s1770_s21  ;;  %v961_v40 = vmul.f32 %v1733_v37, %v2018_v43  ;;  %v1685_v43 = vld [vmem:[%s2135_s4 + $0x8] sm:$0xff]  }
 0x67f   : > { %1620 = vmatprep.subr.bf16.mxu0 %v1685_v43 }
 0x680   : > { %v1663_v47 = vpack.i.bf16 %v962_v11, %v961_v40  ;;  %1621 = vmatpush3.bf16.msra.mxu0 %v1685_v43  ;;  %v1508_v43 = vld [vmem:[%s2136_s5] ss:$0 sm:$0xff] }
 0x682   : > { %1664 = vrot.lane.b32.xlu1 %v1663_v47, %s1770_s21 }
 0x6ca   : > { %v1065_v12 = vpop.xlane.xlu1 %1064 }
 0x6cb   : > { %v1062_v44 = vpop.xlane.xlu0 %1061  ;;  %1734 = vrcp.f32 %v1065_v12 }
 0x6cf   : > { %v1068_v46 = vpop.xlane.xlu0 %1067  ;;  %v1071_v36 = vpop.xlane.xlu1 %1070 }
 0x6d0   : > { %1736 = vrcp.f32 %v1068_v46 }
 0x6d1   : > { %1738 = vrcp.f32 %v1071_v36  ;;  %v1206_v36 = vld [vmem:[%s360_s10 + $0x8] sm:$0xff] }
 0x6d2   : > { %1740 = vrcp.f32 %v1062_v44  ;;  %v1205_v44 = vld [vmem:[%s360_s10] sm:$0xff] }
 0x6d3   : > { %v519_v3 = vpop.xlane.xlu1 %518  ;;  %v516_v26 = vpop.xlane.xlu0 %515 }
 0x6d4   : > { %1742 = vrcp.f32 %v516_v26 }
 0x6d5   : > { %v1735_v45 = vpop.eup %1734  ;;  %1744 = vrcp.f32 %v519_v3 }
 0x6d7   : > { %v525_v27 = vpop.xlane.xlu1 %524  ;;  %v522_v28 = vpop.xlane.xlu0 %521 }
 0x6d8   : > { %1746 = vrcp.f32 %v522_v28 }
 0x6d9   : > { %1748 = vrcp.f32 %v525_v27 }
 0x6da   : > { %v1737_v14 = vpop.eup %1736 }
 0x6db   : > { %v1739_v16 = vpop.eup %1738 }
 0x6dc   : > { %v1741_v0 = vpop.eup %1740 }
 0x6de   : > { %v1743_v31 = vpop.eup %1742 }
 0x6df   : > { %v1745_v35 = vpop.eup %1744  ;;  %v599_v58 = vmul.f32 %v1743_v31, %v1930_v60 }
 0x6e0   : > { %v600_v51 = vmul.f32 %v1745_v35, %v1934_v62 }
 0x6e2   : > { %v1747_v38 = vpop.eup %1746 }
 0x6e3   : > { %v1749_v42 = vpop.eup %1748  ;;  %v601_v52 = vmul.f32 %v1747_v38, %v1928_v59 }
 0x6e4   : > { %v602_v4 = vmul.f32 %v1749_v42, %v1932_v61 }
 0x6e8   : > { %v1650_v32 = vpop.permute.xlu0 %1649 }
 0x6e9   : > { %v1652_v55 = vunpack.i.h.bf16 %v1650_v32  ;;  %v1651_v56 = vunpack.i.l.bf16 %v1650_v32 }
 0x6eb   : > { %v1191_v7 = vsel %vm423_vm0, %v599_v58, %v1651_v56  ;;  %v1192_v8 = vsel %vm423_vm0, %v600_v51, %v1652_v55 }
 0x6ec   : > { %v1655_v29 = vpop.permute.xlu1 %1654 }
 0x6ed   : > { %v1657_v57 = vunpack.i.h.bf16 %v1655_v29  ;;  %v1656_v49 = vunpack.i.l.bf16 %v1655_v29 }
 0x6ef   : > { %v1194_v9 = vsel %vm423_vm0, %v602_v4, %v1657_v57  ;;  %v1193_v60 = vsel %vm423_vm0, %v601_v52, %v1656_v49 }
 0x6f0   : > { %v1660_v30 = vpop.permute.xlu1 %1659 }
 0x6f1   : > { %v1662_v50 = vunpack.i.h.bf16 %v1660_v30  ;;  %v1661_v6 = vunpack.i.l.bf16 %v1660_v30 }
 0x6f3   : > { %v1197_v34 = vsel %vm1195_vm14, %v1192_v8, %v1662_v50  ;;  %v1196_v48 = vsel %vm1195_vm14, %v1191_v7, %v1661_v6 }
 0x6f4   : > { %v1665_v41 = vpop.permute.xlu1 %1664 }
 0x6f5   : > { %v1667_v63 = vunpack.i.h.bf16 %v1665_v41  ;;  %v1666_v2 = vunpack.i.l.bf16 %v1665_v41 }
 0x6f7   : > { %v1198_v59 = vsel %vm1195_vm14, %v1193_v60, %v1666_v2  ;;  %v1199_v61 = vsel %vm1195_vm14, %v1194_v9, %v1667_v63 }
 0x716   : > { %v1616_v13 = vpop.f32.mrb[12].mxu0 }
 0x717   : > { %v1120_v15 = vpop.f32.mrb[13].mxu0  ;;  %v1141_v39 = vmul.f32 %v1737_v14, %v1616_v13 }
 0x718   : > { %v1617_v19 = vpop.f32.mrb[14].mxu0  ;;  %v1139_v1 = vmul.f32 %v1741_v0, %v1120_v15  ;;  %v1208_v15 = vld [vmem:[%s360_s10 + $0x18] sm:$0xff] }
 0x719   : > { %v1142_v21 = vmul.f32 %v1739_v16, %v1617_v19  ;;  %v1123_v22 = vpop.f32.mrb[15].mxu0 }
 0x71a   : > { %v1140_v5 = vmul.f32 %v1735_v45, %v1123_v22 }
 0x71b   : > { %v1673_v24 = vpack.i.bf16 %v1142_v21, %v1141_v39 }
 0x71c   : > { %v1668_v25 = vpack.i.bf16 %v1140_v5, %v1139_v1 }
 0x71d   : > { %1674 = vrot.lane.b32.xlu1 %v1673_v24, %s1771_s26 }
 0x71e   : > { %1669 = vrot.lane.b32.xlu0 %v1668_v25, %s1771_s26 }
 0x78f   : > { %v1675_v17 = vpop.permute.xlu1 %1674 }
 0x790   : > { %v1677_v62 = vunpack.i.h.bf16 %v1675_v17  ;;  %v1676_v18 = vunpack.i.l.bf16 %v1675_v17  ;;  %v1670_v23 = vpop.permute.xlu0 %1669 }
 0x791   : > { %v1672_v20 = vunpack.i.h.bf16 %v1670_v23  ;;  %v1671_v10 = vunpack.i.l.bf16 %v1670_v23 }
 0x792   : > { %v1203_v33 = vsel %vm1200_vm15, %v1198_v59, %v1676_v18  ;;  %v1204_v54 = vsel %vm1200_vm15, %v1199_v61, %v1677_v62 }
 0x793   : > { %v1214_v37 = vpack.c.bf16 %v1204_v54, %v1203_v33  ;;  %v1201_v40 = vsel %vm1200_vm15, %v1196_v48, %v1671_v10  ;;  %v1202_v11 = vsel %vm1200_vm15, %v1197_v34, %v1672_v20  ;;  %v1509_v20 = vld [vmem:[%s2137_s6] ss:$0 sm:$0xff] }
 0x794   : > { %v1213_v47 = vpack.c.bf16 %v1202_v11, %v1201_v40  ;;  %v1510_v48 = vld [vmem:[%s2138_s7] ss:$0 sm:$0xff] }
 0x796   : > { %1622 = vmatprep.mubr.msk.bf16.mxu0 %vm489_vm11, %v1213_v47 }
 0x797   : > { %1623 = vmatmul.mubr.msk.bf16.vlgmr.msra.gmra.mrb[16].mxu0 %vm489_vm11, %v1214_v37 }
 0x86a   : > { %v1624_v12 = vpop.f32.mrb[16].mxu0 }
 0x86b   : > { %v1267_v46 = vpop.f32.mrb[17].mxu0  ;;  %v1284_v45 = vadd.f32 %v1624_v12, %v1207_v53 }
 0x86c   : > { %v1282_v13 = vadd.f32 %v1267_v46, %v1205_v44  ;;  %v1625_v14 = vpop.f32.mrb[18].mxu0 }
 0x86d   : > { %v1270_v16 = vpop.f32.mrb[19].mxu0  ;;  %v1285_v39 = vadd.f32 %v1625_v14, %v1208_v15  ;;  %v1295_v1 = vadd.f32 %v1508_v43, %v1284_v45 }
 0x86e   : > { %v1283_v19 = vadd.f32 %v1270_v16, %v1206_v36  ;;  %v1293_v0 = vadd.f32 %v1508_v43, %v1282_v13 }
 0x86f   : > { %v1305_v24 = vsel %vm489_vm11, %v1295_v1, 0.0  ;;  %v1296_v25 = vadd.f32 %v1508_v43, %v1285_v39 }
 0x870   : > { %v1299_v21 = vsel %vm489_vm11, %v1293_v0, 0.0  ;;  %v1294_v22 = vadd.f32 %v1508_v43, %v1283_v19 }
 0x871   : > { %1300 = vadd.xlane.f32.xlu0 %v1299_v21  ;;  %v1308_v3 = vsel %vm489_vm11, %v1296_v25, 0.0 }
 0x872   : > { %v1302_v5 = vsel %vm489_vm11, %v1294_v22, 0.0 }
 0x873   : > { %1303 = vadd.xlane.f32.xlu1 %v1302_v5 }
 0x875   : > { %1306 = vadd.xlane.f32.xlu0 %v1305_v24 }
 0x879   : > { %1309 = vadd.xlane.f32.xlu0 %v1308_v3 }
 0x8fe   : > { %v1301_v26 = vpop.xlane.xlu0 %1300 }
 0x8ff   : > { %v1312_v27 = vmul.f32 0.03125, %v1301_v26 }
 0x900   : > { %v1304_v28 = vpop.xlane.xlu1 %1303 }
 0x901   : > { %v1316_v29 = vsub.f32 %v1293_v0, %v1312_v27  ;;  %v1313_v30 = vmul.f32 0.03125, %v1304_v28 }
 0x902   : > { %v1307_v31 = vpop.xlane.xlu0 %1306 }
 0x903   : > { %v1317_v32 = vsub.f32 %v1294_v22, %v1313_v30  ;;  %v1314_v35 = vmul.f32 0.03125, %v1307_v31  ;;  %v1320_v38 = vmul.f32 %v1316_v29, %v1316_v29 }
 0x905   : > { %v1318_v41 = vsub.f32 %v1295_v1, %v1314_v35  ;;  %v1324_v42 = vsel %vm489_vm11, %v1320_v38, 0.0  ;;  %v1321_v55 = vmul.f32 %v1317_v32, %v1317_v32 }
 0x906   : > { %1325 = vadd.xlane.f32.xlu0 %v1324_v42  ;;  %v1310_v56 = vpop.xlane.xlu0 %1309 }
 0x907   : > { %v1315_v57 = vmul.f32 0.03125, %v1310_v56  ;;  %v1327_v49 = vsel %vm489_vm11, %v1321_v55, 0.0  ;;  %v1322_v58 = vmul.f32 %v1318_v41, %v1318_v41 }
 0x908   : > { %1328 = vadd.xlane.f32.xlu1 %v1327_v49 }
 0x909   : > { %v1319_v51 = vsub.f32 %v1296_v25, %v1315_v57  ;;  %v1330_v63 = vsel %vm489_vm11, %v1322_v58, 0.0 }
 0x90a   : > { %1331 = vadd.xlane.f32.xlu0 %v1330_v63 }
 0x90b   : > { %v1323_v2 = vmul.f32 %v1319_v51, %v1319_v51 }
 0x90d   : > { %v1333_v52 = vsel %vm489_vm11, %v1323_v2, 0.0 }
 0x90e   : > { %1334 = vadd.xlane.f32.xlu1 %v1333_v52 }
 0x993   : > { %v1326_v4 = vpop.xlane.xlu0 %1325 }
 0x994   : > { %v1336_v50 = vmul.f32 0.03125, %v1326_v4 }
 0x995   : > { %v1329_v6 = vpop.xlane.xlu1 %1328 }
 0x996   : > { %v1340_v7 = vadd.f32 1e-05, %v1336_v50  ;;  %v1337_v8 = vmul.f32 0.03125, %v1329_v6 }
 0x997   : > { %v1332_v17 = vpop.xlane.xlu0 %1331 }
 0x998   : > { %1750 = vrsqrt.f32 %v1340_v7  ;;  %v1341_v9 = vadd.f32 1e-05, %v1337_v8  ;;  %v1338_v60 = vmul.f32 0.03125, %v1332_v17 }
 0x99a   : > { %1752 = vrsqrt.f32 %v1341_v9  ;;  %v1342_v62 = vadd.f32 1e-05, %v1338_v60 }
 0x99b   : > { %v1335_v18 = vpop.xlane.xlu1 %1334 }
 0x99c   : > { %1754 = vrsqrt.f32 %v1342_v62  ;;  %v1339_v23 = vmul.f32 0.03125, %v1335_v18 }
 0x99e   : > { %v1343_v59 = vadd.f32 1e-05, %v1339_v23 }
 0x9a0   : > { %1756 = vrsqrt.f32 %v1343_v59 }
 0x9a2   : > { %v1751_v61 = vpop.eup %1750 }
 0x9a3   : > { %v1348_v10 = vmul.f32 %v1751_v61, %v1316_v29 }
 0x9a4   : > { %v1753_v34 = vpop.eup %1752 }
 0x9a5   : > { %v1358_v33 = vmul.f32 %v1509_v20, %v1348_v10  ;;  %v1349_v54 = vmul.f32 %v1753_v34, %v1317_v32 }
 0x9a6   : > { %v1755_v37 = vpop.eup %1754 }
 0x9a7   : > { %v1368_v40 = vadd.f32 %v1510_v48, %v1358_v33  ;;  %v1359_v11 = vmul.f32 %v1509_v20, %v1349_v54  ;;  %v1350_v47 = vmul.f32 %v1755_v37, %v1318_v41 }
 0x9a9   : > { %1372 = vst.msk [vmem:[%s365_s19] sm:$0xff] %vm489_vm11, %v1368_v40  ;;  %v1369_v53 = vadd.f32 %v1510_v48, %v1359_v11  ;;  %v1360_v44 = vmul.f32 %v1509_v20, %v1350_v47 }
 0x9aa   : > { %v1757_v12 = vpop.eup %1756 }
 0x9ab   : > { %1373 = vst.msk [vmem:[%s365_s19 + $0x8] sm:$0xff] %vm489_vm11, %v1369_v53  ;;  %v1370_v46 = vadd.f32 %v1510_v48, %v1360_v44  ;;  %v1351_v36 = vmul.f32 %v1757_v12, %v1319_v51 }
 0x9ad   : > { %1374 = vst.msk [vmem:[%s365_s19 + $0x10] sm:$0xff] %vm489_vm11, %v1370_v46  ;;  %v1361_v43 = vmul.f32 %v1509_v20, %v1351_v36 }
 0x9af   : > { %v1371_v45 = vadd.f32 %v1510_v48, %v1361_v43 }
 0x9b1   : > { %1375 = vst.msk [vmem:[%s365_s19 + $0x18] sm:$0xff] %vm489_vm11, %v1371_v45 }
 0x9b2 PF: > { %s18_s27 = sadd.s32 1, %s1764_s27  }
 0x9b3   : > { %p15_p4 = scmp.ge.s32.totalorder %s18_s27, 4  }
 0x9b5   :  { %17 = sbr.rel (!%p15_p4) target bundleno = 1 (0x1), region = 91 }

// kernel: fwd.23
= control target key start
LH: loop header
LB: loop body
LE: loop exit
PB: predicated region body
PF: predicated region fallthrough
CT: control target
= control target key end

     0   :  { %v109_v0 = vmov 0.0   ;;  %vm110_vm0 = vmmov 0   ;;  %vm40_vm1 = vcmask 261120   ;;  %vm84_vm2 = vcmask 23552   ;;  %s146_s1 = inlined_call_operand.vmem [shape: bf16[32,3], index: 1, kind: input, shape index: {}]   ;;  %s147_s0 = inlined_call_operand.vmem [shape: f32[8,32], index: 0, kind: input, shape index: {}]   ;;  %s148_s2 = inlined_call_operand.vmem [shape: f32[1,3], index: 2, kind: input, shape index: {}]   ;;  %s149_s3 = inlined_call_operand.vmem [shape: f32[8,3], index: 3, kind: output, shape index: {}]  }
   0x1   :  { %97 = vmatprep.subr.bf16.mxu0 %v109_v0  ;;  %v107_v1 = vld [vmem:[%s146_s1] sm:$0xff]   ;;  %101 = vmatprep.mubr.msk.bf16.mxu0 %vm110_vm0, %v109_v0  ;;  %v108_v2 = vld [vmem:[%s146_s1 + $0x8] sm:$0xff]  }
   0x2   :  { %98 = vmatpush3.bf16.msra.mxu0 %v107_v1  ;;  %v15_v3 = vld [vmem:[%s147_s0] sm:$0xff] }
   0x3   :  { %99 = vmatprep.subr.bf16.mxu0 %v109_v0  ;;  %v20_v4 = vpack.c.bf16 %v15_v3, %v15_v3  ;;  %v90_v5 = vld [vmem:[%s148_s2] ss:$0 sm:$0xff] }
   0x6   :  { %100 = vmatpush3.bf16.msra.mxu0 %v108_v2 }
   0x9   :  { %102 = vmatmul.mubr.msk.bf16.vlgmr.msra.gmra.mrb[0].mxu0 %vm40_vm1, %v20_v4 }
  0xdc   :  { %v78_v6 = vpop.f32.mrb[0].mxu0 }
  0xdd   :  { %v79_v7 = vadd.f32 %v90_v5, %v78_v6  ;;  %v103_v8 = vpop.f32.mrb[1].mxu0 }
  0xde   :  { %v81_v9 = vpop.f32.mrb[2].mxu0 }
  0xdf   :  { %85 = vst.msk [vmem:[%s149_s3] sm:$0xff] %vm84_vm2, %v79_v7  ;;  %v104_v10 = vpop.f32.mrb[3].mxu0 }

// kernel: fwd.17
= control target key start
LH: loop header
LB: loop body
LE: loop exit
PB: predicated region body
PF: predicated region fallthrough
CT: control target
= control target key end

     0   :  { %v24_v0 = vlaneseq  ;;  %v1743_v1 = vmov 0.0   ;;  %vm1744_vm0 = vmmov 0   ;;  %vm63_vm2 = vcmask 261120   ;;  %s2145_s2 = inlined_call_operand.vmem [shape: bf16[32,64], index: 2, kind: input, shape index: {}]   ;;  %s2146_s0 = inlined_call_operand.vmem [shape: f32[8,8,32], index: 0, kind: input, shape index: {}]   ;;  %s2147_s1 = inlined_call_operand.vmem [shape: f32[8,1,32], index: 1, kind: input, shape index: {}]   ;;  %s2148_s4 = inlined_call_operand.vmem [shape: bf16[64,32], index: 4, kind: input, shape index: {}]   ;;  %s2149_s3 = inlined_call_operand.vmem [shape: f32[1,64], index: 3, kind: input, shape index: {}]   ;;  %s2150_s5 = inlined_call_operand.vmem [shape: f32[1,32], index: 5, kind: input, shape index: {}]   ;;  %s2151_s6 = inlined_call_operand.vmem [shape: f32[8,8,32], index: 6, kind: output, shape index: {}]  }
   0x1   :  { %1533 = vmatprep.subr.bf16.mxu1 %v1743_v1  ;;  %1553 = vmatprep.subr.bf16.mxu0 %v1743_v1  ;;  %v1695_v2 = vld [vmem:[%s2145_s2] sm:$0xff]   ;;  %v1697_v5 = vld [vmem:[%s2145_s2 + $0x8] sm:$0xff]   ;;  %v1703_v21 = vld [vmem:[%s2148_s4 + $0x10] sm:$0xff]   ;;  %vm149_vm3 = vcmask 523264  }
   0x2   :  { %v1696_v3 = vld [vmem:[%s2145_s2] sm:$0xff]   ;;  %1537 = vmatprep.mubr.msk.bf16.mxu1 %vm1744_vm0, %v1743_v1  ;;  %1557 = vmatprep.mubr.msk.bf16.mxu0 %vm1744_vm0, %v1743_v1  ;;  %v1792_v4 = vshrl.u32 %v24_v0, 7  ;;  %v1698_v6 = vld [vmem:[%s2145_s2 + $0x8] sm:$0xff]   ;;  %v1704_v22 = vld [vmem:[%s2148_s4 + $0x10] sm:$0xff]  }
   0x3   :  { %1534 = vmatpush3.bf16.msra.mxu1 %v1695_v2  ;;  %1554 = vmatpush3.bf16.msra.mxu0 %v1696_v3  ;;  %v27_v7 = vld [vmem:[%s2146_s0] sm:$0xff]  ;;  %v1371_v9 = vld [vmem:[%s2146_s0 + $0x8] sm:$0xff]  ;;  %v1705_v23 = vld [vmem:[%s2148_s4 + $0x18] sm:$0xff]  }
   0x4   :  { %1535 = vmatprep.subr.bf16.mxu1 %v1743_v1  ;;  %1555 = vmatprep.subr.bf16.mxu0 %v1743_v1  ;;  %vm26_vm1 = vcmp.eq.s32.totalorder %v1792_v4, 5  ;;  %v1360_v8 = vld [vmem:[%s2147_s1] ss:$0 sm:$0xff]  ;;  %v1373_v11 = vld [vmem:[%s2147_s1 + $0x1] ss:$0 sm:$0xff]  ;;  %v1701_v19 = vld [vmem:[%s2148_s4 + $0x8] sm:$0xff]  }
   0x5   :  { %v35_v10 = vadd.f32 %v1360_v8, %v27_v7  ;;  %v204_v12 = vadd.f32 %v1373_v11, %v1371_v9  ;;  %v1699_v14 = vld [vmem:[%s2148_s4] sm:$0xff]   ;;  %v1702_v20 = vld [vmem:[%s2148_s4 + $0x8] sm:$0xff]   ;;  %v1706_v24 = vld [vmem:[%s2148_s4 + $0x18] sm:$0xff]  }
   0x6   :  { %v1700_v17 = vld [vmem:[%s2148_s4] sm:$0xff]   ;;  %v1385_v36 = vld [vmem:[%s2146_s0 + $0x10] sm:$0xff]  ;;  %v1399_v40 = vld [vmem:[%s2146_s0 + $0x18] sm:$0xff] }
   0x7   :  { %1536 = vmatpush3.bf16.msra.mxu1 %v1697_v5  ;;  %1556 = vmatpush3.bf16.msra.mxu0 %v1698_v6  ;;  %v38_v13 = vsel %vm26_vm1, %v35_v10, %v27_v7  ;;  %v205_v16 = vsel %vm26_vm1, %v204_v12, %v1371_v9  ;;  %v1862_v25 = vld [vmem:[%s2149_s3] ss:$0 sm:$0xff]  ;;  %v1387_v37 = vld [vmem:[%s2147_s1 + $0x2] ss:$0 sm:$0xff]  ;;  %v1401_v41 = vld [vmem:[%s2147_s1 + $0x3] ss:$0 sm:$0xff] }
   0x8   :  { %1541 = vmatprep.subr.bf16.mxu1 %v1743_v1  ;;  %v43_v15 = vpack.c.bf16 %v38_v13, %v38_v13  ;;  %1561 = vmatprep.subr.bf16.mxu0 %v1743_v1  ;;  %v210_v18 = vpack.c.bf16 %v205_v16, %v205_v16  ;;  %v1707_v44 = vld [vmem:[%s2145_s2] sm:$0xff]   ;;  %v370_v45 = vadd.f32 %v1387_v37, %v1385_v36  ;;  %v1709_v50 = vld [vmem:[%s2145_s2 + $0x8] sm:$0xff]   ;;  %v1715_v60 = vld [vmem:[%s2148_s4 + $0x10] sm:$0xff]  }
   0x9   :  { %v1708_v47 = vld [vmem:[%s2145_s2] sm:$0xff]   ;;  %v536_v48 = vadd.f32 %v1401_v41, %v1399_v40  ;;  %v1710_v52 = vld [vmem:[%s2145_s2 + $0x8] sm:$0xff]   ;;  %v1716_v61 = vld [vmem:[%s2148_s4 + $0x10] sm:$0xff]  }
   0xa   :  { %1538 = vmatmul.mubr.msk.bf16.vlgmr.msra.gmra.mrb[0].mxu1 %vm63_vm2, %v43_v15  ;;  %1558 = vmatmul.mubr.msk.bf16.vlgmr.msra.gmra.mrb[0].mxu0 %vm63_vm2, %v210_v18  ;;  %v371_v51 = vsel %vm26_vm1, %v370_v45, %v1385_v36  ;;  %v1711_v56 = vld [vmem:[%s2148_s4] sm:$0xff]   ;;  %v1713_v58 = vld [vmem:[%s2148_s4 + $0x8] sm:$0xff]   ;;  %v1717_v62 = vld [vmem:[%s2148_s4 + $0x18] sm:$0xff]  }
   0xb   :  { %1542 = vmatpush3.bf16.msra.mxu1 %v1699_v14  ;;  %1562 = vmatpush3.bf16.msra.mxu0 %v1700_v17  ;;  %v537_v53 = vsel %vm26_vm1, %v536_v48, %v1399_v40  ;;  %v376_v54 = vpack.c.bf16 %v371_v51, %v371_v51  ;;  %v1712_v57 = vld [vmem:[%s2148_s4] sm:$0xff]   ;;  %v1714_v59 = vld [vmem:[%s2148_s4 + $0x8] sm:$0xff]   ;;  %v1718_v63 = vld [vmem:[%s2148_s4 + $0x18] sm:$0xff]  }
   0xc   :  { %1543 = vmatprep.subr.bf16.mxu1 %v1743_v1  ;;  %1563 = vmatprep.subr.bf16.mxu0 %v1743_v1  ;;  %v542_v55 = vpack.c.bf16 %v537_v53, %v537_v53  ;;  %v1945_v0 = vld [vmem:[%s2150_s5] ss:$0 sm:$0xff]  ;;  %v1722_v40 = vld [vmem:[%s2145_s2 + $0x8] sm:$0xff]   ;;  %v1727_v48 = vld [vmem:[%s2148_s4 + $0x10] sm:$0xff]  }
   0xd   :  { %1549 = vmatprep.mubr.msk.bf16.mxu1 %vm1744_vm0, %v1743_v1  ;;  %1569 = vmatprep.mubr.msk.bf16.mxu0 %vm1744_vm0, %v1743_v1  ;;  %v1724_v45 = vld [vmem:[%s2148_s4] sm:$0xff]   ;;  %v1730_v51 = vld [vmem:[%s2148_s4 + $0x18] sm:$0xff]  }
   0xe   :  { %v1735_v4 = vld [vmem:[%s2148_s4] sm:$0xff]  }
   0xf   :  { %1544 = vmatpush3.bf16.msra.mxu1 %v1701_v19  ;;  %1564 = vmatpush3.bf16.msra.mxu0 %v1702_v20 }
  0x10   :  { %1545 = vmatprep.subr.bf16.mxu1 %v1743_v1  ;;  %1565 = vmatprep.subr.bf16.mxu0 %v1743_v1 }
  0x13   :  { %1546 = vmatpush3.bf16.msra.mxu1 %v1703_v21  ;;  %1566 = vmatpush3.bf16.msra.mxu0 %v1704_v22 }
  0x14   :  { %1547 = vmatprep.subr.bf16.mxu1 %v1743_v1  ;;  %1567 = vmatprep.subr.bf16.mxu0 %v1743_v1 }
  0x17   :  { %1548 = vmatpush3.bf16.msra.mxu1 %v1705_v23  ;;  %1568 = vmatpush3.bf16.msra.mxu0 %v1706_v24  ;;  %v1413_v23 = vld [vmem:[%s2146_s0 + $0x20] sm:$0xff] }
  0x18   :  { %1573 = vmatprep.subr.bf16.mxu1 %v1743_v1  ;;  %1593 = vmatprep.subr.bf16.mxu0 %v1743_v1  ;;  %v1415_v24 = vld [vmem:[%s2147_s1 + $0x4] ss:$0 sm:$0xff] }
  0xdd   :  { %v101_v26 = vpop.f32.mrb[0].mxu1  ;;  %v267_v28 = vpop.f32.mrb[0].mxu0 }
  0xde   :  { %v102_v27 = vadd.f32 %v1862_v25, %v101_v26  ;;  %v1539_v29 = vpop.f32.mrb[1].mxu1  ;;  %v268_v30 = vadd.f32 %v1862_v25, %v267_v28  ;;  %v1559_v31 = vpop.f32.mrb[1].mxu0  ;;  %v1427_v28 = vld [vmem:[%s2146_s0 + $0x28] sm:$0xff] }
  0xdf   :  { %v104_v32 = vpop.f32.mrb[2].mxu1  ;;  %v270_v34 = vpop.f32.mrb[2].mxu0  ;;  %v1429_v29 = vld [vmem:[%s2147_s1 + $0x5] ss:$0 sm:$0xff] }
  0xe0   :  { %v107_v33 = vmax.f32 %v102_v27, 0.0  ;;  %v1540_v35 = vpop.f32.mrb[3].mxu1  ;;  %v273_v38 = vmax.f32 %v268_v30, 0.0  ;;  %v1560_v39 = vpop.f32.mrb[3].mxu0  ;;  %v1719_v32 = vld [vmem:[%s2145_s2] sm:$0xff]   ;;  %v868_v36 = vadd.f32 %v1429_v29, %v1427_v28 }
  0xe1   :  { %v1720_v35 = vld [vmem:[%s2145_s2] sm:$0xff]  }
  0xe2   :  { %v108_v42 = vmul.f32 2.0, %v107_v33  ;;  %v274_v43 = vmul.f32 2.0, %v273_v38  ;;  %v702_v33 = vadd.f32 %v1415_v24, %v1413_v23  ;;  %v1721_v38 = vld [vmem:[%s2145_s2 + $0x8] sm:$0xff]   ;;  %v869_v41 = vsel %vm26_vm1, %v868_v36, %v1427_v28  ;;  %v1740_v36 = vld [vmem:[%s2148_s4 + $0x10] sm:$0xff]  }
  0xe3   :  { %v1734_v28 = vld [vmem:[%s2145_s2 + $0x8] sm:$0xff]  }
  0xe4   :  { %v117_v46 = vpack.c.bf16 %v108_v42, %v108_v42  ;;  %v283_v49 = vpack.c.bf16 %v274_v43, %v274_v43  ;;  %v703_v39 = vsel %vm26_vm1, %v702_v33, %v1413_v23  ;;  %v874_v43 = vpack.c.bf16 %v869_v41, %v869_v41  ;;  %v1737_v33 = vld [vmem:[%s2148_s4 + $0x8] sm:$0xff]  }
  0xe5   :  { %v708_v42 = vpack.c.bf16 %v703_v39, %v703_v39 }
  0xe6   :  { %1550 = vmatmul.mubr.msk.bf16.vlgmr.msra.gmra.mrb[4].mxu1 %vm149_vm3, %v117_v46  ;;  %1570 = vmatmul.mubr.msk.bf16.vlgmr.msra.gmra.mrb[4].mxu0 %vm149_vm3, %v283_v49  ;;  %v1725_v46 = vld [vmem:[%s2148_s4 + $0x8] sm:$0xff]   ;;  %v1728_v49 = vld [vmem:[%s2148_s4 + $0x10] sm:$0xff]  }
  0xe7   :  { %1574 = vmatpush3.bf16.msra.mxu1 %v1707_v44  ;;  %1594 = vmatpush3.bf16.msra.mxu0 %v1708_v47  ;;  %v1723_v44 = vld [vmem:[%s2148_s4] sm:$0xff]   ;;  %v1726_v47 = vld [vmem:[%s2148_s4 + $0x8] sm:$0xff]  }
  0xe8   :  { %1575 = vmatprep.subr.bf16.mxu1 %v1743_v1  ;;  %1595 = vmatprep.subr.bf16.mxu0 %v1743_v1 }
  0xe9   :  { %1577 = vmatprep.mubr.msk.bf16.mxu1 %vm1744_vm0, %v1743_v1  ;;  %1597 = vmatprep.mubr.msk.bf16.mxu0 %vm1744_vm0, %v1743_v1 }
  0xeb   :  { %1576 = vmatpush3.bf16.msra.mxu1 %v1709_v50  ;;  %1596 = vmatpush3.bf16.msra.mxu0 %v1710_v52  ;;  %v1729_v50 = vld [vmem:[%s2148_s4 + $0x18] sm:$0xff]  }
  0xec   :  { %1581 = vmatprep.subr.bf16.mxu1 %v1743_v1  ;;  %1601 = vmatprep.subr.bf16.mxu0 %v1743_v1 }
  0xee   :  { %1578 = vmatmul.mubr.msk.bf16.vlgmr.msra.gmra.mrb[8].mxu1 %vm63_vm2, %v376_v54  ;;  %1598 = vmatmul.mubr.msk.bf16.vlgmr.msra.gmra.mrb[8].mxu0 %vm63_vm2, %v542_v55 }
  0xef   :  { %1589 = vmatprep.mubr.msk.bf16.mxu1 %vm1744_vm0, %v1743_v1  ;;  %1609 = vmatprep.mubr.msk.bf16.mxu0 %vm1744_vm0, %v1743_v1 }
  0xf0   :  { %1582 = vmatpush3.bf16.msra.mxu1 %v1711_v56  ;;  %1602 = vmatpush3.bf16.msra.mxu0 %v1712_v57 }
  0xf1   :  { %1583 = vmatprep.subr.bf16.mxu1 %v1743_v1  ;;  %1603 = vmatprep.subr.bf16.mxu0 %v1743_v1 }
  0xf4   :  { %1584 = vmatpush3.bf16.msra.mxu1 %v1713_v58  ;;  %1604 = vmatpush3.bf16.msra.mxu0 %v1714_v59 }
  0xf5   :  { %1585 = vmatprep.subr.bf16.mxu1 %v1743_v1  ;;  %1605 = vmatprep.subr.bf16.mxu0 %v1743_v1 }
  0xf8   :  { %1586 = vmatpush3.bf16.msra.mxu1 %v1715_v60  ;;  %1606 = vmatpush3.bf16.msra.mxu0 %v1716_v61 }
  0xf9   :  { %1587 = vmatprep.subr.bf16.mxu1 %v1743_v1  ;;  %1607 = vmatprep.subr.bf16.mxu0 %v1743_v1 }
  0xfc   :  { %1588 = vmatpush3.bf16.msra.mxu1 %v1717_v62  ;;  %1608 = vmatpush3.bf16.msra.mxu0 %v1718_v63 }
  0xfd   :  { %1613 = vmatprep.subr.bf16.mxu1 %v1743_v1  ;;  %1633 = vmatprep.subr.bf16.mxu0 %v1743_v1 }
 0x1b9   :  { %v187_v2 = vpop.f32.mrb[4].mxu1  ;;  %v352_v5 = vpop.f32.mrb[4].mxu0 }
 0x1ba   :  { %v188_v3 = vadd.f32 %v1945_v0, %v187_v2  ;;  %v1551_v6 = vpop.f32.mrb[5].mxu1  ;;  %v353_v7 = vadd.f32 %v1945_v0, %v352_v5  ;;  %v1571_v8 = vpop.f32.mrb[5].mxu0 }
 0x1bb   :  { %v190_v9 = vpop.f32.mrb[6].mxu1  ;;  %v355_v10 = vpop.f32.mrb[6].mxu0 }
 0x1bc   :  { %193 = vst.msk [vmem:[%s2151_s6] sm:$0xff] %vm63_vm2, %v188_v3  ;;  %v1552_v11 = vpop.f32.mrb[7].mxu1  ;;  %1384 = vst.msk [vmem:[%s2151_s6 + $0x8] sm:$0xff] %vm63_vm2, %v353_v7  ;;  %v1572_v12 = vpop.f32.mrb[7].mxu0 }
 0x1bd   :  { %v1441_v11 = vld [vmem:[%s2146_s0 + $0x30] sm:$0xff]  ;;  %v1443_v12 = vld [vmem:[%s2147_s1 + $0x6] ss:$0 sm:$0xff] }
 0x1c1   :  { %v433_v13 = vpop.f32.mrb[8].mxu1  ;;  %v599_v15 = vpop.f32.mrb[8].mxu0 }
 0x1c2   :  { %v434_v14 = vadd.f32 %v1862_v25, %v433_v13  ;;  %v1579_v16 = vpop.f32.mrb[9].mxu1  ;;  %v600_v17 = vadd.f32 %v1862_v25, %v599_v15  ;;  %v1599_v18 = vpop.f32.mrb[9].mxu0  ;;  %v1455_v15 = vld [vmem:[%s2146_s0 + $0x38] sm:$0xff] }
 0x1c3   :  { %v436_v19 = vpop.f32.mrb[10].mxu1  ;;  %v602_v21 = vpop.f32.mrb[10].mxu0  ;;  %v1457_v16 = vld [vmem:[%s2147_s1 + $0x7] ss:$0 sm:$0xff] }
 0x1c4   :  { %v439_v20 = vmax.f32 %v434_v14, 0.0  ;;  %v1580_v22 = vpop.f32.mrb[11].mxu1  ;;  %v605_v26 = vmax.f32 %v600_v17, 0.0  ;;  %v1600_v27 = vpop.f32.mrb[11].mxu0  ;;  %v1731_v19 = vld [vmem:[%s2145_s2] sm:$0xff]   ;;  %v1200_v23 = vadd.f32 %v1457_v16, %v1455_v15 }
 0x1c5   :  { %v1732_v22 = vld [vmem:[%s2145_s2] sm:$0xff]  }
 0x1c6   :  { %v440_v30 = vmul.f32 2.0, %v439_v20  ;;  %v606_v31 = vmul.f32 2.0, %v605_v26  ;;  %v1034_v20 = vadd.f32 %v1443_v12, %v1441_v11  ;;  %v1733_v26 = vld [vmem:[%s2145_s2 + $0x8] sm:$0xff]   ;;  %v1201_v29 = vsel %vm26_vm1, %v1200_v23, %v1455_v15 }
 0x1c8   :  { %v449_v34 = vpack.c.bf16 %v440_v30, %v440_v30  ;;  %v615_v37 = vpack.c.bf16 %v606_v31, %v606_v31  ;;  %v1035_v27 = vsel %vm26_vm1, %v1034_v20, %v1441_v11  ;;  %v1206_v31 = vpack.c.bf16 %v1201_v29, %v1201_v29 }
 0x1c9   :  { %v1040_v30 = vpack.c.bf16 %v1035_v27, %v1035_v27 }
 0x1ca   :  { %1590 = vmatmul.mubr.msk.bf16.vlgmr.msra.gmra.mrb[12].mxu1 %vm149_vm3, %v449_v34  ;;  %1610 = vmatmul.mubr.msk.bf16.vlgmr.msra.gmra.mrb[12].mxu0 %vm149_vm3, %v615_v37  ;;  %v1738_v34 = vld [vmem:[%s2148_s4 + $0x8] sm:$0xff]   ;;  %v1741_v37 = vld [vmem:[%s2148_s4 + $0x18] sm:$0xff]  }
 0x1cb   :  { %1614 = vmatpush3.bf16.msra.mxu1 %v1719_v32  ;;  %1634 = vmatpush3.bf16.msra.mxu0 %v1720_v35  ;;  %v1736_v32 = vld [vmem:[%s2148_s4] sm:$0xff]   ;;  %v1739_v35 = vld [vmem:[%s2148_s4 + $0x10] sm:$0xff]  }
 0x1cc   :  { %1615 = vmatprep.subr.bf16.mxu1 %v1743_v1  ;;  %1635 = vmatprep.subr.bf16.mxu0 %v1743_v1 }
 0x1cd   :  { %1617 = vmatprep.mubr.msk.bf16.mxu1 %vm1744_vm0, %v1743_v1  ;;  %1637 = vmatprep.mubr.msk.bf16.mxu0 %vm1744_vm0, %v1743_v1 }
 0x1cf   :  { %1616 = vmatpush3.bf16.msra.mxu1 %v1721_v38  ;;  %1636 = vmatpush3.bf16.msra.mxu0 %v1722_v40  ;;  %v1742_v38 = vld [vmem:[%s2148_s4 + $0x18] sm:$0xff]  }
 0x1d0   :  { %1621 = vmatprep.subr.bf16.mxu1 %v1743_v1  ;;  %1641 = vmatprep.subr.bf16.mxu0 %v1743_v1 }
 0x1d2   :  { %1618 = vmatmul.mubr.msk.bf16.vlgmr.msra.gmra.mrb[16].mxu1 %vm63_vm2, %v708_v42  ;;  %1638 = vmatmul.mubr.msk.bf16.vlgmr.msra.gmra.mrb[16].mxu0 %vm63_vm2, %v874_v43 }
 0x1d3   :  { %1629 = vmatprep.mubr.msk.bf16.mxu1 %vm1744_vm0, %v1743_v1  ;;  %1649 = vmatprep.mubr.msk.bf16.mxu0 %vm1744_vm0, %v1743_v1 }
 0x1d4   :  { %1622 = vmatpush3.bf16.msra.mxu1 %v1723_v44  ;;  %1642 = vmatpush3.bf16.msra.mxu0 %v1724_v45 }
 0x1d5   :  { %1623 = vmatprep.subr.bf16.mxu1 %v1743_v1  ;;  %1643 = vmatprep.subr.bf16.mxu0 %v1743_v1 }
 0x1d8   :  { %1624 = vmatpush3.bf16.msra.mxu1 %v1725_v46  ;;  %1644 = vmatpush3.bf16.msra.mxu0 %v1726_v47 }
 0x1d9   :  { %1625 = vmatprep.subr.bf16.mxu1 %v1743_v1  ;;  %1645 = vmatprep.subr.bf16.mxu0 %v1743_v1 }
 0x1dc   :  { %1626 = vmatpush3.bf16.msra.mxu1 %v1727_v48  ;;  %1646 = vmatpush3.bf16.msra.mxu0 %v1728_v49 }
 0x1dd   :  { %1627 = vmatprep.subr.bf16.mxu1 %v1743_v1  ;;  %1647 = vmatprep.subr.bf16.mxu0 %v1743_v1 }
 0x1e0   :  { %1628 = vmatpush3.bf16.msra.mxu1 %v1729_v50  ;;  %1648 = vmatpush3.bf16.msra.mxu0 %v1730_v51 }
 0x1e1   :  { %1653 = vmatprep.subr.bf16.mxu1 %v1743_v1  ;;  %1673 = vmatprep.subr.bf16.mxu0 %v1743_v1 }
 0x29d   :  { %v518_v52 = vpop.f32.mrb[12].mxu1  ;;  %v684_v54 = vpop.f32.mrb[12].mxu0 }
 0x29e   :  { %v519_v53 = vadd.f32 %v1945_v0, %v518_v52  ;;  %v1591_v55 = vpop.f32.mrb[13].mxu1  ;;  %v685_v56 = vadd.f32 %v1945_v0, %v684_v54  ;;  %v1611_v57 = vpop.f32.mrb[13].mxu0 }
 0x29f   :  { %v521_v58 = vpop.f32.mrb[14].mxu1  ;;  %v687_v59 = vpop.f32.mrb[14].mxu0 }
 0x2a0   :  { %1398 = vst.msk [vmem:[%s2151_s6 + $0x10] sm:$0xff] %vm63_vm2, %v519_v53  ;;  %v1592_v60 = vpop.f32.mrb[15].mxu1  ;;  %1412 = vst.msk [vmem:[%s2151_s6 + $0x18] sm:$0xff] %vm63_vm2, %v685_v56  ;;  %v1612_v61 = vpop.f32.mrb[15].mxu0 }
 0x2a5   :  { %v765_v62 = vpop.f32.mrb[16].mxu1  ;;  %v931_v2 = vpop.f32.mrb[16].mxu0 }
 0x2a6   :  { %v766_v63 = vadd.f32 %v1862_v25, %v765_v62  ;;  %v1619_v3 = vpop.f32.mrb[17].mxu1  ;;  %v932_v5 = vadd.f32 %v1862_v25, %v931_v2  ;;  %v1639_v6 = vpop.f32.mrb[17].mxu0 }
 0x2a7   :  { %v768_v7 = vpop.f32.mrb[18].mxu1  ;;  %v934_v9 = vpop.f32.mrb[18].mxu0 }
 0x2a8   :  { %v771_v8 = vmax.f32 %v766_v63, 0.0  ;;  %v1620_v10 = vpop.f32.mrb[19].mxu1  ;;  %v937_v13 = vmax.f32 %v932_v5, 0.0  ;;  %v1640_v14 = vpop.f32.mrb[19].mxu0 }
 0x2aa   :  { %v772_v17 = vmul.f32 2.0, %v771_v8  ;;  %v938_v18 = vmul.f32 2.0, %v937_v13 }
 0x2ac   :  { %v781_v21 = vpack.c.bf16 %v772_v17, %v772_v17  ;;  %v947_v24 = vpack.c.bf16 %v938_v18, %v938_v18 }
 0x2ae   :  { %1630 = vmatmul.mubr.msk.bf16.vlgmr.msra.gmra.mrb[20].mxu1 %vm149_vm3, %v781_v21  ;;  %1650 = vmatmul.mubr.msk.bf16.vlgmr.msra.gmra.mrb[20].mxu0 %vm149_vm3, %v947_v24 }
 0x2af   :  { %1654 = vmatpush3.bf16.msra.mxu1 %v1731_v19  ;;  %1674 = vmatpush3.bf16.msra.mxu0 %v1732_v22 }
 0x2b0   :  { %1655 = vmatprep.subr.bf16.mxu1 %v1743_v1  ;;  %1675 = vmatprep.subr.bf16.mxu0 %v1743_v1 }
 0x2b1   :  { %1657 = vmatprep.mubr.msk.bf16.mxu1 %vm1744_vm0, %v1743_v1  ;;  %1677 = vmatprep.mubr.msk.bf16.mxu0 %vm1744_vm0, %v1743_v1 }
 0x2b3   :  { %1656 = vmatpush3.bf16.msra.mxu1 %v1733_v26  ;;  %1676 = vmatpush3.bf16.msra.mxu0 %v1734_v28 }
 0x2b4   :  { %1661 = vmatprep.subr.bf16.mxu1 %v1743_v1  ;;  %1681 = vmatprep.subr.bf16.mxu0 %v1743_v1 }
 0x2b6   :  { %1658 = vmatmul.mubr.msk.bf16.vlgmr.msra.gmra.mrb[24].mxu1 %vm63_vm2, %v1040_v30  ;;  %1678 = vmatmul.mubr.msk.bf16.vlgmr.msra.gmra.mrb[24].mxu0 %vm63_vm2, %v1206_v31 }
 0x2b7   :  { %1669 = vmatprep.mubr.msk.bf16.mxu1 %vm1744_vm0, %v1743_v1  ;;  %1689 = vmatprep.mubr.msk.bf16.mxu0 %vm1744_vm0, %v1743_v1 }
 0x2b8   :  { %1662 = vmatpush3.bf16.msra.mxu1 %v1735_v4  ;;  %1682 = vmatpush3.bf16.msra.mxu0 %v1736_v32 }
 0x2b9   :  { %1663 = vmatprep.subr.bf16.mxu1 %v1743_v1  ;;  %1683 = vmatprep.subr.bf16.mxu0 %v1743_v1 }
 0x2bc   :  { %1664 = vmatpush3.bf16.msra.mxu1 %v1737_v33  ;;  %1684 = vmatpush3.bf16.msra.mxu0 %v1738_v34 }
 0x2bd   :  { %1665 = vmatprep.subr.bf16.mxu1 %v1743_v1  ;;  %1685 = vmatprep.subr.bf16.mxu0 %v1743_v1 }
 0x2c0   :  { %1666 = vmatpush3.bf16.msra.mxu1 %v1739_v35  ;;  %1686 = vmatpush3.bf16.msra.mxu0 %v1740_v36 }
 0x2c1   :  { %1667 = vmatprep.subr.bf16.mxu1 %v1743_v1  ;;  %1687 = vmatprep.subr.bf16.mxu0 %v1743_v1 }
 0x2c4   :  { %1668 = vmatpush3.bf16.msra.mxu1 %v1741_v37  ;;  %1688 = vmatpush3.bf16.msra.mxu0 %v1742_v38 }
 0x381   :  { %v850_v39 = vpop.f32.mrb[20].mxu1  ;;  %v1016_v41 = vpop.f32.mrb[20].mxu0 }
 0x382   :  { %v851_v40 = vadd.f32 %v1945_v0, %v850_v39  ;;  %v1631_v42 = vpop.f32.mrb[21].mxu1  ;;  %v1017_v43 = vadd.f32 %v1945_v0, %v1016_v41  ;;  %v1651_v44 = vpop.f32.mrb[21].mxu0 }
 0x383   :  { %v853_v45 = vpop.f32.mrb[22].mxu1  ;;  %v1019_v1 = vpop.f32.mrb[22].mxu0 }
 0x384   :  { %1426 = vst.msk [vmem:[%s2151_s6 + $0x20] sm:$0xff] %vm63_vm2, %v851_v40  ;;  %v1632_v46 = vpop.f32.mrb[23].mxu1  ;;  %1440 = vst.msk [vmem:[%s2151_s6 + $0x28] sm:$0xff] %vm63_vm2, %v1017_v43  ;;  %v1652_v47 = vpop.f32.mrb[23].mxu0 }
 0x389   :  { %v1097_v48 = vpop.f32.mrb[24].mxu1  ;;  %v1263_v50 = vpop.f32.mrb[24].mxu0 }
 0x38a   :  { %v1098_v49 = vadd.f32 %v1862_v25, %v1097_v48  ;;  %v1659_v51 = vpop.f32.mrb[25].mxu1  ;;  %v1264_v52 = vadd.f32 %v1862_v25, %v1263_v50  ;;  %v1679_v53 = vpop.f32.mrb[25].mxu0 }
 0x38b   :  { %v1100_v54 = vpop.f32.mrb[26].mxu1  ;;  %v1266_v56 = vpop.f32.mrb[26].mxu0 }
 0x38c   :  { %v1103_v55 = vmax.f32 %v1098_v49, 0.0  ;;  %v1660_v57 = vpop.f32.mrb[27].mxu1  ;;  %v1269_v58 = vmax.f32 %v1264_v52, 0.0  ;;  %v1680_v59 = vpop.f32.mrb[27].mxu0 }
 0x38e   :  { %v1104_v60 = vmul.f32 2.0, %v1103_v55  ;;  %v1270_v61 = vmul.f32 2.0, %v1269_v58 }
 0x390   :  { %v1113_v62 = vpack.c.bf16 %v1104_v60, %v1104_v60  ;;  %v1279_v63 = vpack.c.bf16 %v1270_v61, %v1270_v61 }
 0x392   :  { %1670 = vmatmul.mubr.msk.bf16.vlgmr.msra.gmra.mrb[28].mxu1 %vm149_vm3, %v1113_v62  ;;  %1690 = vmatmul.mubr.msk.bf16.vlgmr.msra.gmra.mrb[28].mxu0 %vm149_vm3, %v1279_v63 }
 0x465   :  { %v1182_v2 = vpop.f32.mrb[28].mxu1  ;;  %v1348_v5 = vpop.f32.mrb[28].mxu0 }
 0x466   :  { %v1183_v3 = vadd.f32 %v1945_v0, %v1182_v2  ;;  %v1671_v25 = vpop.f32.mrb[29].mxu1  ;;  %v1349_v6 = vadd.f32 %v1945_v0, %v1348_v5  ;;  %v1691_v7 = vpop.f32.mrb[29].mxu0 }
 0x467   :  { %v1185_v8 = vpop.f32.mrb[30].mxu1  ;;  %v1351_v9 = vpop.f32.mrb[30].mxu0 }
 0x468   :  { %1454 = vst.msk [vmem:[%s2151_s6 + $0x30] sm:$0xff] %vm63_vm2, %v1183_v3  ;;  %v1672_v10 = vpop.f32.mrb[31].mxu1  ;;  %1468 = vst.msk [vmem:[%s2151_s6 + $0x38] sm:$0xff] %vm63_vm2, %v1349_v6  ;;  %v1692_v11 = vpop.f32.mrb[31].mxu0 }

</bundles_post_ra>
